<compile_context>
chip_gen: v7x
topology: tpu7x:2x2x1
jax: 0.10.0
libtpu: 0.0.40
codegen_flags: <defaults>
</compile_context>

<pallas_src>
import functools

import jax
import jax.numpy as jnp
from jax.experimental import pallas as pl
from jax.experimental.pallas import tpu as pltpu

_SIGMA = 5.0
_BIG = 1e30  # "infinity" used to deactivate padded lanes (exp(-BIG) == 0 exactly)


# --------------------------------------------------------------------------- kernel
def _make_kernel(D, H, K0, K1):
    PW = K0 * H        # padded lane width of per-leaf tensors      (128 here)
    GW = K0 * K1 * H   # lane width of per-(leaf, branch) tensors   (512 here)
    RW = K1 * H        # lane width of per-branch tensors           (128 here)
    NEG_INV_2SIG = -1.0 / (2.0 * _SIGMA)

    def kernel(x_ref, w1_ref, w2_ref, w3_ref, w4_ref, gexp_ref, out_ref):
        f32 = jnp.float32
        mmt = w1_ref.dtype                      # matmul operand dtype (f32 or bf16)
        x = x_ref[...]                          # (TB, D) f32
        x_mm = x.astype(mmt)

        # --- fused matmul #1: RBF cross-terms + all K0 leaf-cell pre-activations ---
        pre1 = jnp.dot(x_mm, w1_ref[:D, :], preferred_element_type=f32)   # (TB, 2*PW)
        pre1 = pre1 + w1_ref[D:D + 1, :].astype(f32)                      # fused bias row
        xc = pre1[:, :PW]        # lane i<K0: ||c_i||^2 - 2 x.c_i ; padded lanes: +BIG
        leaf_pre = pre1[:, PW:]  # (TB, PW): per-leaf tanh pre-activations

        # RBF soft assignment over the K0 centers (exact divide; padded lanes -> 0)
        x_sq = jnp.sum(x * x, axis=-1, keepdims=True)                     # (TB, 1)
        dist = jnp.maximum(x_sq + xc, 0.0)                                # ||x - c_i||^2
        dist = dist - jnp.min(dist, axis=-1, keepdims=True)               # stabilization
        e = jnp.exp(dist * NEG_INV_2SIG)
        assign = e / jnp.sum(e, axis=-1, keepdims=True)                   # (TB, PW)

        u_leaf = jnp.tanh(leaf_pre)                                       # (TB, PW)
        # expand per-leaf scalars to H lanes with a tiny MXU matmul (rows >=K0 are 0)
        c_leaf = jnp.dot(assign.astype(mmt), w3_ref[:PW, :],
                         preferred_element_type=f32) * u_leaf             # (TB, PW)

        # --- fused matmul #2: all K0*K1 gate logits + all K0*K1 cell pre-activations
        pre2 = jnp.dot(c_leaf.astype(mmt), w2_ref[:PW, :],
                       preferred_element_type=f32)                        # (TB, PW+GW)
        pre2 = pre2 + w2_ref[PW:PW + 1, :].astype(f32)
        gates = pre2[:, :PW]     # lanes < K0*K1 real, padded lanes ~ -BIG
        u_nl_pre = pre2[:, PW:]  # (TB, GW)

        # grouped softmax over the K1 branches of each leaf (row-wide max is
        # constant within each group, so it is a valid stabilizer)
        gates = gates - jnp.max(gates, axis=-1, keepdims=True)
        ge = jnp.exp(gates)                                               # padded -> 0
        denom = jnp.dot(ge.astype(mmt), w3_ref[PW:2 * PW, :],
                        preferred_element_type=f32)                       # in-group sums
        probs = ge / denom                                                # exact divide

        u_nl = jnp.tanh(u_nl_pre)                                         # (TB, GW)
        weighted = jnp.dot(probs.astype(mmt), gexp_ref[...],
                           preferred_element_type=f32) * u_nl             # (TB, GW)

        # sum over the K0 leaves for each branch (fold matmul keeps lanes dense)
        c_nl = jnp.dot(weighted.astype(mmt), w4_ref[:GW, :],
                       preferred_element_type=f32)                        # (TB, RW)

        # --- root level: block-diagonal matmul + tanh; fold over K1 done by wrapper
        root_pre = jnp.dot(c_nl.astype(mmt), w4_ref[GW:GW + RW, :],
                           preferred_element_type=f32)
        root_pre = root_pre + w4_ref[GW + RW:GW + RW + 1, :].astype(f32)
        out_ref[...] = jnp.tanh(root_pre)                                 # (TB, RW)

    return kernel


# --------------------------------------------------------------- one-time packing
def pack_tree_lstm_params(params, matmul_dtype=jnp.float32):
    """One-time layout plumbing, hoisted out of the per-call path.

    Packs the per-node weights of the TreeLSTM into 4 lane-dense slabs + one
    expansion matrix. Call once; pass the result to tree_lstm_forward.
    Use matmul_dtype=jnp.bfloat16 for the v6e/v7x MXU fast path (f32 accumulation
    is retained inside the kernel).
    """
    f32 = jnp.float32
    centers = jnp.asarray(params["centers"], f32)    # (K0, D)
    leaf_w = jnp.asarray(params["leaf_w"], f32)      # (K0, D, H)
    leaf_b = jnp.asarray(params["leaf_b"], f32)      # (K0, 1, H)
    nl_wi = jnp.asarray(params["nl_wi"], f32)        # (K1, H, 1)
    nl_bi = jnp.asarray(params["nl_bi"], f32)        # (K1, 1, 1)
    nl_wu = jnp.asarray(params["nl_wu"], f32)        # (K1, H, H)
    nl_bu = jnp.asarray(params["nl_bu"], f32)        # (K1, 1, H)
    root_w = jnp.asarray(params["root_w"], f32)      # (H, H)
    root_b = jnp.asarray(params["root_b"], f32)      # (1, H)

    K0, D, H = leaf_w.shape
    K1 = nl_wu.shape[0]
    PW, GW, RW = K0 * H, K0 * K1 * H, K1 * H
    eye_k0 = jnp.eye(K0, dtype=f32)

    # W1: LHS = x. cols [0:PW): -2*center_i in lane i (<K0), zero elsewhere;
    #     cols [PW:): the K0 leaf weight matrices side by side. Last row = biases
    #     (||c_i||^2 for the center part, +BIG in padded lanes; leaf biases after).
    cw = jnp.zeros((D, PW), f32).at[:, :K0].set(-2.0 * centers.T)
    lw = jnp.transpose(leaf_w, (1, 0, 2)).reshape(D, PW)
    csq = jnp.full((1, PW), _BIG, f32).at[0, :K0].set(jnp.sum(centers ** 2, axis=-1))
    lb = leaf_b.reshape(1, PW)
    w1 = jnp.concatenate([jnp.concatenate([cw, lw], axis=1),
                          jnp.concatenate([csq, lb], axis=1)], axis=0)   # (D+1, 2*PW)

    # W2: LHS = c_leaf. cols [0:PW): block-diag gate weights (lane idx*K1+k), padded
    #     with zero cols; cols [PW:): kron(eye_K0, [Wu_0 | ... | Wu_{K1-1}]).
    #     Last row = biases (-BIG in padded gate lanes so their exp underflows to 0).
    gate_w = jnp.kron(eye_k0, nl_wi[:, :, 0].T)                          # (PW, K0*K1)
    gate_w_pad = jnp.zeros((PW, PW), f32).at[:, :K0 * K1].set(gate_w)
    gate_b_pad = jnp.full((1, PW), -_BIG, f32).at[0, :K0 * K1].set(
        jnp.tile(nl_bi.reshape(1, K1), (1, K0))[0])
    wu = jnp.kron(eye_k0, jnp.transpose(nl_wu, (1, 0, 2)).reshape(H, K1 * H))  # (PW, GW)
    bu = jnp.tile(nl_bu.reshape(1, K1 * H), (1, K0))                     # (1, GW)
    w2 = jnp.concatenate([jnp.concatenate([gate_w_pad, wu], axis=1),
                          jnp.concatenate([gate_b_pad, bu], axis=1)], axis=0)  # (PW+1, PW+GW)

    # W3 (PW-wide slab): rows [0:PW) assignment-expansion, rows [PW:2PW) grouped
    #     softmax-denominator fold (padded columns get denom >= 1 -> no 0/0).
    assign_exp = jnp.zeros((PW, PW), f32).at[:K0, :].set(
        jnp.kron(eye_k0, jnp.ones((1, H), f32)))
    soft_sum = jnp.zeros((PW, PW), f32)
    soft_sum = soft_sum.at[:K0 * K1, :K0 * K1].set(
        jnp.kron(eye_k0, jnp.ones((K1, K1), f32)))
    soft_sum = soft_sum.at[:K0 * K1, K0 * K1:].set(1.0)
    w3 = jnp.concatenate([assign_exp, soft_sum], axis=0)                 # (2*PW, PW)

    # W4 (RW-wide slab): rows [0:GW) leaf-fold (sum over K0), rows [GW:GW+RW) the
    #     block-diagonal root weight, last row the tiled root bias.
    leaf_fold = jnp.tile(jnp.eye(RW, dtype=f32), (K0, 1))                # (GW, RW)
    root_blk = jnp.kron(jnp.eye(K1, dtype=f32), root_w)                  # (RW, RW)
    root_bt = jnp.tile(root_b, (1, K1))                                  # (1, RW)
    w4 = jnp.concatenate([leaf_fold, root_blk, root_bt], axis=0)         # (GW+RW+1, RW)

    # gate-probability expansion (rows >= K0*K1 zero; padded probs are 0 anyway)
    gexp = jnp.zeros((PW, GW), f32).at[:K0 * K1, :].set(
        jnp.kron(jnp.eye(K0 * K1, dtype=f32), jnp.ones((1, H), f32)))

    md = matmul_dtype
    return dict(w1=w1.astype(md), w2=w2.astype(md), w3=w3.astype(md),
                w4=w4.astype(md), gate_exp=gexp.astype(md))


# --------------------------------------------------------------------------- wrapper
@functools.partial(jax.jit, static_argnames=("block_b",))
def tree_lstm_forward(x, packed, block_b=256):
    """Batched TreeLSTM forward: each row of x is one independent forward pass."""
    w1, w2, w3, w4, gexp = (packed["w1"], packed["w2"], packed["w3"],
                            packed["w4"], packed["gate_exp"])
    B, D = x.shape
    PW, GW = gexp.shape
    RW = w4.shape[1]
    K0 = GW // RW
    H = PW // K0
    K1 = RW // H

    # batch tile: multiple of 8 sublanes; block_b (>=256 feeds the full v6e/v7x MXU)
    tb = block_b if B >= block_b else max(8, -(-B // 8) * 8)
    b_pad = -(-B // tb) * tb
    if b_pad != B:
        x = jnp.pad(x, ((0, b_pad - B), (0, 0)))   # padded rows are independent junk
    grid = (b_pad // tb,)

    kernel = _make_kernel(D, H, K0, K1)
    const_spec = lambda a: pl.BlockSpec(a.shape, lambda i: (0, 0))  # VMEM-resident

    r = pl.pallas_call(
        kernel,
        out_shape=jax.ShapeDtypeStruct((b_pad, RW), jnp.float32),
        grid=grid,
        in_specs=[
            pl.BlockSpec((tb, D), lambda i: (i, 0)),
            const_spec(w1), const_spec(w2), const_spec(w3), const_spec(w4),
            const_spec(gexp),
        ],
        out_specs=pl.BlockSpec((tb, RW), lambda i: (i, 0)),
        compiler_params=pltpu.CompilerParams(
            dimension_semantics=("parallel",)),   # v7x: shard batch tiles over 2 TCs
    )(x, w1, w2, w3, w4, gexp)

    # lane-dense kernel output (b_pad, K1*H); fold the K1 branches here (layout only)
    root_c = r.reshape(b_pad, K1, H).sum(axis=1)[:B]
    return root_c, root_c   # the module returns (root_c, root_c)


# --------------------------------------------------------------------------- reference
@jax.jit
def tree_lstm_reference(x, p):
    """Vectorized pure-JAX mirror of the PyTorch forward (rows are independent)."""
    sigma = 5.0
    d = x[:, None, :] - p["centers"][None, :, :]                         # (B,K0,D)
    e = jnp.exp(-jnp.sum(d * d, axis=-1) / (2.0 * sigma))                # (B,K0)
    assign = e / jnp.sum(e, axis=-1, keepdims=True)
    u = jnp.tanh(jnp.einsum("bd,kdh->bkh", x, p["leaf_w"]) + p["leaf_b"][:, 0, :][None])
    c_leaf = assign[..., None] * u                                       # (B,K0,H)
    gates = (jnp.einsum("bkh,lh->bkl", c_leaf, p["nl_wi"][:, :, 0])
             + p["nl_bi"][:, 0, 0][None, None, :])                       # (B,K0,K1)
    probs = jax.nn.softmax(gates, axis=-1)
    u_nl = jnp.tanh(jnp.einsum("bkh,lhg->bklg", c_leaf, p["nl_wu"])
                    + p["nl_bu"][:, 0, :][None, None])                   # (B,K0,K1,H)
    c_no_leaf = jnp.sum(probs[..., None] * u_nl, axis=1)                 # (B,K1,H)
    root = jnp.tanh(jnp.einsum("blh,hg->blg", c_no_leaf, p["root_w"])
                    + p["root_b"][0][None, None])
    return jnp.sum(root, axis=1)                                         # (B,H)


# --------------------------------------------------------------------------- demo
if __name__ == "__main__":
    # Module shapes: input_dim=32, tree_hidden_dim=32, cluster_layer_0=cluster_layer_1=4.
    # The original module is batch=1; the kernel applies it row-wise to a batch of
    # independent task rows (512 here so the grid/megacore path is exercised).
    B, D, H, K0, K1 = 512, 32, 32, 4, 4
    key = jax.random.PRNGKey(0)
    ks = jax.random.split(key, 10)
    params = {
        "centers": jax.random.normal(ks[0], (K0, D), jnp.float32),      # cluster_center
        "leaf_w":  jax.random.normal(ks[1], (K0, D, H), jnp.float32),   # leaf_weight_u
        "leaf_b":  jax.random.normal(ks[2], (K0, 1, H), jnp.float32),   # leaf_bias_u
        "nl_wi":   jax.random.normal(ks[3], (K1, H, 1), jnp.float32),   # no_leaf_weight_i
        "nl_bi":   jax.random.normal(ks[4], (K1, 1, 1), jnp.float32),   # no_leaf_bias_i
        "nl_wu":   jax.random.normal(ks[5], (K1, H, H), jnp.float32),   # no_leaf_weight_u
        "nl_bu":   jax.random.normal(ks[6], (K1, 1, H), jnp.float32),   # no_leaf_bias_u
        "root_w":  jax.random.normal(ks[7], (H, H), jnp.float32),       # root_weight_u
        "root_b":  jax.random.normal(ks[8], (1, H), jnp.float32),       # root_bias_u
    }
    x = jax.random.normal(ks[9], (B, D), jnp.float32)

    # pack ONCE (hoisted out of the per-call path), then call the jitted forward.
    packed_f32 = pack_tree_lstm_params(params)
    root_c, root_c_again = tree_lstm_forward(x, packed_f32)
    jax.block_until_ready(root_c)
    assert root_c.shape == (B, H)

    ref = tree_lstm_reference(x, params)
    jax.block_until_ready(ref)
    # tolerance covers default-precision MXU f32 matmuls on both sides
    assert jnp.allclose(root_c, ref, rtol=2e-2, atol=2e-2), (
        f"f32 mismatch: max|err|={float(jnp.max(jnp.abs(root_c - ref)))}")

    # bf16 matmul-operand path (v6e/v7x MXU fast path, f32 accumulation) — loose sanity.
    packed_bf16 = pack_tree_lstm_params(params, matmul_dtype=jnp.bfloat16)
    root_bf16, _ = tree_lstm_forward(x, packed_bf16)
    jax.block_until_ready(root_bf16)
    assert float(jnp.max(jnp.abs(root_bf16 - ref))) < 0.25, "bf16 sanity check failed"

    print("KERNEL_OK")
</pallas_src>

<mosaic_0001>
module attributes {stable_mosaic.version = 11 : i64} {
  func.func @kernel(%arg0: i32, %arg1: memref<256x32xf32, #tpu.memory_space<vmem>>, %arg2: memref<33x256xf32, #tpu.memory_space<vmem>>, %arg3: memref<129x640xf32, #tpu.memory_space<vmem>>, %arg4: memref<256x128xf32, #tpu.memory_space<vmem>>, %arg5: memref<641x128xf32, #tpu.memory_space<vmem>>, %arg6: memref<128x512xf32, #tpu.memory_space<vmem>>, %arg7: memref<256x128xf32, #tpu.memory_space<vmem>>) attributes {dimension_semantics = [#tpu.dimension_semantics<parallel>], iteration_bounds = array<i64: 2>, scalar_prefetch = 0 : i64, scratch_operands = 0 : i64, tpu.core_type = #tpu.core_type<tc>, window_params = [{transform_indices = @transform_0, window_bounds = array<i64: 256, 32>}, {pipeline_mode = #tpu.pipeline_mode<synchronous>, transform_indices = @transform_1, window_bounds = array<i64: 33, 256>}, {pipeline_mode = #tpu.pipeline_mode<synchronous>, transform_indices = @transform_2, window_bounds = array<i64: 129, 640>}, {pipeline_mode = #tpu.pipeline_mode<synchronous>, transform_indices = @transform_3, window_bounds = array<i64: 256, 128>}, {pipeline_mode = #tpu.pipeline_mode<synchronous>, transform_indices = @transform_4, window_bounds = array<i64: 641, 128>}, {pipeline_mode = #tpu.pipeline_mode<synchronous>, transform_indices = @transform_5, window_bounds = array<i64: 128, 512>}, {transform_indices = @transform_6, window_bounds = array<i64: 256, 128>}]} {
    %c0 = arith.constant 0 : index
    %c0_0 = arith.constant 0 : index
    %0 = vector.load %arg1[%c0, %c0_0] : memref<256x32xf32, #tpu.memory_space<vmem>>, vector<256x32xf32>
    %c0_1 = arith.constant 0 : index
    %c0_2 = arith.constant 0 : index
    %1 = vector.load %arg2[%c0_1, %c0_2] : memref<33x256xf32, #tpu.memory_space<vmem>>, vector<32x256xf32>
    %cst = arith.constant dense<0.000000e+00> : vector<256x256xf32>
    %2 = tpu.matmul %0, %1, %cst {dimension_numbers = #tpu.dot_dimension_numbers<[1], [0], [0], [1], [0, 0, 1, 1], [], []>} : vector<256x32xf32>, vector<32x256xf32>, vector<256x256xf32> -> vector<256x256xf32>
    %c32 = arith.constant 32 : index
    %c0_3 = arith.constant 0 : index
    %3 = vector.load %arg2[%c32, %c0_3] : memref<33x256xf32, #tpu.memory_space<vmem>>, vector<1x256xf32>
    %4 = vector.broadcast %3 : vector<1x256xf32> to vector<256x256xf32>
    %5 = arith.addf %2, %4 : vector<256x256xf32>
    %6 = vector.extract_strided_slice %5 {offsets = [0, 0], sizes = [256, 128], strides = [1, 1]} : vector<256x256xf32> to vector<256x128xf32>
    %7 = vector.extract_strided_slice %5 {offsets = [0, 128], sizes = [256, 128], strides = [1, 1]} : vector<256x256xf32> to vector<256x128xf32>
    %8 = arith.mulf %0, %0 : vector<256x32xf32>
    %cst_4 = arith.constant dense<0.000000e+00> : vector<256xf32>
    %9 = vector.multi_reduction <add>, %8, %cst_4 [1] : vector<256x32xf32> to vector<256xf32>
    %10 = vector.shape_cast %9 : vector<256xf32> to vector<256x1xf32>
    %11 = vector.broadcast %10 : vector<256x1xf32> to vector<256x128xf32>
    %12 = arith.addf %11, %6 : vector<256x128xf32>
    %cst_5 = arith.constant 0.000000e+00 : f32
    %13 = vector.broadcast %cst_5 : f32 to vector<256x128xf32>
    %14 = arith.maximumf %12, %13 : vector<256x128xf32>
    %cst_6 = arith.constant dense<0x7F800000> : vector<256xf32>
    %15 = vector.multi_reduction <minimumf>, %14, %cst_6 [1] : vector<256x128xf32> to vector<256xf32>
    %16 = vector.shape_cast %15 : vector<256xf32> to vector<256x1xf32>
    %17 = vector.broadcast %16 : vector<256x1xf32> to vector<256x128xf32>
    %18 = arith.subf %14, %17 : vector<256x128xf32>
    %cst_7 = arith.constant -1.000000e-01 : f32
    %19 = vector.broadcast %cst_7 : f32 to vector<256x128xf32>
    %20 = arith.mulf %18, %19 : vector<256x128xf32>
    %21 = math.exp %20 : vector<256x128xf32>
    %cst_8 = arith.constant dense<0.000000e+00> : vector<256xf32>
    %22 = vector.multi_reduction <add>, %21, %cst_8 [1] : vector<256x128xf32> to vector<256xf32>
    %23 = vector.shape_cast %22 : vector<256xf32> to vector<256x1xf32>
    %24 = vector.broadcast %23 : vector<256x1xf32> to vector<256x128xf32>
    %25 = arith.divf %21, %24 : vector<256x128xf32>
    %26 = math.tanh %7 : vector<256x128xf32>
    %c0_9 = arith.constant 0 : index
    %c0_10 = arith.constant 0 : index
    %27 = vector.load %arg4[%c0_9, %c0_10] : memref<256x128xf32, #tpu.memory_space<vmem>>, vector<128x128xf32>
    %cst_11 = arith.constant dense<0.000000e+00> : vector<256x128xf32>
    %28 = tpu.matmul %25, %27, %cst_11 {dimension_numbers = #tpu.dot_dimension_numbers<[1], [0], [0], [1], [0, 0, 1, 1], [], []>} : vector<256x128xf32>, vector<128x128xf32>, vector<256x128xf32> -> vector<256x128xf32>
    %29 = arith.mulf %28, %26 : vector<256x128xf32>
    %c0_12 = arith.constant 0 : index
    %c0_13 = arith.constant 0 : index
    %30 = vector.load %arg3[%c0_12, %c0_13] : memref<129x640xf32, #tpu.memory_space<vmem>>, vector<128x640xf32>
    %cst_14 = arith.constant dense<0.000000e+00> : vector<256x640xf32>
    %31 = tpu.matmul %29, %30, %cst_14 {dimension_numbers = #tpu.dot_dimension_numbers<[1], [0], [0], [1], [0, 0, 1, 1], [], []>} : vector<256x128xf32>, vector<128x640xf32>, vector<256x640xf32> -> vector<256x640xf32>
    %c128 = arith.constant 128 : index
    %c0_15 = arith.constant 0 : index
    %32 = vector.load %arg3[%c128, %c0_15] : memref<129x640xf32, #tpu.memory_space<vmem>>, vector<1x640xf32>
    %33 = vector.broadcast %32 : vector<1x640xf32> to vector<256x640xf32>
    %34 = arith.addf %31, %33 : vector<256x640xf32>
    %35 = vector.extract_strided_slice %34 {offsets = [0, 0], sizes = [256, 128], strides = [1, 1]} : vector<256x640xf32> to vector<256x128xf32>
    %36 = vector.extract_strided_slice %34 {offsets = [0, 128], sizes = [256, 512], strides = [1, 1]} : vector<256x640xf32> to vector<256x512xf32>
    %cst_16 = arith.constant dense<0xFF800000> : vector<256xf32>
    %37 = vector.multi_reduction <maximumf>, %35, %cst_16 [1] : vector<256x128xf32> to vector<256xf32>
    %38 = vector.shape_cast %37 : vector<256xf32> to vector<256x1xf32>
    %39 = vector.broadcast %38 : vector<256x1xf32> to vector<256x128xf32>
    %40 = arith.subf %35, %39 : vector<256x128xf32>
    %41 = math.exp %40 : vector<256x128xf32>
    %c128_17 = arith.constant 128 : index
    %c0_18 = arith.constant 0 : index
    %42 = vector.load %arg4[%c128_17, %c0_18] : memref<256x128xf32, #tpu.memory_space<vmem>>, vector<128x128xf32>
    %cst_19 = arith.constant dense<0.000000e+00> : vector<256x128xf32>
    %43 = tpu.matmul %41, %42, %cst_19 {dimension_numbers = #tpu.dot_dimension_numbers<[1], [0], [0], [1], [0, 0, 1, 1], [], []>} : vector<256x128xf32>, vector<128x128xf32>, vector<256x128xf32> -> vector<256x128xf32>
    %44 = arith.divf %41, %43 : vector<256x128xf32>
    %45 = math.tanh %36 : vector<256x512xf32>
    %c0_20 = arith.constant 0 : index
    %c0_21 = arith.constant 0 : index
    %46 = vector.load %arg6[%c0_20, %c0_21] : memref<128x512xf32, #tpu.memory_space<vmem>>, vector<128x512xf32>
    %cst_22 = arith.constant dense<0.000000e+00> : vector<256x512xf32>
    %47 = tpu.matmul %44, %46, %cst_22 {dimension_numbers = #tpu.dot_dimension_numbers<[1], [0], [0], [1], [0, 0, 1, 1], [], []>} : vector<256x128xf32>, vector<128x512xf32>, vector<256x512xf32> -> vector<256x512xf32>
    %48 = arith.mulf %47, %45 : vector<256x512xf32>
    %c0_23 = arith.constant 0 : index
    %c0_24 = arith.constant 0 : index
    %49 = vector.load %arg5[%c0_23, %c0_24] : memref<641x128xf32, #tpu.memory_space<vmem>>, vector<512x128xf32>
    %cst_25 = arith.constant dense<0.000000e+00> : vector<256x128xf32>
    %50 = tpu.matmul %48, %49, %cst_25 {dimension_numbers = #tpu.dot_dimension_numbers<[1], [0], [0], [1], [0, 0, 1, 1], [], []>} : vector<256x512xf32>, vector<512x128xf32>, vector<256x128xf32> -> vector<256x128xf32>
    %c512 = arith.constant 512 : index
    %c0_26 = arith.constant 0 : index
    %51 = vector.load %arg5[%c512, %c0_26] : memref<641x128xf32, #tpu.memory_space<vmem>>, vector<128x128xf32>
    %cst_27 = arith.constant dense<0.000000e+00> : vector<256x128xf32>
    %52 = tpu.matmul %50, %51, %cst_27 {dimension_numbers = #tpu.dot_dimension_numbers<[1], [0], [0], [1], [0, 0, 1, 1], [], []>} : vector<256x128xf32>, vector<128x128xf32>, vector<256x128xf32> -> vector<256x128xf32>
    %c640 = arith.constant 640 : index
    %c0_28 = arith.constant 0 : index
    %53 = vector.load %arg5[%c640, %c0_28] : memref<641x128xf32, #tpu.memory_space<vmem>>, vector<1x128xf32>
    %54 = vector.broadcast %53 : vector<1x128xf32> to vector<256x128xf32>
    %55 = arith.addf %52, %54 : vector<256x128xf32>
    %56 = math.tanh %55 : vector<256x128xf32>
    %c0_29 = arith.constant 0 : index
    %c0_30 = arith.constant 0 : index
    %57 = vector.load %arg7[%c0_29, %c0_30] : memref<256x128xf32, #tpu.memory_space<vmem>>, vector<256x128xf32>
    tpu.vector_store %arg7[%c0_29, %c0_30], %56 {strides = array<i32>} : memref<256x128xf32, #tpu.memory_space<vmem>>, vector<256x128xf32>,
    return
  }
  func.func @transform_0(%arg0: i32) -> (i32, i32) {
    %c0_i32 = arith.constant 0 : i32
    %c0_i32_0 = arith.constant 0 : i32
    return %arg0, %c0_i32 : i32, i32
  }
  func.func @transform_1(%arg0: i32) -> (i32, i32) {
    %c0_i32 = arith.constant 0 : i32
    %c0_i32_0 = arith.constant 0 : i32
    %c0_i32_1 = arith.constant 0 : i32
    return %c0_i32, %c0_i32_0 : i32, i32
  }
  func.func @transform_2(%arg0: i32) -> (i32, i32) {
    %c0_i32 = arith.constant 0 : i32
    %c0_i32_0 = arith.constant 0 : i32
    %c0_i32_1 = arith.constant 0 : i32
    return %c0_i32, %c0_i32_0 : i32, i32
  }
  func.func @transform_3(%arg0: i32) -> (i32, i32) {
    %c0_i32 = arith.constant 0 : i32
    %c0_i32_0 = arith.constant 0 : i32
    %c0_i32_1 = arith.constant 0 : i32
    return %c0_i32, %c0_i32_0 : i32, i32
  }
  func.func @transform_4(%arg0: i32) -> (i32, i32) {
    %c0_i32 = arith.constant 0 : i32
    %c0_i32_0 = arith.constant 0 : i32
    %c0_i32_1 = arith.constant 0 : i32
    return %c0_i32, %c0_i32_0 : i32, i32
  }
  func.func @transform_5(%arg0: i32) -> (i32, i32) {
    %c0_i32 = arith.constant 0 : i32
    %c0_i32_0 = arith.constant 0 : i32
    %c0_i32_1 = arith.constant 0 : i32
    return %c0_i32, %c0_i32_0 : i32, i32
  }
  func.func @transform_6(%arg0: i32) -> (i32, i32) {
    %c0_i32 = arith.constant 0 : i32
    %c0_i32_0 = arith.constant 0 : i32
    return %arg0, %c0_i32 : i32, i32
  }
}

</mosaic_0001>

<bundles_post_ra>
// kernel: tree_lstm_forward.1
= control target key start
LH: loop header
LB: loop body
LE: loop exit
PB: predicated region body
PF: predicated region fallthrough
CT: control target
= control target key end

     0   :  { %11 = vsyncpa [#allocation3], 0  ;;  %s9076_s0 = inlined_call_operand.vmem [shape: f32[512,32], index: 0, kind: input, shape index: {}]   ;;  %s9077_s1 = inlined_call_operand.hbm [shape: f32[33,256], index: 1, kind: input, shape index: {}]   ;;  %s9078_s2 = inlined_call_operand.hbm [shape: f32[129,640], index: 2, kind: input, shape index: {}]   ;;  %s9079_s3 = inlined_call_operand.hbm [shape: f32[256,128], index: 3, kind: input, shape index: {}]   ;;  %s9080_s4 = inlined_call_operand.vmem [shape: f32[641,128], index: 4, kind: input, shape index: {}]   ;;  %s9081_s5 = inlined_call_operand.hbm [shape: f32[128,512], index: 5, kind: input, shape index: {}]   ;;  %s9082_s6 = inlined_call_operand.vmem [shape: f32[512,128], index: 6, kind: output, shape index: {}]  }
   0x1   :  { %12 = vsyncpa [#allocation5], 0 }
   0x2   :  { %13 = vsyncpa [#allocation8], 0  ;;  %s6492_s21 = smov 0  }
   0x3 LB: > { %s6443_s22 = smov [#allocation4]   ;;  %s4607_s24 = sadd.s32 4294967295, %s6441_s21   ;;  %s6441_s21 = sphi %s6492_s21, %s19_s21  }
   0x4   : > { %s206_s23 = sshll.u32 %s6443_s22, 4  ;;  %p4609_p0 = scmp.ge.s32.totalorder %s6441_s21, 1  ;;  %s6506_s23 = int_to_ptr.vmem [resolvable:$true] %s206_s23 }
   0x5   : > { %p181_p1 = scmp.lt.s32.totalorder %s6441_s21, 3  ;;  %p6502_p2 = scmp.eq.s32.totalorder %s4607_s24, 0 }
   0x6   : > { %s6444_s27 = smov [#allocation2]   ;;  %s6445_s30 = smov [#allocation6]  }
   0x7   : > { %s9119_s25 = scalar_select %p6502_p2, 1, 0 }
   0x8   : > { %p6508_p3 = pnand %p4609_p0, %p181_p1  ;;  %s193_s28 = sshll.u32 %s6444_s27, 4  ;;  %s6514_s28 = int_to_ptr.vmem [resolvable:$true] %s193_s28 }
   0x9   : > { %s6522_s7 = sshll.u32 %s6445_s30, 4  ;;  %s6311_s10 = scalar_lea.hbm %s9078_s2, 10880  ;;  %s220_s7 = int_to_ptr.vmem [resolvable:$true] %s6522_s7 }
   0xa   : > { %s9120_s26 = scalar_select %p6508_p3, 1, 0 }
   0xb   : > { %p5627_p4 = pneg %p6508_p3  ;;  %p6312_p6 = scmp.ne.s32.totalorder %s9078_s2, %s6311_s10 }
   0xc   : > { %p6318_p10 = scmp.lt.u32.totalorder %s6311_s10, %s9078_s2 }
   0xd   : > { %p6518_p5 = pnand %p6502_p2, %p5627_p4 }
   0xf   : > { %p6532_p7 = pneg %p6518_p5 }
  0x11   : > { %p6314_p8 = pnand %p6532_p7, %p6312_p6 }
  0x13   : > { %p6315_p9 = pneg %p6314_p8 }
  0x15   : > { %p6320_p11 = pnand %p6318_p10, %p6315_p9 }
  0x17   : > { %6323 = shalt.err (!%p6320_p11)
}
  0x18   : > { %s6324_s16 = scalar_lea.vmem %s6506_s23, 10880  ;;  %p6332_p1 = scmp.lt.s32.totalorder %s6506_s23, %s6506_s23 }
  0x19   : > { %p6325_p12 = scmp.ne.s32.totalorder %s6506_s23, %s6324_s16  ;;  %p6333_p4 = scmp.lt.s32.totalorder %s6324_s16, %s6324_s16 }
  0x1b   : > { %p6327_p13 = pnand %p6325_p12, %p6532_p7  ;;  %p6334_p6 = por %p6333_p4, %p6332_p1 }
  0x1d   : > { %p6328_p0 = pneg %p6327_p13 }
  0x1f   : > { %p6335_p8 = pnand %p6334_p6, %p6328_p0 }
  0x21   : > { %6338 = shalt.err (!%p6335_p8)
}
  0x22   : > { %s6446_s17 = smov 640   ;;  %s6447_s18 = smov 40  }
  0x23   : > { %5633 = dma.hbm_to_vmem [thread:$0]  (!%p6518_p5), %s9078_s2, 10880, %s6506_s23, [#allocation5], %s6446_s17, %s6446_s17, %s6447_s18  }
  0x24   : > { %s6339_s30 = scalar_lea.hbm %s9077_s1, 1280 }
  0x25   : > { %p6340_p9 = scmp.ne.s32.totalorder %s9077_s1, %s6339_s30  ;;  %p6346_p12 = scmp.lt.u32.totalorder %s6339_s30, %s9077_s1 }
  0x27   : > { %p6342_p10 = pnand %p6340_p9, %p6532_p7 }
  0x29   : > { %p6343_p11 = pneg %p6342_p10 }
  0x2b   : > { %p6348_p13 = pnand %p6346_p12, %p6343_p11 }
  0x2d   : > { %6351 = shalt.err (!%p6348_p13)
}
  0x2e   : > { %s6352_s23 = scalar_lea.vmem %s6514_s28, 1280  ;;  %p6360_p6 = scmp.lt.s32.totalorder %s6514_s28, %s6514_s28 }
  0x2f   : > { %p6353_p0 = scmp.ne.s32.totalorder %s6514_s28, %s6352_s23  ;;  %p6361_p8 = scmp.lt.s32.totalorder %s6352_s23, %s6352_s23 }
  0x31   : > { %p6355_p1 = pnand %p6353_p0, %p6532_p7  ;;  %p6362_p9 = por %p6361_p8, %p6360_p6 }
  0x33   : > { %p6356_p4 = pneg %p6355_p1 }
  0x35   : > { %p6363_p10 = pnand %p6362_p9, %p6356_p4 }
  0x37   : > { %6366 = shalt.err (!%p6363_p10)
}
  0x38   : > { %s6448_s12 = smov 256   ;;  %s6449_s14 = smov 16  }
  0x39   : > { %5630 = dma.hbm_to_vmem [thread:$0]  (!%p6518_p5), %s9077_s1, 1280, %s6514_s28, [#allocation3], %s6448_s12, %s6448_s12, %s6449_s14  }
  0x3a   : > { %s6367_s19 = scalar_lea.hbm %s9079_s3, 4096 }
  0x3b   : > { %p6368_p11 = scmp.ne.s32.totalorder %s9079_s3, %s6367_s19  ;;  %p6374_p0 = scmp.lt.u32.totalorder %s6367_s19, %s9079_s3 }
  0x3d   : > { %p6370_p12 = pnand %p6368_p11, %p6532_p7 }
  0x3f   : > { %p6371_p13 = pneg %p6370_p12 }
  0x41   : > { %p6376_p1 = pnand %p6374_p0, %p6371_p13 }
  0x43   : > { %6379 = shalt.err (!%p6376_p1)
}
  0x44   : > { %s6380_s8 = scalar_lea.vmem %s220_s7, 4096  ;;  %p6388_p9 = scmp.lt.s32.totalorder %s220_s7, %s220_s7 }
  0x45   : > { %p6381_p4 = scmp.ne.s32.totalorder %s220_s7, %s6380_s8  ;;  %p6389_p10 = scmp.lt.s32.totalorder %s6380_s8, %s6380_s8 }
  0x47   : > { %p6383_p6 = pnand %p6381_p4, %p6532_p7  ;;  %p6390_p2 = por %p6389_p10, %p6388_p9 }
  0x49   : > { %p6384_p8 = pneg %p6383_p6 }
  0x4b   : > { %p6391_p3 = pnand %p6390_p2, %p6384_p8 }
  0x4d   : > { %6394 = shalt.err (!%p6391_p3)
}
  0x4e   : > { %s6450_s28 = smov 128   ;;  %s6451_s9 = smov 8  }
  0x4f   : > { %5636 = dma.hbm_to_vmem [thread:$0]  (!%p6518_p5), %s9079_s3, 4096, %s220_s7, [#allocation5], %s6450_s28, %s6450_s28, %s6451_s9  }
  0x50   : > { %s6452_s23 = smov [#allocation7]   ;;  %s6395_s16 = scalar_lea.hbm %s9081_s5, 8192 }
  0x51   : > { %s235_s12 = sshll.u32 %s6452_s23, 4  ;;  %p6396_p2 = scmp.ne.s32.totalorder %s9081_s5, %s6395_s16  ;;  %s236_s12 = int_to_ptr.vmem [resolvable:$true] %s235_s12 }
  0x52   : > { %p6402_p12 = scmp.lt.u32.totalorder %s6395_s16, %s9081_s5 }
  0x53   : > { %p6398_p3 = pnand %p6396_p2, %p6532_p7 }
  0x55   : > { %p6399_p11 = pneg %p6398_p3 }
  0x57   : > { %p6404_p13 = pnand %p6402_p12, %p6399_p11 }
  0x59   : > { %6407 = shalt.err (!%p6404_p13)
}
  0x5a   : > { %s6408_s7 = scalar_lea.vmem %s236_s12, 8192  ;;  %p6416_p6 = scmp.lt.s32.totalorder %s236_s12, %s236_s12 }
  0x5b   : > { %p6409_p0 = scmp.ne.s32.totalorder %s236_s12, %s6408_s7  ;;  %p6417_p8 = scmp.lt.s32.totalorder %s6408_s7, %s6408_s7 }
  0x5d   : > { %p6411_p1 = pnand %p6409_p0, %p6532_p7  ;;  %p6418_p9 = por %p6417_p8, %p6416_p6 }
  0x5f   : > { %p6412_p4 = pneg %p6411_p1 }
  0x61   : > { %p6419_p10 = pnand %p6418_p9, %p6412_p4 }
  0x63   : > { %6422 = shalt.err (!%p6419_p10)
}
  0x64   : > { %s6453_s22 = smov 512   ;;  %s6454_s27 = smov 32  }
  0x65   : > { %5639 = dma.hbm_to_vmem [thread:$0]  (!%p6518_p5), %s9081_s5, 8192, %s236_s12, [#allocation8], %s6453_s22, %s6453_s22, %s6454_s27  }
  0x66   : > { %p9123_p2 = scmp.ne.s32.totalorder %s9120_s26, 0 }
  0x68   : > { %260 = sbr.rel (%p9123_p2) target bundleno = 2459 (0x99b), region = 44 }
  0x6f   : > { %p9124_p3 = scmp.ne.s32.totalorder %s9119_s25, 0 }
  0x71   : > { %6428 = dma.done.wait (%p9124_p3), [#allocation3], 1280  }
  0x72   : > { %6430 = vsyncadd (%p9124_p3), [#allocation3], 4294966016 }
  0x73   : > { %6432 = dma.done.wait (%p9124_p3), [#allocation5], 14976  }
  0x74   : > { %6434 = vsyncadd (%p9124_p3), [#allocation5], 4294952320 }
  0x75   : > { %6436 = dma.done.wait (%p9124_p3), [#allocation8], 8192  }
  0x76   : > { %6438 = vsyncadd (%p9124_p3), [#allocation8], 4294959104  ;;  %s4620_s26 = sshll.u32 %s4607_s24, 5  ;;  %v9087_v0 = vmov 0.0   ;;  %v347_v1 = vld [vmem:[#allocation2 + $0x8] sm:$0xff]  ;;  %v349_v2 = vld [vmem:[#allocation2 + $0x18] sm:$0xff] }
  0x77   : > { %528 = vmatprep.mubr.f32.mxu0 %v9087_v0  ;;  %p303_p5 = scmp.lt.s32.totalorder %s4620_s26, 63  ;;  %v346_v3 = vld [vmem:[#allocation2] sm:$0xff]  ;;  %v5171_v4 = vpack.c.bf16 %v349_v2, %v347_v1  ;;  %v348_v5 = vld [vmem:[#allocation2 + $0x10] sm:$0xff]  ;;  %v351_v6 = vld [vmem:[#allocation2 + $0x28] sm:$0xff]  ;;  %vm367_vm0 = vcmask 261120  }
  0x78   : > { %v353_v7 = vld [vmem:[#allocation2 + $0x38] sm:$0xff]  ;;  %v5173_v8 = vpack.c.bf16 %v348_v5, %v346_v3  ;;  %v350_v10 = vld [vmem:[#allocation2 + $0x20] sm:$0xff]  ;;  %v352_v11 = vld [vmem:[#allocation2 + $0x30] sm:$0xff] }
  0x79   : > { %s9472_s26 = smov (!%p303_p5, %s4620_s26), 63  ;;  %v5175_v9 = vpack.c.bf16 %v353_v7, %v351_v6  ;;  %5172 = vmatprep.subr.bf16.mxu0 %v5171_v4  ;;  %v5177_v17 = vpack.c.bf16 %v352_v11, %v350_v10 }
  0x7a   : > { %s4621_s29 = sshll.u32 %s9472_s26, 3  ;;  %5174 = vmatpush1.bf16.msra.mxu0 %v5173_v8 }
  0x7b   : > { %s6638_s9 = scalar_lea.vmem %s9076_s0, %s4621_s29  ;;  %5176 = vmatprep.subr.bf16.mxu0 %v5175_v9  ;;  %s9011_s8 = scalar_lea.vmem %s9082_s6, %s4621_s29 }
  0x7c   : > { %v314_v12 = vld [vmem:[%s6638_s9] sm:$0xff]  ;;  %v315_v13 = vld [vmem:[%s6638_s9 + $0x8] sm:$0xff]  ;;  %v316_v14 = vld [vmem:[%s6638_s9 + $0x10] sm:$0xff] }
  0x7d   : > { %v317_v15 = vld [vmem:[%s6638_s9 + $0x18] sm:$0xff]  ;;  %v721_v16 = vmul.f32 %v314_v12, %v314_v12  ;;  %v722_v18 = vmul.f32 %v315_v13, %v315_v13  ;;  %v723_v19 = vmul.f32 %v316_v14, %v316_v14  ;;  %v318_v22 = vld [vmem:[%s6638_s9 + $0x20] sm:$0xff]  ;;  %v319_v24 = vld [vmem:[%s6638_s9 + $0x28] sm:$0xff] }
  0x7e   : > { %v724_v20 = vmul.f32 %v317_v15, %v317_v15  ;;  %v725_v26 = vmul.f32 %v318_v22, %v318_v22  ;;  %5178 = vmatpush1.bf16.msra.mxu0 %v5177_v17  ;;  %v726_v28 = vmul.f32 %v319_v24, %v319_v24  ;;  %v320_v29 = vld [vmem:[%s6638_s9 + $0x30] sm:$0xff]  ;;  %v6653_v30 = vld [vmem:[%s6638_s9 + $0x38] sm:$0xff]  ;;  %v6661_v35 = vld [vmem:[%s6638_s9 + $0x40] sm:$0xff] }
  0x7f   : > { %v753_v21 = vsel %vm367_vm0, %v721_v16, 0.0  ;;  %v759_v23 = vsel %vm367_vm0, %v723_v19, 0.0  ;;  %v756_v25 = vsel %vm367_vm0, %v722_v18, 0.0  ;;  %v727_v32 = vmul.f32 %v320_v29, %v320_v29  ;;  %v6665_v36 = vld [vmem:[%s6638_s9 + $0x48] sm:$0xff]  ;;  %v324_v41 = vld [vmem:[%s6638_s9 + $0x50] sm:$0xff]  ;;  %v325_v42 = vld [vmem:[%s6638_s9 + $0x58] sm:$0xff] }
  0x80   : > { %754 = vadd.xlane.f32.xlu0 %v753_v21  ;;  %760 = vadd.xlane.f32.xlu1 %v759_v23  ;;  %v762_v27 = vsel %vm367_vm0, %v724_v20, 0.0  ;;  %v765_v31 = vsel %vm367_vm0, %v725_v26, 0.0  ;;  %v768_v33 = vsel %vm367_vm0, %v726_v28, 0.0  ;;  %v728_v34 = vmul.f32 %v6653_v30, %v6653_v30  ;;  %v326_v47 = vld [vmem:[%s6638_s9 + $0x60] sm:$0xff]  ;;  %v327_v48 = vld [vmem:[%s6638_s9 + $0x68] sm:$0xff]  ;;  %v328_v53 = vld [vmem:[%s6638_s9 + $0x70] sm:$0xff] }
  0x81   : > { %4624 = vmatmul.mubr.msk.f32.vlgmr.msra.gmra.mrb[0].mxu0 %vm367_vm0, %v314_v12  ;;  %v771_v37 = vsel %vm367_vm0, %v727_v32, 0.0  ;;  %v729_v38 = vmul.f32 %v6661_v35, %v6661_v35  ;;  %v730_v40 = vmul.f32 %v6665_v36, %v6665_v36  ;;  %v731_v44 = vmul.f32 %v324_v41, %v324_v41  ;;  %v329_v54 = vld [vmem:[%s6638_s9 + $0x78] sm:$0xff]  ;;  %v330_v59 = vld [vmem:[%s6638_s9 + $0x80] sm:$0xff]  ;;  %v331_v60 = vld [vmem:[%s6638_s9 + $0x88] sm:$0xff] }
  0x82   : > { %534 = vmatprep.mubr.f32.mxu0 %v9087_v0  ;;  %v774_v39 = vsel %vm367_vm0, %v728_v34, 0.0  ;;  %v732_v46 = vmul.f32 %v325_v42, %v325_v42  ;;  %v733_v50 = vmul.f32 %v326_v47, %v326_v47  ;;  %v734_v52 = vmul.f32 %v327_v48, %v327_v48  ;;  %v332_v2 = vld [vmem:[%s6638_s9 + $0x90] sm:$0xff]  ;;  %v333_v3 = vld [vmem:[%s6638_s9 + $0x98] sm:$0xff]  ;;  %v334_v10 = vld [vmem:[%s6638_s9 + $0xa0] sm:$0xff] }
  0x83   : > { %v777_v43 = vsel %vm367_vm0, %v729_v38, 0.0  ;;  %v780_v45 = vsel %vm367_vm0, %v730_v40, 0.0  ;;  %v783_v49 = vsel %vm367_vm0, %v731_v44, 0.0  ;;  %v735_v56 = vmul.f32 %v328_v53, %v328_v53  ;;  %v335_v11 = vld [vmem:[%s6638_s9 + $0xa8] sm:$0xff]  ;;  %v336_v12 = vld [vmem:[%s6638_s9 + $0xb0] sm:$0xff]  ;;  %v6769_v17 = vld [vmem:[%s6638_s9 + $0xd8] sm:$0xff] }
  0x84   : > { %757 = vadd.xlane.f32.xlu0 %v756_v25  ;;  %763 = vadd.xlane.f32.xlu1 %v762_v27  ;;  %v786_v51 = vsel %vm367_vm0, %v732_v46, 0.0  ;;  %v789_v55 = vsel %vm367_vm0, %v733_v50, 0.0  ;;  %v792_v57 = vsel %vm367_vm0, %v734_v52, 0.0  ;;  %v736_v58 = vmul.f32 %v329_v54, %v329_v54  ;;  %v6763_v16 = vld [vmem:[%s6638_s9 + $0xd0] sm:$0xff]  ;;  %v6775_v18 = vld [vmem:[%s6638_s9 + $0xe0] sm:$0xff]  ;;  %v6781_v19 = vld [vmem:[%s6638_s9 + $0xe8] sm:$0xff] }
  0x85   : > { %4625 = vmatmul.mubr.msk.f32.gmra.mrb[2].mxu0 %vm367_vm0, %v315_v13  ;;  %v795_v61 = vsel %vm367_vm0, %v735_v56, 0.0  ;;  %v737_v62 = vmul.f32 %v330_v59, %v330_v59  ;;  %v738_v1 = vmul.f32 %v331_v60, %v331_v60  ;;  %v739_v5 = vmul.f32 %v332_v2, %v332_v2  ;;  %v6745_v13 = vld [vmem:[%s6638_s9 + $0xb8] sm:$0xff]  ;;  %v6787_v20 = vld [vmem:[%s6638_s9 + $0xf0] sm:$0xff]  ;;  %v355_v25 = vld [vmem:[#allocation2 + $0x40] ss:$8 sm:$0x3] }
  0x86   : > { %540 = vmatprep.mubr.f32.mxu0 %v9087_v0  ;;  %v798_v63 = vsel %vm367_vm0, %v736_v58, 0.0  ;;  %v740_v7 = vmul.f32 %v333_v3, %v333_v3  ;;  %v6793_v21 = vld [vmem:[%s6638_s9 + $0xf8] sm:$0xff]  ;;  %v741_v34 = vmul.f32 %v334_v10, %v334_v10  ;;  %v743_v50 = vmul.f32 %v336_v12, %v336_v12 }
  0x87   : > { %v801_v4 = vsel %vm367_vm0, %v737_v62, 0.0  ;;  %v804_v6 = vsel %vm367_vm0, %v738_v1, 0.0  ;;  %v807_v8 = vsel %vm367_vm0, %v739_v5, 0.0  ;;  %v744_v58 = vmul.f32 %v6745_v13, %v6745_v13 }
  0x88   : > { %766 = vadd.xlane.f32.xlu0 %v765_v31  ;;  %769 = vadd.xlane.f32.xlu1 %v768_v33  ;;  %v810_v9 = vsel %vm367_vm0, %v740_v7, 0.0 }
  0x89   : > { %4626 = vmatmul.mubr.msk.f32.gmra.mrb[4].mxu0 %vm367_vm0, %v316_v14  ;;  %v6751_v14 = vld [vmem:[%s6638_s9 + $0xc0] sm:$0xff] }
  0x8a   : > { %546 = vmatprep.mubr.f32.mxu0 %v9087_v0 }
  0x8c   : > { %772 = vadd.xlane.f32.xlu0 %v771_v37  ;;  %775 = vadd.xlane.f32.xlu1 %v774_v39 }
  0x8d   : > { %4627 = vmatmul.mubr.msk.f32.gmra.mrb[6].mxu0 %vm367_vm0, %v317_v15  ;;  %v6757_v15 = vld [vmem:[%s6638_s9 + $0xc8] sm:$0xff] }
  0x8e   : > { %552 = vmatprep.mubr.f32.mxu0 %v9087_v0 }
  0x90   : > { %778 = vadd.xlane.f32.xlu0 %v777_v43  ;;  %781 = vadd.xlane.f32.xlu1 %v780_v45 }
  0x91   : > { %4628 = vmatmul.mubr.msk.f32.gmra.mrb[8].mxu0 %vm367_vm0, %v318_v22  ;;  %v357_v22 = vlaneseq }
  0x92   : > { %558 = vmatprep.mubr.f32.mxu0 %v9087_v0 }
  0x93   : > { %v6798_v23 = vshrl.u32 %v357_v22, 7 }
  0x94   : > { %784 = vadd.xlane.f32.xlu0 %v783_v49  ;;  %787 = vadd.xlane.f32.xlu1 %v786_v51 }
  0x95   : > { %4629 = vmatmul.mubr.msk.f32.gmra.mrb[10].mxu0 %vm367_vm0, %v319_v24  ;;  %v9086_v24 = vsub.s32 0, %v6798_v23 }
  0x96   : > { %564 = vmatprep.mubr.f32.mxu0 %v9087_v0 }
  0x97   : > { %v6803_v26 = vrot.slane %v355_v25, %v9086_v24 }
  0x98   : > { %790 = vadd.xlane.f32.xlu0 %v789_v55  ;;  %793 = vadd.xlane.f32.xlu1 %v792_v57  ;;  %v819_v57 = vsel %vm367_vm0, %v743_v50, 0.0 }
  0x99   : > { %4630 = vmatmul.mubr.msk.f32.gmra.mrb[12].mxu0 %vm367_vm0, %v320_v29 }
  0x9a   : > { %570 = vmatprep.mubr.f32.mxu0 %v9087_v0 }
  0x9c   : > { %796 = vadd.xlane.f32.xlu0 %v795_v61  ;;  %799 = vadd.xlane.f32.xlu1 %v798_v63 }
  0x9d   : > { %4631 = vmatmul.mubr.msk.f32.gmra.mrb[14].mxu0 %vm367_vm0, %v6653_v30 }
  0x9e   : > { %576 = vmatprep.mubr.f32.mxu0 %v9087_v0 }
  0xa0   : > { %802 = vadd.xlane.f32.xlu0 %v801_v4  ;;  %805 = vadd.xlane.f32.xlu1 %v804_v6 }
  0xa1   : > { %4632 = vmatmul.mubr.msk.f32.gmra.mrb[16].mxu0 %vm367_vm0, %v6661_v35 }
  0xa2   : > { %582 = vmatprep.mubr.f32.mxu0 %v9087_v0 }
  0xa4   : > { %808 = vadd.xlane.f32.xlu0 %v807_v8  ;;  %811 = vadd.xlane.f32.xlu1 %v810_v9 }
  0xa5   : > { %4633 = vmatmul.mubr.msk.f32.gmra.mrb[18].mxu0 %vm367_vm0, %v6665_v36 }
  0xa6   : > { %588 = vmatprep.mubr.f32.mxu0 %v9087_v0 }
  0xa9   : > { %4634 = vmatmul.mubr.msk.f32.gmra.mrb[20].mxu0 %vm367_vm0, %v324_v41  ;;  %v813_v41 = vsel %vm367_vm0, %v741_v34, 0.0 }
  0xaa   : > { %594 = vmatprep.mubr.f32.mxu0 %v9087_v0 }
  0xad   : > { %4635 = vmatmul.mubr.msk.f32.gmra.mrb[22].mxu0 %vm367_vm0, %v325_v42  ;;  %v742_v42 = vmul.f32 %v335_v11, %v335_v11 }
  0xae   : > { %600 = vmatprep.mubr.f32.mxu0 %v9087_v0 }
  0xaf   : > { %v816_v49 = vsel %vm367_vm0, %v742_v42, 0.0 }
  0xb1   : > { %4636 = vmatmul.mubr.msk.f32.gmra.mrb[24].mxu0 %vm367_vm0, %v326_v47 }
  0xb2   : > { %606 = vmatprep.mubr.f32.mxu0 %v9087_v0 }
  0xb5   : > { %4637 = vmatmul.mubr.msk.f32.gmra.mrb[26].mxu0 %vm367_vm0, %v327_v48 }
  0xb6   : > { %612 = vmatprep.mubr.f32.mxu0 %v9087_v0 }
  0xb9   : > { %4638 = vmatmul.mubr.msk.f32.gmra.mrb[28].mxu0 %vm367_vm0, %v328_v53 }
  0xba   : > { %618 = vmatprep.mubr.f32.mxu0 %v9087_v0 }
  0xbd   : > { %4639 = vmatmul.mubr.msk.f32.gmra.mrb[30].mxu0 %vm367_vm0, %v329_v54 }
  0xbe   : > { %624 = vmatprep.mubr.f32.mxu0 %v9087_v0 }
  0xc1   : > { %4640 = vmatmul.mubr.msk.f32.gmra.mrb[32].mxu0 %vm367_vm0, %v330_v59 }
  0xc2   : > { %630 = vmatprep.mubr.f32.mxu0 %v9087_v0 }
  0xc5   : > { %4641 = vmatmul.mubr.msk.f32.gmra.mrb[34].mxu0 %vm367_vm0, %v331_v60 }
  0xc6   : > { %636 = vmatprep.mubr.f32.mxu0 %v9087_v0 }
  0xc9   : > { %4642 = vmatmul.mubr.msk.f32.gmra.mrb[36].mxu0 %vm367_vm0, %v332_v2  ;;  %v822_v2 = vsel %vm367_vm0, %v744_v58, 0.0 }
  0xca   : > { %642 = vmatprep.mubr.f32.mxu0 %v9087_v0 }
  0xcd   : > { %4643 = vmatmul.mubr.msk.f32.gmra.mrb[38].mxu0 %vm367_vm0, %v333_v3  ;;  %v745_v3 = vmul.f32 %v6751_v14, %v6751_v14 }
  0xce   : > { %648 = vmatprep.mubr.f32.mxu0 %v9087_v0 }
  0xd1   : > { %4644 = vmatmul.mubr.msk.f32.gmra.mrb[40].mxu0 %vm367_vm0, %v334_v10  ;;  %v825_v10 = vsel %vm367_vm0, %v745_v3, 0.0 }
  0xd2   : > { %654 = vmatprep.mubr.f32.mxu0 %v9087_v0 }
  0xd5   : > { %4645 = vmatmul.mubr.msk.f32.gmra.mrb[42].mxu0 %vm367_vm0, %v335_v11  ;;  %v746_v11 = vmul.f32 %v6757_v15, %v6757_v15 }
  0xd6   : > { %660 = vmatprep.mubr.f32.mxu0 %v9087_v0 }
  0xd9   : > { %4646 = vmatmul.mubr.msk.f32.gmra.mrb[44].mxu0 %vm367_vm0, %v336_v12 }
  0xda   : > { %666 = vmatprep.mubr.f32.mxu0 %v9087_v0 }
  0xdd   : > { %4647 = vmatmul.mubr.msk.f32.gmra.mrb[46].mxu0 %vm367_vm0, %v6745_v13 }
  0xde   : > { %672 = vmatprep.mubr.f32.mxu0 %v9087_v0 }
  0xe1   : > { %4648 = vmatmul.mubr.msk.f32.gmra.mrb[48].mxu0 %vm367_vm0, %v6751_v14 }
  0xe2   : > { %678 = vmatprep.mubr.f32.mxu0 %v9087_v0 }
  0xe5   : > { %4649 = vmatmul.mubr.msk.f32.gmra.mrb[50].mxu0 %vm367_vm0, %v6757_v15 }
  0xe6   : > { %684 = vmatprep.mubr.f32.mxu0 %v9087_v0 }
  0xe9   : > { %4650 = vmatmul.mubr.msk.f32.gmra.mrb[52].mxu0 %vm367_vm0, %v6763_v16 }
  0xea   : > { %690 = vmatprep.mubr.f32.mxu0 %v9087_v0 }
  0xed   : > { %4651 = vmatmul.mubr.msk.f32.gmra.mrb[54].mxu0 %vm367_vm0, %v6769_v17 }
  0xee   : > { %696 = vmatprep.mubr.f32.mxu0 %v9087_v0 }
  0xf1   : > { %4652 = vmatmul.mubr.msk.f32.gmra.mrb[56].mxu0 %vm367_vm0, %v6775_v18 }
  0xf2   : > { %702 = vmatprep.mubr.f32.mxu0 %v9087_v0 }
  0xf5   : > { %4653 = vmatmul.mubr.msk.f32.gmra.mrb[58].mxu0 %vm367_vm0, %v6781_v19 }
  0xf6   : > { %708 = vmatprep.mubr.f32.mxu0 %v9087_v0 }
  0xf9   : > { %4654 = vmatmul.mubr.msk.f32.gmra.mrb[60].mxu0 %vm367_vm0, %v6787_v20 }
  0xfa   : > { %714 = vmatprep.mubr.f32.mxu0 %v9087_v0 }
  0xfd   : > { %4655 = vmatmul.mubr.msk.f32.gmra.mrb[62].mxu0 %vm367_vm0, %v6793_v21 }
  0xfe   : > { %1712 = vmatprep.mubr.f32.mxu0 %v9087_v0 }
 0x10d   : > { %v755_v27 = vpop.xlane.xlu0 %754  ;;  %v761_v38 = vpop.xlane.xlu1 %760 }
 0x111   : > { %v758_v33 = vpop.xlane.xlu0 %757  ;;  %v764_v48 = vpop.xlane.xlu1 %763 }
 0x115   : > { %v767_v56 = vpop.xlane.xlu0 %766  ;;  %v770_v1 = vpop.xlane.xlu1 %769 }
 0x119   : > { %v773_v9 = vpop.xlane.xlu0 %772 }
 0x154   : > { %v530_v28 = vpop.f32.mrb[0].mxu0 }
 0x155   : > { %v531_v29 = vadd.f32 %v530_v28, %v6803_v26  ;;  %v6806_v30 = vpop.f32.mrb[1].mxu0  ;;  %v828_v28 = vsel %vm367_vm0, %v746_v11, 0.0  ;;  %v751_v11 = vmul.f32 %v6787_v20, %v6787_v20 }
 0x157   : > { %v6808_v31 = vadd.f32 %v755_v27, %v531_v29  ;;  %v776_v27 = vpop.xlane.xlu1 %775  ;;  %v747_v29 = vmul.f32 %v6763_v16, %v6763_v16 }
 0x158   : > { %v536_v32 = vpop.f32.mrb[2].mxu0 }
 0x159   : > { %v537_v35 = vadd.f32 %v536_v32, %v6803_v26  ;;  %v6811_v36 = vpop.f32.mrb[3].mxu0  ;;  %v9108_v37 = vmax.f32 %v6808_v31, 0.0 }
 0x15b   : > { %v6814_v39 = vadd.f32 %v758_v33, %v537_v35  ;;  %913 = vmin.xlane.f32.xlu0 %v9108_v37 }
 0x15c   : > { %v542_v40 = vpop.f32.mrb[4].mxu0 }
 0x15d   : > { %v543_v43 = vadd.f32 %v542_v40, %v6803_v26  ;;  %v6820_v44 = vpop.f32.mrb[5].mxu0  ;;  %v9107_v45 = vmax.f32 %v6814_v39, 0.0  ;;  %v831_v40 = vsel %vm367_vm0, %v747_v29, 0.0 }
 0x15f   : > { %v6823_v46 = vadd.f32 %v761_v38, %v543_v43  ;;  %915 = vmin.xlane.f32.xlu1 %v9107_v45  ;;  %814 = vadd.xlane.f32.xlu0 %v813_v41  ;;  %v779_v38 = vpop.xlane.xlu0 %778  ;;  %v748_v41 = vmul.f32 %v6769_v17, %v6769_v17 }
 0x160   : > { %v548_v47 = vpop.f32.mrb[6].mxu0 }
 0x161   : > { %v549_v51 = vadd.f32 %v548_v47, %v6803_v26  ;;  %v6829_v52 = vpop.f32.mrb[7].mxu0  ;;  %v9106_v53 = vmax.f32 %v6823_v46, 0.0  ;;  %v834_v50 = vsel %vm367_vm0, %v748_v41, 0.0 }
 0x163   : > { %v6832_v54 = vadd.f32 %v764_v48, %v549_v51  ;;  %817 = vadd.xlane.f32.xlu1 %v816_v49  ;;  %917 = vmin.xlane.f32.xlu0 %v9106_v53  ;;  %v782_v49 = vpop.xlane.xlu1 %781  ;;  %v749_v51 = vmul.f32 %v6775_v18, %v6775_v18  ;;  %v1266_v53 = vld [vmem:[#allocation6 + $0x8] sm:$0xff] }
 0x164   : > { %v554_v55 = vpop.f32.mrb[8].mxu0 }
 0x165   : > { %v555_v59 = vadd.f32 %v554_v55, %v6803_v26  ;;  %v6840_v60 = vpop.f32.mrb[9].mxu0  ;;  %v9105_v61 = vmax.f32 %v6832_v54, 0.0 }
 0x167   : > { %v6843_v62 = vadd.f32 %v767_v56, %v555_v59  ;;  %919 = vmin.xlane.f32.xlu1 %v9105_v61  ;;  %820 = vadd.xlane.f32.xlu0 %v819_v57  ;;  %v785_v59 = vpop.xlane.xlu0 %784  ;;  %v1265_v61 = vld [vmem:[#allocation6] sm:$0xff] }
 0x168   : > { %v560_v63 = vpop.f32.mrb[10].mxu0  ;;  %v5179_v45 = vpack.c.bf16 %v1266_v53, %v1265_v61 }
 0x169   : > { %v561_v4 = vadd.f32 %v560_v63, %v6803_v26  ;;  %v6851_v5 = vpop.f32.mrb[11].mxu0  ;;  %v9104_v6 = vmax.f32 %v6843_v62, 0.0  ;;  %v837_v63 = vsel %vm367_vm0, %v749_v51, 0.0 }
 0x16a   : > { %5180 = vmatprep.subr.bf16.mxu1 %v5179_v45 }
 0x16b   : > { %v6854_v7 = vadd.f32 %v770_v1, %v561_v4  ;;  %823 = vadd.xlane.f32.xlu1 %v822_v2  ;;  %921 = vmin.xlane.f32.xlu0 %v9104_v6  ;;  %v750_v1 = vmul.f32 %v6781_v19, %v6781_v19  ;;  %v791_v29 = vpop.xlane.xlu0 %790 }
 0x16c   : > { %v566_v8 = vpop.f32.mrb[12].mxu0  ;;  %5182 = vmatpush3.bf16.msra.mxu1 %v5179_v45 }
 0x16d   : > { %v567_v12 = vadd.f32 %v566_v8, %v6803_v26  ;;  %v6862_v13 = vpop.f32.mrb[13].mxu0  ;;  %v9103_v14 = vmax.f32 %v6854_v7, 0.0 }
 0x16f   : > { %v6865_v22 = vadd.f32 %v773_v9, %v567_v12  ;;  %923 = vmin.xlane.f32.xlu1 %v9103_v14  ;;  %826 = vadd.xlane.f32.xlu0 %v825_v10  ;;  %v788_v9 = vpop.xlane.xlu1 %787  ;;  %v840_v10 = vsel %vm367_vm0, %v750_v1, 0.0 }
 0x170   : > { %v572_v25 = vpop.f32.mrb[14].mxu0 }
 0x171   : > { %v573_v15 = vadd.f32 %v572_v25, %v6803_v26  ;;  %v6873_v32 = vpop.f32.mrb[15].mxu0  ;;  %v9102_v33 = vmax.f32 %v6865_v22, 0.0 }
 0x173   : > { %v6876_v34 = vadd.f32 %v776_v27, %v573_v15  ;;  %829 = vadd.xlane.f32.xlu1 %v828_v28  ;;  %925 = vmin.xlane.f32.xlu0 %v9102_v33  ;;  %v843_v15 = vsel %vm367_vm0, %v751_v11, 0.0 }
 0x174   : > { %v578_v35 = vpop.f32.mrb[16].mxu0 }
 0x175   : > { %v579_v16 = vadd.f32 %v578_v35, %v6803_v26  ;;  %v6884_v42 = vpop.f32.mrb[17].mxu0  ;;  %v9100_v43 = vmax.f32 %v6876_v34, 0.0  ;;  %v752_v35 = vmul.f32 %v6793_v21, %v6793_v21 }
 0x177   : > { %v6887_v47 = vadd.f32 %v779_v38, %v579_v16  ;;  %927 = vmin.xlane.f32.xlu1 %v9100_v43  ;;  %832 = vadd.xlane.f32.xlu0 %v831_v40 }
 0x178   : > { %v584_v48 = vpop.f32.mrb[18].mxu0 }
 0x179   : > { %v585_v17 = vadd.f32 %v584_v48, %v6803_v26  ;;  %v6895_v55 = vpop.f32.mrb[19].mxu0  ;;  %v9099_v56 = vmax.f32 %v6887_v47, 0.0  ;;  %v794_v48 = vpop.xlane.xlu1 %793 }
 0x17b   : > { %v6898_v57 = vadd.f32 %v782_v49, %v585_v17  ;;  %835 = vadd.xlane.f32.xlu1 %v834_v50  ;;  %929 = vmin.xlane.f32.xlu0 %v9099_v56  ;;  %v846_v49 = vsel %vm367_vm0, %v752_v35, 0.0 }
 0x17c   : > { %v590_v58 = vpop.f32.mrb[20].mxu0 }
 0x17d   : > { %v591_v18 = vadd.f32 %v590_v58, %v6803_v26  ;;  %v6906_v2 = vpop.f32.mrb[21].mxu0  ;;  %v9098_v3 = vmax.f32 %v6898_v57, 0.0 }
 0x17f   : > { %v6909_v4 = vadd.f32 %v785_v59, %v591_v18  ;;  %931 = vmin.xlane.f32.xlu1 %v9098_v3  ;;  %838 = vadd.xlane.f32.xlu0 %v837_v63  ;;  %v797_v59 = vpop.xlane.xlu0 %796 }
 0x180   : > { %v596_v8 = vpop.f32.mrb[22].mxu0 }
 0x181   : > { %v597_v19 = vadd.f32 %v596_v8, %v6803_v26  ;;  %v6917_v12 = vpop.f32.mrb[23].mxu0  ;;  %v9096_v25 = vmax.f32 %v6909_v4, 0.0 }
 0x183   : > { %v6920_v27 = vadd.f32 %v788_v9, %v597_v19  ;;  %841 = vadd.xlane.f32.xlu1 %v840_v10  ;;  %933 = vmin.xlane.f32.xlu0 %v9096_v25  ;;  %v800_v10 = vpop.xlane.xlu1 %799  ;;  %v803_v35 = vpop.xlane.xlu0 %802 }
 0x184   : > { %v602_v28 = vpop.f32.mrb[24].mxu0 }
 0x185   : > { %v603_v20 = vadd.f32 %v602_v28, %v6803_v26  ;;  %v6928_v38 = vpop.f32.mrb[25].mxu0  ;;  %v9095_v40 = vmax.f32 %v6920_v27, 0.0 }
 0x187   : > { %v6931_v41 = vadd.f32 %v791_v29, %v603_v20  ;;  %935 = vmin.xlane.f32.xlu1 %v9095_v40  ;;  %844 = vadd.xlane.f32.xlu0 %v843_v15 }
 0x188   : > { %v608_v16 = vpop.f32.mrb[26].mxu0 }
 0x189   : > { %v609_v50 = vadd.f32 %v608_v16, %v6803_v26  ;;  %v6937_v51 = vpop.f32.mrb[27].mxu0  ;;  %v9094_v21 = vmax.f32 %v6931_v41, 0.0 }
 0x18b   : > { %v6940_v17 = vadd.f32 %v794_v48, %v609_v50  ;;  %847 = vadd.xlane.f32.xlu1 %v846_v49  ;;  %937 = vmin.xlane.f32.xlu0 %v9094_v21 }
 0x18c   : > { %v614_v58 = vpop.f32.mrb[28].mxu0 }
 0x18d   : > { %v615_v63 = vadd.f32 %v614_v58, %v6803_v26  ;;  %v6945_v1 = vpop.f32.mrb[29].mxu0  ;;  %v9093_v18 = vmax.f32 %v6940_v17, 0.0  ;;  %v806_v58 = vpop.xlane.xlu1 %805 }
 0x18e   : > { %9125 = vst [vmem:[#allocation12_spill] sm:$0xff] %v6945_v1 }
 0x18f   : > { %v6948_v8 = vadd.f32 %v797_v59, %v615_v63  ;;  %939 = vmin.xlane.f32.xlu1 %v9093_v18 }
 0x190   : > { %v620_v9 = vpop.f32.mrb[30].mxu0 }
 0x191   : > { %v621_v11 = vadd.f32 %v620_v9, %v6803_v26  ;;  %v6953_v19 = vpop.f32.mrb[31].mxu0  ;;  %v9091_v28 = vmax.f32 %v6948_v8, 0.0 }
 0x192   : > { %9126 = vst [vmem:[#allocation13_spill] sm:$0xff] %v6953_v19 }
 0x193   : > { %v6956_v29 = vadd.f32 %v800_v10, %v621_v11  ;;  %941 = vmin.xlane.f32.xlu0 %v9091_v28 }
 0x194   : > { %v626_v15 = vpop.f32.mrb[32].mxu0 }
 0x195   : > { %v627_v20 = vadd.f32 %v626_v15, %v6803_v26  ;;  %v6961_v16 = vpop.f32.mrb[33].mxu0  ;;  %v9089_v48 = vmax.f32 %v6956_v29, 0.0  ;;  %v809_v15 = vpop.xlane.xlu0 %808 }
 0x196   : > { %9127 = vst [vmem:[#allocation14_spill] sm:$0xff] %v6961_v16 }
 0x197   : > { %v6964_v49 = vadd.f32 %v803_v35, %v627_v20  ;;  %943 = vmin.xlane.f32.xlu1 %v9089_v48  ;;  %v812_v48 = vpop.xlane.xlu1 %811 }
 0x198   : > { %v632_v50 = vpop.f32.mrb[34].mxu0 }
 0x199   : > { %v633_v59 = vadd.f32 %v632_v50, %v6803_v26  ;;  %v6969_v63 = vpop.f32.mrb[35].mxu0  ;;  %v9090_v9 = vmax.f32 %v6964_v49, 0.0 }
 0x19a   : > { %9128 = vst [vmem:[#allocation15_spill] sm:$0xff] %v6969_v63 }
 0x19b   : > { %v6972_v10 = vadd.f32 %v806_v58, %v633_v59  ;;  %945 = vmin.xlane.f32.xlu0 %v9090_v9 }
 0x19c   : > { %v638_v11 = vpop.f32.mrb[36].mxu0 }
 0x19d   : > { %v639_v35 = vadd.f32 %v638_v11, %v6803_v26  ;;  %v6977_v20 = vpop.f32.mrb[37].mxu0  ;;  %v9092_v24 = vmax.f32 %v6972_v10, 0.0 }
 0x19e   : > { %9129 = vst [vmem:[#allocation16_spill] sm:$0xff] %v6977_v20 }
 0x19f   : > { %v6980_v0 = vadd.f32 %v809_v15, %v639_v35  ;;  %947 = vmin.xlane.f32.xlu1 %v9092_v24 }
 0x1a0   : > { %v644_v50 = vpop.f32.mrb[38].mxu0 }
 0x1a1   : > { %v645_v58 = vadd.f32 %v644_v50, %v6803_v26  ;;  %v9097_v59 = vmax.f32 %v6980_v0, 0.0  ;;  %v6986_v9 = vpop.f32.mrb[39].mxu0 }
 0x1a2   : > { %9130 = vst [vmem:[#allocation17_spill] sm:$0xff] %v6986_v9 }
 0x1a3   : > { %v6988_v28 = vadd.f32 %v812_v48, %v645_v58  ;;  %949 = vmin.xlane.f32.xlu0 %v9097_v59 }
 0x1a4   : > { %v650_v11 = vpop.f32.mrb[40].mxu0 }
 0x1a5   : > { %v9101_v15 = vmax.f32 %v6988_v28, 0.0  ;;  %v6993_v35 = vpop.f32.mrb[41].mxu0  ;;  %v651_v53 = vadd.f32 %v650_v11, %v6803_v26 }
 0x1a6   : > { %9131 = vst [vmem:[#allocation18_spill] sm:$0xff] %v6993_v35 }
 0x1a7   : > { %951 = vmin.xlane.f32.xlu1 %v9101_v15 }
 0x1a8   : > { %v656_v24 = vpop.f32.mrb[42].mxu0 }
 0x1a9   : > { %v6997_v18 = vpop.f32.mrb[43].mxu0 }
 0x1aa   : > { %9132 = vst [vmem:[#allocation19_spill] sm:$0xff] %v6997_v18 }
 0x1ac   : > { %v662_v50 = vpop.f32.mrb[44].mxu0 }
 0x1ad   : > { %v6999_v21 = vpop.f32.mrb[45].mxu0 }
 0x1ae   : > { %9133 = vst [vmem:[#allocation20_spill] sm:$0xff] %v6999_v21 }
 0x1b0   : > { %v668_v40 = vpop.f32.mrb[46].mxu0 }
 0x1b1   : > { %v7001_v48 = vpop.f32.mrb[47].mxu0 }
 0x1b2   : > { %9134 = vst [vmem:[#allocation21_spill] sm:$0xff] %v7001_v48 }
 0x1b4   : > { %v674_v58 = vpop.f32.mrb[48].mxu0 }
 0x1b5   : > { %v7003_v25 = vpop.f32.mrb[49].mxu0 }
 0x1b6   : > { %9135 = vst [vmem:[#allocation22_spill] sm:$0xff] %v7003_v25 }
 0x1b8   : > { %v7005_v59 = vpop.f32.mrb[50].mxu0 }
 0x1b9   : > { %v7007_v3 = vpop.f32.mrb[51].mxu0 }
 0x1ba   : > { %9136 = vst [vmem:[#allocation23_spill] sm:$0xff] %v7007_v3 }
 0x1bc   : > { %v7009_v56 = vpop.f32.mrb[52].mxu0 }
 0x1bd   : > { %v7011_v43 = vpop.f32.mrb[53].mxu0 }
 0x1be   : > { %9137 = vst [vmem:[#allocation24_spill] sm:$0xff] %v7011_v43 }
 0x1c0   : > { %v7013_v15 = vpop.f32.mrb[54].mxu0 }
 0x1c1   : > { %v7015_v33 = vpop.f32.mrb[55].mxu0 }
 0x1c2   : > { %9138 = vst [vmem:[#allocation25_spill] sm:$0xff] %v7015_v33 }
 0x1c4   : > { %v7017_v14 = vpop.f32.mrb[56].mxu0 }
 0x1c5   : > { %v7019_v6 = vpop.f32.mrb[57].mxu0 }
 0x1c6   : > { %9139 = vst [vmem:[#allocation26_spill] sm:$0xff] %v7019_v6  ;;  %v9143_v6 = vmax.f32 %v6808_v31, 0.0 }
 0x1c8   : > { %v7021_v37 = vpop.f32.mrb[58].mxu0 }
 0x1c9   : > { %v7023_v25 = vpop.f32.mrb[59].mxu0 }
 0x1ca   : > { %9140 = vst [vmem:[#allocation27_spill] sm:$0xff] %v7023_v25  ;;  %v9144_v25 = vmax.f32 %v6814_v39, 0.0 }
 0x1cc   : > { %v7025_v3 = vpop.f32.mrb[60].mxu0 }
 0x1cd   : > { %v7027_v43 = vpop.f32.mrb[61].mxu0 }
 0x1ce   : > { %9141 = vst [vmem:[#allocation28_spill] sm:$0xff] %v7027_v43  ;;  %v657_v43 = vadd.f32 %v656_v24, %v6803_v26 }
 0x1d0   : > { %v7029_v21 = vpop.f32.mrb[62].mxu0 }
 0x1d1   : > { %v7031_v33 = vpop.f32.mrb[63].mxu0 }
 0x1d2   : > { %9142 = vst [vmem:[#allocation29_spill] sm:$0xff] %v7031_v33 }
 0x1e8   : > { %v914_v48 = vpop.xlane.xlu0 %913 }
 0x1e9   : > { %v977_v35 = vsub.f32 %v9143_v6, %v914_v48  ;;  %v9145_v6 = vmax.f32 %v6823_v46, 0.0  ;;  %v9146_v48 = vmax.f32 %v6832_v54, 0.0  ;;  %v669_v46 = vadd.f32 %v668_v40, %v6803_v26 }
 0x1eb   : > { %v1009_v61 = vmul.f32 -0.1, %v977_v35  ;;  %v663_v35 = vadd.f32 %v662_v50, %v6803_v26 }
 0x1ec   : > { %v916_v18 = vpop.xlane.xlu1 %915  ;;  %v815_v20 = vpop.xlane.xlu0 %814 }
 0x1ed   : > { %v978_v45 = vsub.f32 %v9144_v25, %v916_v18  ;;  %v7038_v9 = vadd.f32 %v815_v20, %v651_v53  ;;  %v1041_v16 = vmul.f32 1.442695, %v1009_v61 }
 0x1ef   : > { %v1010_v63 = vmul.f32 -0.1, %v978_v45  ;;  %v901_v33 = vmax.f32 %v7038_v9, 0.0  ;;  %5670 = vpow2.f32 %v1041_v16  ;;  %v9147_v45 = vmax.f32 %v6843_v62, 0.0 }
 0x1f0   : > { %v818_v1 = vpop.xlane.xlu1 %817  ;;  %v918_v19 = vpop.xlane.xlu0 %917  ;;  %v681_v62 = vadd.f32 %v7005_v59, %v6803_v26  ;;  %v9149_v59 = vmax.f32 %v6865_v22, 0.0 }
 0x1f1   : > { %v7042_v31 = vadd.f32 %v818_v1, %v657_v43  ;;  %v979_v11 = vsub.f32 %v9145_v6, %v918_v19  ;;  %953 = vmin.xlane.f32.xlu0 %v901_v33  ;;  %v1043_v39 = vmul.f32 1.442695, %v1010_v63  ;;  %v675_v6 = vadd.f32 %v674_v58, %v6803_v26  ;;  %v1267_v58 = vld [vmem:[#allocation6 + $0x10] sm:$0xff] }
 0x1f3   : > { %v1011_v25 = vmul.f32 -0.1, %v979_v11  ;;  %v902_v24 = vmax.f32 %v7042_v31, 0.0  ;;  %5672 = vpow2.f32 %v1043_v39 }
 0x1f4   : > { %v920_v18 = vpop.xlane.xlu1 %919  ;;  %v821_v20 = vpop.xlane.xlu0 %820 }
 0x1f5   : > { %v980_v53 = vsub.f32 %v9146_v48, %v920_v18  ;;  %v7052_v43 = vadd.f32 %v821_v20, %v663_v35  ;;  %955 = vmin.xlane.f32.xlu1 %v902_v24  ;;  %v1045_v1 = vmul.f32 1.442695, %v1011_v25  ;;  %v9148_v20 = vmax.f32 %v6854_v7, 0.0 }
 0x1f7   : > { %v1012_v19 = vmul.f32 -0.1, %v980_v53  ;;  %v903_v16 = vmax.f32 %v7052_v43, 0.0  ;;  %5674 = vpow2.f32 %v1045_v1 }
 0x1f8   : > { %v824_v63 = vpop.xlane.xlu1 %823  ;;  %v922_v50 = vpop.xlane.xlu0 %921 }
 0x1f9   : > { %v7058_v61 = vadd.f32 %v824_v63, %v669_v46  ;;  %v981_v54 = vsub.f32 %v9147_v45, %v922_v50  ;;  %957 = vmin.xlane.f32.xlu0 %v903_v16  ;;  %v1047_v40 = vmul.f32 1.442695, %v1012_v19  ;;  %v7066_v39 = vpop.eup %5670  ;;  %v1268_v46 = vld [vmem:[#allocation6 + $0x18] sm:$0xff] }
 0x1fa   : > { %v5183_v19 = vpack.c.bf16 %v1268_v46, %v1267_v58 }
 0x1fb   : > { %v1013_v11 = vmul.f32 -0.1, %v981_v54  ;;  %v9113_v35 = vmax.f32 %v7058_v61, 0.0  ;;  %5676 = vpow2.f32 %v1047_v40  ;;  %v1269_v40 = vld [vmem:[#allocation6 + $0x20] sm:$0xff] }
 0x1fc   : > { %v924_v25 = vpop.xlane.xlu1 %923  ;;  %v827_v18 = vpop.xlane.xlu0 %826  ;;  %5184 = vmatprep.subr.bf16.mxu1 %v5183_v19 }
 0x1fd   : > { %v982_v48 = vsub.f32 %v9148_v20, %v924_v25  ;;  %v7070_v53 = vadd.f32 %v827_v18, %v675_v6  ;;  %959 = vmin.xlane.f32.xlu1 %v9113_v35  ;;  %1105 = vadd.xlane.f32.xlu0 %v7066_v39  ;;  %v1049_v1 = vmul.f32 1.442695, %v1013_v11  ;;  %v7078_v7 = vpop.eup %5672  ;;  %v687_v18 = vadd.f32 %v7009_v56, %v6803_v26  ;;  %v1270_v11 = vld [vmem:[#allocation6 + $0x28] sm:$0xff] }
 0x1fe   : > { %5186 = vmatpush3.bf16.msra.mxu1 %v5183_v19  ;;  %v9150_v56 = vmax.f32 %v6876_v34, 0.0  ;;  %v1272_v19 = vld [vmem:[#allocation6 + $0x38] sm:$0xff] }
 0x1ff   : > { %v1014_v63 = vmul.f32 -0.1, %v982_v48  ;;  %v9109_v50 = vmax.f32 %v7070_v53, 0.0  ;;  %5678 = vpow2.f32 %v1049_v1  ;;  %v5187_v48 = vpack.c.bf16 %v1270_v11, %v1269_v40  ;;  %v1271_v1 = vld [vmem:[#allocation6 + $0x30] sm:$0xff] }
 0x200   : > { %v830_v45 = vpop.xlane.xlu1 %829  ;;  %v926_v54 = vpop.xlane.xlu0 %925  ;;  %v9164_v43 = vmax.f32 %v7070_v53, 0.0 }
 0x201   : > { %v7080_v6 = vadd.f32 %v830_v45, %v681_v62  ;;  %v983_v25 = vsub.f32 %v9149_v59, %v926_v54  ;;  %1107 = vadd.xlane.f32.xlu1 %v7078_v7  ;;  %961 = vmin.xlane.f32.xlu0 %v9109_v50  ;;  %v1051_v20 = vmul.f32 1.442695, %v1014_v63  ;;  %v7090_v46 = vpop.eup %5674  ;;  %v693_v50 = vadd.f32 %v7013_v15, %v6803_v26 }
 0x202   : > { %5188 = vmatprep.subr.bf16.mxu1 %v5187_v48 }
 0x203   : > { %v9110_v62 = vmax.f32 %v7080_v6, 0.0  ;;  %v1015_v58 = vmul.f32 -0.1, %v983_v25  ;;  %5680 = vpow2.f32 %v1051_v20  ;;  %5190 = vmatpush3.bf16.msra.mxu1 %v5187_v48  ;;  %v5191_v25 = vpack.c.bf16 %v1272_v19, %v1271_v1  ;;  %v1273_v20 = vld [vmem:[#allocation6 + $0x40] sm:$0xff]  ;;  %v1274_v48 = vld [vmem:[#allocation6 + $0x48] sm:$0xff] }
 0x204   : > { %v928_v22 = vpop.xlane.xlu1 %927  ;;  %v833_v45 = vpop.xlane.xlu0 %832 }
 0x205   : > { %v984_v54 = vsub.f32 %v9150_v56, %v928_v22  ;;  %v7094_v59 = vadd.f32 %v833_v45, %v687_v18  ;;  %963 = vmin.xlane.f32.xlu1 %v9110_v62  ;;  %1109 = vadd.xlane.f32.xlu0 %v7090_v46  ;;  %v1053_v63 = vmul.f32 1.442695, %v1015_v58  ;;  %v7102_v11 = vpop.eup %5676  ;;  %v9151_v45 = vmax.f32 %v6887_v47, 0.0 }
 0x206   : > { %5192 = vmatprep.subr.bf16.mxu1 %v5191_v25  ;;  %v699_v62 = vadd.f32 %v7017_v14, %v6803_v26  ;;  %v9152_v14 = vmax.f32 %v6898_v57, 0.0 }
 0x207   : > { %v1016_v40 = vmul.f32 -0.1, %v984_v54  ;;  %v9111_v34 = vmax.f32 %v7094_v59, 0.0  ;;  %5682 = vpow2.f32 %v1053_v63  ;;  %5194 = vmatpush3.bf16.msra.mxu1 %v5191_v25  ;;  %v5195_v54 = vpack.c.bf16 %v1274_v48, %v1273_v20  ;;  %v1275_v63 = vld [vmem:[#allocation6 + $0x50] sm:$0xff]  ;;  %v1276_v25 = vld [vmem:[#allocation6 + $0x58] sm:$0xff] }
 0x208   : > { %v836_v18 = vpop.xlane.xlu1 %835  ;;  %v930_v22 = vpop.xlane.xlu0 %929 }
 0x209   : > { %v7104_v15 = vadd.f32 %v836_v18, %v693_v50  ;;  %v985_v56 = vsub.f32 %v9151_v45, %v930_v22  ;;  %1111 = vadd.xlane.f32.xlu1 %v7102_v11  ;;  %965 = vmin.xlane.f32.xlu0 %v9111_v34  ;;  %v1055_v58 = vmul.f32 1.442695, %v1016_v40  ;;  %v7114_v19 = vpop.eup %5678  ;;  %v705_v34 = vadd.f32 %v7021_v37, %v6803_v26 }
 0x20a   : > { %5196 = vmatprep.subr.bf16.mxu1 %v5195_v54 }
 0x20b   : > { %v9112_v50 = vmax.f32 %v7104_v15, 0.0  ;;  %v1017_v1 = vmul.f32 -0.1, %v985_v56  ;;  %5684 = vpow2.f32 %v1055_v58  ;;  %5198 = vmatpush3.bf16.msra.mxu1 %v5195_v54  ;;  %v5199_v56 = vpack.c.bf16 %v1276_v25, %v1275_v63  ;;  %v1277_v58 = vld [vmem:[#allocation6 + $0x60] sm:$0xff]  ;;  %v1278_v54 = vld [vmem:[#allocation6 + $0x68] sm:$0xff] }
 0x20c   : > { %v932_v47 = vpop.xlane.xlu1 %931  ;;  %v839_v18 = vpop.xlane.xlu0 %838 }
 0x20d   : > { %v986_v22 = vsub.f32 %v9152_v14, %v932_v47  ;;  %v7118_v45 = vadd.f32 %v839_v18, %v699_v62  ;;  %967 = vmin.xlane.f32.xlu1 %v9112_v50  ;;  %1113 = vadd.xlane.f32.xlu0 %v7114_v19  ;;  %v1057_v40 = vmul.f32 1.442695, %v1017_v1  ;;  %v7126_v48 = vpop.eup %5680  ;;  %v9153_v18 = vmax.f32 %v6909_v4, 0.0 }
 0x20e   : > { %5200 = vmatprep.subr.bf16.mxu1 %v5199_v56  ;;  %v711_v50 = vadd.f32 %v7025_v3, %v6803_v26 }
 0x20f   : > { %v1018_v20 = vmul.f32 -0.1, %v986_v22  ;;  %v9117_v57 = vmax.f32 %v7118_v45, 0.0  ;;  %5686 = vpow2.f32 %v1057_v40  ;;  %5202 = vmatpush3.bf16.msra.mxu1 %v5199_v56  ;;  %v5203_v22 = vpack.c.bf16 %v1278_v54, %v1277_v58  ;;  %v1279_v56 = vld [vmem:[#allocation6 + $0x70] sm:$0xff] }
 0x210   : > { %v842_v62 = vpop.xlane.xlu1 %841  ;;  %v934_v47 = vpop.xlane.xlu0 %933  ;;  %v717_v40 = vadd.f32 %v7029_v21, %v6803_v26 }
 0x211   : > { %v7128_v37 = vadd.f32 %v842_v62, %v705_v34  ;;  %v987_v14 = vsub.f32 %v9153_v18, %v934_v47  ;;  %1115 = vadd.xlane.f32.xlu1 %v7126_v48  ;;  %969 = vmin.xlane.f32.xlu0 %v9117_v57  ;;  %v1059_v1 = vmul.f32 1.442695, %v1018_v20  ;;  %v7138_v25 = vpop.eup %5682  ;;  %v9154_v47 = vmax.f32 %v6920_v27, 0.0  ;;  %v1280_v20 = vld [vmem:[#allocation6 + $0x78] sm:$0xff] }
 0x212   : > { %5204 = vmatprep.subr.bf16.mxu1 %v5203_v22 }
 0x213   : > { %v9116_v34 = vmax.f32 %v7128_v37, 0.0  ;;  %v1019_v63 = vmul.f32 -0.1, %v987_v14  ;;  %5688 = vpow2.f32 %v1059_v1  ;;  %5206 = vmatpush3.bf16.msra.mxu1 %v5203_v22  ;;  %v5207_v14 = vpack.c.bf16 %v1280_v20, %v1279_v56 }
 0x214   : > { %v936_v4 = vpop.xlane.xlu1 %935  ;;  %v845_v62 = vpop.xlane.xlu0 %844 }
 0x215   : > { %v1061_v3 = vmul.f32 1.442695, %v1019_v63  ;;  %v988_v18 = vsub.f32 %v9154_v47, %v936_v4  ;;  %v7142_v35 = vadd.f32 %v845_v62, %v711_v50  ;;  %971 = vmin.xlane.f32.xlu1 %v9116_v34  ;;  %1117 = vadd.xlane.f32.xlu0 %v7138_v25  ;;  %v7150_v54 = vpop.eup %5684  ;;  %v9155_v4 = vmax.f32 %v6931_v41, 0.0 }
 0x216   : > { %5208 = vmatprep.subr.bf16.mxu1 %v5207_v14 }
 0x217   : > { %5690 = vpow2.f32 %v1061_v3  ;;  %v1020_v58 = vmul.f32 -0.1, %v988_v18  ;;  %v9115_v27 = vmax.f32 %v7142_v35, 0.0  ;;  %5210 = vmatpush3.bf16.msra.mxu1 %v5207_v14 }
 0x218   : > { %v848_v50 = vpop.xlane.xlu1 %847  ;;  %v938_v63 = vpop.xlane.xlu0 %937 }
 0x219   : > { %v1063_v26 = vmul.f32 1.442695, %v1020_v58  ;;  %v7152_v21 = vadd.f32 %v848_v50, %v717_v40  ;;  %v989_v62 = vsub.f32 %v9155_v4, %v938_v63  ;;  %1119 = vadd.xlane.f32.xlu1 %v7150_v54  ;;  %973 = vmin.xlane.f32.xlu0 %v9115_v27  ;;  %v7160_v3 = vpop.eup %5686  ;;  %v9156_v40 = vmax.f32 %v6940_v17, 0.0 }
 0x21a   : > { %v9157_v63 = vmax.f32 %v6948_v8, 0.0 }
 0x21b   : > { %5692 = vpow2.f32 %v1063_v26  ;;  %v9114_v1 = vmax.f32 %v7152_v21, 0.0  ;;  %v1021_v22 = vmul.f32 -0.1, %v989_v62 }
 0x21c   : > { %v940_v47 = vpop.xlane.xlu1 %939 }
 0x21d   : > { %v1065_v18 = vmul.f32 1.442695, %v1021_v22  ;;  %v990_v56 = vsub.f32 %v9156_v40, %v940_v47  ;;  %975 = vmin.xlane.f32.xlu1 %v9114_v1  ;;  %1121 = vadd.xlane.f32.xlu0 %v7160_v3  ;;  %v7167_v20 = vpop.eup %5688  ;;  %v9158_v47 = vmax.f32 %v6956_v29, 0.0 }
 0x21f   : > { %5694 = vpow2.f32 %v1065_v18  ;;  %v1022_v41 = vmul.f32 -0.1, %v990_v56 }
 0x220   : > { %v942_v14 = vpop.xlane.xlu0 %941 }
 0x221   : > { %v7169_v58 = vpop.eup %5690  ;;  %v1067_v50 = vmul.f32 1.442695, %v1022_v41  ;;  %v991_v26 = vsub.f32 %v9157_v63, %v942_v14  ;;  %1123 = vadd.xlane.f32.xlu1 %v7167_v20  ;;  %v9159_v14 = vmax.f32 %v6964_v49, 0.0 }
 0x222   : > { %1125 = vadd.xlane.f32.xlu0 %v7169_v58 }
 0x223   : > { %5696 = vpow2.f32 %v1067_v50  ;;  %v1023_v17 = vmul.f32 -0.1, %v991_v26 }
 0x224   : > { %v944_v4 = vpop.xlane.xlu1 %943 }
 0x225   : > { %v7175_v62 = vpop.eup %5692  ;;  %v1069_v22 = vmul.f32 1.442695, %v1023_v17  ;;  %v992_v18 = vsub.f32 %v9158_v47, %v944_v4  ;;  %v9160_v4 = vmax.f32 %v6972_v10, 0.0 }
 0x226   : > { %1127 = vadd.xlane.f32.xlu1 %v7175_v62 }
 0x227   : > { %5698 = vpow2.f32 %v1069_v22  ;;  %v1024_v40 = vmul.f32 -0.1, %v992_v18 }
 0x228   : > { %v946_v56 = vpop.xlane.xlu0 %945 }
 0x229   : > { %v7180_v8 = vpop.eup %5694  ;;  %v1071_v41 = vmul.f32 1.442695, %v1024_v40  ;;  %v993_v63 = vsub.f32 %v9159_v14, %v946_v56  ;;  %v9161_v56 = vmax.f32 %v6980_v0, 0.0 }
 0x22a   : > { %1129 = vadd.xlane.f32.xlu0 %v7180_v8 }
 0x22b   : > { %5700 = vpow2.f32 %v1071_v41  ;;  %v1025_v50 = vmul.f32 -0.1, %v993_v63 }
 0x22c   : > { %v948_v26 = vpop.xlane.xlu1 %947 }
 0x22d   : > { %v7185_v17 = vpop.eup %5696  ;;  %v1073_v29 = vmul.f32 1.442695, %v1025_v50  ;;  %v994_v47 = vsub.f32 %v9160_v4, %v948_v26  ;;  %v9162_v26 = vmax.f32 %v6988_v28, 0.0 }
 0x22e   : > { %1131 = vadd.xlane.f32.xlu1 %v7185_v17 }
 0x22f   : > { %5702 = vpow2.f32 %v1073_v29  ;;  %v1026_v22 = vmul.f32 -0.1, %v994_v47 }
 0x230   : > { %v950_v18 = vpop.xlane.xlu0 %949 }
 0x231   : > { %v7190_v40 = vpop.eup %5698  ;;  %v1075_v49 = vmul.f32 1.442695, %v1026_v22  ;;  %v995_v14 = vsub.f32 %v9161_v56, %v950_v18 }
 0x232   : > { %1133 = vadd.xlane.f32.xlu0 %v7190_v40 }
 0x233   : > { %5704 = vpow2.f32 %v1075_v49  ;;  %v1027_v41 = vmul.f32 -0.1, %v995_v14 }
 0x234   : > { %v952_v63 = vpop.xlane.xlu1 %951 }
 0x235   : > { %v7195_v50 = vpop.eup %5700  ;;  %v1077_v10 = vmul.f32 1.442695, %v1027_v41  ;;  %v996_v4 = vsub.f32 %v9162_v26, %v952_v63 }
 0x236   : > { %1135 = vadd.xlane.f32.xlu1 %v7195_v50 }
 0x237   : > { %5706 = vpow2.f32 %v1077_v10  ;;  %v1028_v29 = vmul.f32 -0.1, %v996_v4 }
 0x239   : > { %v7200_v47 = vpop.eup %5702  ;;  %v1079_v22 = vmul.f32 1.442695, %v1028_v29 }
 0x23a   : > { %1137 = vadd.xlane.f32.xlu0 %v7200_v47 }
 0x23b   : > { %5708 = vpow2.f32 %v1079_v22 }
 0x23d   : > { %v7203_v0 = vpop.eup %5704 }
 0x23e   : > { %1139 = vadd.xlane.f32.xlu1 %v7203_v0 }
 0x241   : > { %v7206_v18 = vpop.eup %5706 }
 0x242   : > { %1141 = vadd.xlane.f32.xlu0 %v7206_v18 }
 0x245   : > { %v7209_v28 = vpop.eup %5708 }
 0x246   : > { %1143 = vadd.xlane.f32.xlu1 %v7209_v28 }
 0x27e   : > { %v954_v49 = vpop.xlane.xlu0 %953 }
 0x27f   : > { %v997_v56 = vsub.f32 %v901_v33, %v954_v49  ;;  %v9163_v33 = vmax.f32 %v7058_v61, 0.0 }
 0x281   : > { %v1029_v14 = vmul.f32 -0.1, %v997_v56 }
 0x282   : > { %v956_v41 = vpop.xlane.xlu1 %955 }
 0x283   : > { %v1081_v63 = vmul.f32 1.442695, %v1029_v14  ;;  %v998_v10 = vsub.f32 %v902_v24, %v956_v41 }
 0x285   : > { %5710 = vpow2.f32 %v1081_v63  ;;  %v1030_v26 = vmul.f32 -0.1, %v998_v10 }
 0x286   : > { %v958_v4 = vpop.xlane.xlu0 %957 }
 0x287   : > { %v1083_v29 = vmul.f32 1.442695, %v1030_v26  ;;  %v999_v22 = vsub.f32 %v903_v16, %v958_v4 }
 0x289   : > { %5712 = vpow2.f32 %v1083_v29  ;;  %v1031_v1 = vmul.f32 -0.1, %v999_v22 }
 0x28a   : > { %v960_v27 = vpop.xlane.xlu1 %959  ;;  %v1106_v34 = vpop.xlane.xlu0 %1105 }
 0x28b   : > { %v1085_v57 = vmul.f32 1.442695, %v1031_v1  ;;  %v1000_v9 = vsub.f32 %v9163_v33, %v960_v27  ;;  %5714 = vrcp.f32 %v1106_v34 }
 0x28d   : > { %5716 = vpow2.f32 %v1085_v57  ;;  %v1032_v49 = vmul.f32 -0.1, %v1000_v9  ;;  %v9165_v57 = vmax.f32 %v7080_v6, 0.0  ;;  %v9166_v9 = vmax.f32 %v7094_v59, 0.0 }
 0x28e   : > { %v1108_v31 = vpop.xlane.xlu1 %1107  ;;  %v962_v24 = vpop.xlane.xlu0 %961 }
 0x28f   : > { %v7220_v56 = vpop.eup %5710  ;;  %v1087_v14 = vmul.f32 1.442695, %v1032_v49  ;;  %5718 = vrcp.f32 %v1108_v31  ;;  %v1001_v16 = vsub.f32 %v9164_v43, %v962_v24 }
 0x290   : > { %1145 = vadd.xlane.f32.xlu0 %v7220_v56 }
 0x291   : > { %5720 = vpow2.f32 %v1087_v14  ;;  %v1033_v41 = vmul.f32 -0.1, %v1001_v16 }
 0x292   : > { %v964_v1 = vpop.xlane.xlu1 %963  ;;  %v1110_v63 = vpop.xlane.xlu0 %1109 }
 0x293   : > { %v7225_v61 = vpop.eup %5712  ;;  %v1089_v34 = vmul.f32 1.442695, %v1033_v41  ;;  %v1002_v27 = vsub.f32 %v9165_v57, %v964_v1  ;;  %5722 = vrcp.f32 %v1110_v63  ;;  %v9167_v41 = vmax.f32 %v7104_v15, 0.0 }
 0x294   : > { %1147 = vadd.xlane.f32.xlu1 %v7225_v61 }
 0x295   : > { %v5715_v10 = vpop.eup %5714  ;;  %5724 = vpow2.f32 %v1089_v34  ;;  %v1034_v26 = vmul.f32 -0.1, %v1002_v27 }
 0x296   : > { %v1112_v53 = vpop.xlane.xlu1 %1111  ;;  %v966_v4 = vpop.xlane.xlu0 %965  ;;  %v1170_v29 = vmul.f32 %v5715_v10, %v7066_v39 }
 0x297   : > { %v7231_v22 = vpop.eup %5716  ;;  %v1091_v33 = vmul.f32 1.442695, %v1034_v26  ;;  %5726 = vrcp.f32 %v1112_v53  ;;  %v1003_v49 = vsub.f32 %v9166_v9, %v966_v4  ;;  %v9168_v26 = vmax.f32 %v7118_v45, 0.0 }
 0x298   : > { %1149 = vadd.xlane.f32.xlu0 %v7231_v22  ;;  %4883 = vmatprep.mubr.f32.mxu1 %v1170_v29 }
 0x299   : > { %v5719_v6 = vpop.eup %5718  ;;  %5728 = vpow2.f32 %v1091_v33  ;;  %v1035_v31 = vmul.f32 -0.1, %v1003_v49 }
 0x29a   : > { %v968_v24 = vpop.xlane.xlu1 %967  ;;  %v1114_v14 = vpop.xlane.xlu0 %1113  ;;  %v1172_v43 = vmul.f32 %v5719_v6, %v7078_v7  ;;  %v9169_v6 = vmax.f32 %v7128_v37, 0.0 }
 0x29b   : > { %v7237_v16 = vpop.eup %5720  ;;  %v1093_v39 = vmul.f32 1.442695, %v1035_v31  ;;  %v1004_v1 = vsub.f32 %v9167_v41, %v968_v24  ;;  %5730 = vrcp.f32 %v1114_v14 }
 0x29c   : > { %1151 = vadd.xlane.f32.xlu1 %v7237_v16  ;;  %4884 = vmatmul.mubr.f32.vlgmr.msra.gmra.mrb[0].mxu1 %v1172_v43 }
 0x29d   : > { %v5723_v59 = vpop.eup %5722  ;;  %5732 = vpow2.f32 %v1093_v39  ;;  %v1036_v63 = vmul.f32 -0.1, %v1004_v1  ;;  %v9170_v1 = vmax.f32 %v7142_v35, 0.0 }
 0x29e   : > { %v1116_v34 = vpop.xlane.xlu1 %1115  ;;  %v970_v57 = vpop.xlane.xlu0 %969  ;;  %v1174_v27 = vmul.f32 %v5723_v59, %v7090_v46 }
 0x29f   : > { %v7243_v10 = vpop.eup %5724  ;;  %v1095_v7 = vmul.f32 1.442695, %v1036_v63  ;;  %5734 = vrcp.f32 %v1116_v34  ;;  %v1005_v53 = vsub.f32 %v9168_v26, %v970_v57  ;;  %v9171_v26 = vmax.f32 %v7152_v21, 0.0 }
 0x2a0   : > { %1153 = vadd.xlane.f32.xlu0 %v7243_v10  ;;  %4886 = vmatprep.mubr.f32.mxu1 %v1174_v27 }
 0x2a1   : > { %v5727_v15 = vpop.eup %5726  ;;  %5736 = vpow2.f32 %v1095_v7  ;;  %v1037_v4 = vmul.f32 -0.1, %v1005_v53 }
 0x2a2   : > { %v972_v29 = vpop.xlane.xlu1 %971  ;;  %v1118_v33 = vpop.xlane.xlu0 %1117  ;;  %v1176_v9 = vmul.f32 %v5727_v15, %v7102_v11 }
 0x2a3   : > { %v7249_v49 = vpop.eup %5728  ;;  %v1097_v46 = vmul.f32 1.442695, %v1037_v4  ;;  %v1006_v31 = vsub.f32 %v9169_v6, %v972_v29  ;;  %5738 = vrcp.f32 %v1118_v33 }
 0x2a4   : > { %1155 = vadd.xlane.f32.xlu1 %v7249_v49  ;;  %4887 = vmatmul.mubr.f32.gmra.mrb[2].mxu1 %v1176_v9 }
 0x2a5   : > { %v5731_v45 = vpop.eup %5730  ;;  %5740 = vpow2.f32 %v1097_v46  ;;  %v1038_v24 = vmul.f32 -0.1, %v1006_v31 }
 0x2a6   : > { %v1120_v14 = vpop.xlane.xlu1 %1119  ;;  %v974_v43 = vpop.xlane.xlu0 %973  ;;  %v1178_v39 = vmul.f32 %v5731_v45, %v7114_v19  ;;  %v1539_v45 = vld [vmem:[#allocation4 + $0x8] sm:$0xff] }
 0x2a7   : > { %v7255_v41 = vpop.eup %5732  ;;  %v1099_v11 = vmul.f32 1.442695, %v1038_v24  ;;  %5742 = vrcp.f32 %v1120_v14  ;;  %v1007_v59 = vsub.f32 %v9170_v1, %v974_v43  ;;  %v1544_v24 = vld [vmem:[#allocation4 + $0x30] sm:$0xff] }
 0x2a8   : > { %1157 = vadd.xlane.f32.xlu0 %v7255_v41  ;;  %4889 = vmatprep.mubr.f32.mxu1 %v1178_v39  ;;  %v1538_v39 = vld [vmem:[#allocation4] sm:$0xff] }
 0x2a9   : > { %v5735_v37 = vpop.eup %5734  ;;  %5744 = vpow2.f32 %v1099_v11  ;;  %v1039_v63 = vmul.f32 -0.1, %v1007_v59  ;;  %v1543_v11 = vld [vmem:[#allocation4 + $0x28] sm:$0xff] }
 0x2aa   : > { %v976_v34 = vpop.xlane.xlu1 %975  ;;  %v1122_v57 = vpop.xlane.xlu0 %1121  ;;  %v1180_v27 = vmul.f32 %v5735_v37, %v7126_v48  ;;  %v5213_v59 = vpack.c.bf16 %v1543_v11, %v1538_v39 }
 0x2ab   : > { %v7261_v7 = vpop.eup %5736  ;;  %v1101_v19 = vmul.f32 1.442695, %v1039_v63  ;;  %v1008_v53 = vsub.f32 %v9171_v26, %v976_v34  ;;  %5746 = vrcp.f32 %v1122_v57 }
 0x2ac   : > { %1159 = vadd.xlane.f32.xlu1 %v7261_v7  ;;  %4890 = vmatmul.mubr.f32.gmra.mrb[4].mxu1 %v1180_v27 }
 0x2ad   : > { %v5739_v35 = vpop.eup %5738  ;;  %5748 = vpow2.f32 %v1101_v19  ;;  %v1040_v15 = vmul.f32 -0.1, %v1008_v53 }
 0x2ae   : > { %v1124_v4 = vpop.xlane.xlu1 %1123  ;;  %v1182_v29 = vmul.f32 %v5739_v35, %v7138_v25  ;;  %v5211_v25 = vpack.c.bf16 %v1544_v24, %v1539_v45 }
 0x2af   : > { %v7267_v33 = vpop.eup %5740  ;;  %v1103_v9 = vmul.f32 1.442695, %v1040_v15  ;;  %5750 = vrcp.f32 %v1124_v4  ;;  %v1126_v48 = vpop.xlane.xlu0 %1125  ;;  %v1549_v4 = vld [vmem:[#allocation4 + $0x58] sm:$0xff] }
 0x2b0   : > { %5752 = vrcp.f32 %v1126_v48  ;;  %1161 = vadd.xlane.f32.xlu0 %v7267_v33  ;;  %4892 = vmatprep.mubr.f32.mxu1 %v1182_v29  ;;  %v1554_v29 = vld [vmem:[#allocation4 + $0x80] sm:$0xff]  ;;  %v1548_v48 = vld [vmem:[#allocation4 + $0x50] sm:$0xff] }
 0x2b1   : > { %v5743_v21 = vpop.eup %5742  ;;  %5754 = vpow2.f32 %v1103_v9  ;;  %5212 = vmatprep.subr.bf16.mxu0 %v5211_v25  ;;  %5531 = vmatprep.subr.bf16.mxu1 %v5211_v25  ;;  %v5215_v9 = vpack.c.bf16 %v1554_v29, %v1549_v4  ;;  %v1578_v29 = vld [vmem:[#allocation4 + $0x140] sm:$0xff] }
 0x2b2   : > { %v1184_v46 = vmul.f32 %v5743_v21, %v7150_v54  ;;  %5214 = vmatpush1.bf16.msra.mxu0 %v5213_v59  ;;  %5539 = vmatpush1.bf16.msra.mxu1 %v5213_v59  ;;  %v1553_v21 = vld [vmem:[#allocation4 + $0x78] sm:$0xff]  ;;  %v1564_v59 = vld [vmem:[#allocation4 + $0xd0] sm:$0xff] }
 0x2b3   : > { %v7271_v6 = vpop.eup %5744  ;;  %v1128_v31 = vpop.xlane.xlu1 %1127  ;;  %5216 = vmatprep.subr.bf16.mxu0 %v5215_v9  ;;  %5532 = vmatprep.subr.bf16.mxu1 %v5215_v9  ;;  %v1583_v9 = vld [vmem:[#allocation4 + $0x168] sm:$0xff] }
 0x2b4   : > { %5756 = vrcp.f32 %v1128_v31  ;;  %1163 = vadd.xlane.f32.xlu1 %v7271_v6  ;;  %4893 = vmatmul.mubr.f32.gmra.mrb[6].mxu1 %v1184_v46 }
 0x2b5   : > { %v5747_v14 = vpop.eup %5746 }
 0x2b6   : > { %v1186_v43 = vmul.f32 %v5747_v14, %v7160_v3 }
 0x2b7   : > { %v7275_v1 = vpop.eup %5748  ;;  %v1130_v54 = vpop.xlane.xlu0 %1129 }
 0x2b8   : > { %5758 = vrcp.f32 %v1130_v54  ;;  %1165 = vadd.xlane.f32.xlu0 %v7275_v1  ;;  %4895 = vmatprep.mubr.f32.mxu1 %v1186_v43  ;;  %v1559_v54 = vld [vmem:[#allocation4 + $0xa8] sm:$0xff] }
 0x2b9   : > { %v5751_v37 = vpop.eup %5750 }
 0x2ba   : > { %v5753_v63 = vpop.eup %5752  ;;  %v1188_v34 = vmul.f32 %v5751_v37, %v7167_v20  ;;  %v1558_v37 = vld [vmem:[#allocation4 + $0xa0] sm:$0xff] }
 0x2bb   : > { %v7279_v57 = vpop.eup %5754  ;;  %v1132_v3 = vpop.xlane.xlu1 %1131  ;;  %v1190_v27 = vmul.f32 %v5753_v63, %v7169_v58  ;;  %v5219_v63 = vpack.c.bf16 %v1564_v59, %v1559_v54  ;;  %v1609_v54 = vld [vmem:[#allocation4 + $0x238] sm:$0xff]  ;;  %v1614_v59 = vld [vmem:[#allocation4 + $0x260] sm:$0xff] }
 0x2bc   : > { %5760 = vrcp.f32 %v1132_v3  ;;  %1167 = vadd.xlane.f32.xlu1 %v7279_v57  ;;  %4896 = vmatmul.mubr.f32.gmra.mrb[8].mxu1 %v1188_v34  ;;  %v1563_v34 = vld [vmem:[#allocation4 + $0xc8] sm:$0xff] }
 0x2bd   : > { %4898 = vmatprep.mubr.f32.mxu1 %v1190_v27 }
 0x2be   : > { %v5757_v19 = vpop.eup %5756 }
 0x2bf   : > { %v1134_v26 = vpop.xlane.xlu0 %1133  ;;  %v1192_v53 = vmul.f32 %v5757_v19, %v7175_v62  ;;  %v5217_v62 = vpack.c.bf16 %v1553_v21, %v1548_v48  ;;  %v1574_v19 = vld [vmem:[#allocation4 + $0x120] sm:$0xff] }
 0x2c0   : > { %5762 = vrcp.f32 %v1134_v26  ;;  %v1568_v26 = vld [vmem:[#allocation4 + $0xf0] sm:$0xff]  ;;  %v1594_v21 = vld [vmem:[#allocation4 + $0x1c0] sm:$0xff] }
 0x2c1   : > { %4899 = vmatmul.mubr.f32.gmra.mrb[10].mxu1 %v1192_v53  ;;  %5218 = vmatpush1.bf16.msra.mxu0 %v5217_v62 }
 0x2c2   : > { %v5759_v35 = vpop.eup %5758  ;;  %5540 = vmatpush1.bf16.msra.mxu1 %v5217_v62  ;;  %5220 = vmatprep.subr.bf16.mxu0 %v5219_v63  ;;  %v1588_v62 = vld [vmem:[#allocation4 + $0x190] sm:$0xff] }
 0x2c3   : > { %v1136_v15 = vpop.xlane.xlu1 %1135  ;;  %v1194_v20 = vmul.f32 %v5759_v35, %v7180_v8  ;;  %5533 = vmatprep.subr.bf16.mxu1 %v5219_v63  ;;  %v1579_v35 = vld [vmem:[#allocation4 + $0x148] sm:$0xff]  ;;  %v1613_v63 = vld [vmem:[#allocation4 + $0x258] sm:$0xff] }
 0x2c4   : > { %5764 = vrcp.f32 %v1136_v15  ;;  %v1584_v15 = vld [vmem:[#allocation4 + $0x170] sm:$0xff] }
 0x2c5   : > { %4901 = vmatprep.mubr.f32.mxu1 %v1194_v20  ;;  %v5227_v4 = vpack.c.bf16 %v1584_v15, %v1579_v35 }
 0x2c6   : > { %v5761_v58 = vpop.eup %5760 }
 0x2c7   : > { %v1138_v46 = vpop.xlane.xlu0 %1137  ;;  %v1196_v31 = vmul.f32 %v5761_v58, %v7185_v17  ;;  %v1589_v58 = vld [vmem:[#allocation4 + $0x198] sm:$0xff] }
 0x2c8   : > { %5766 = vrcp.f32 %v1138_v46  ;;  %v5229_v46 = vpack.c.bf16 %v1583_v9, %v1578_v29 }
 0x2c9   : > { %4902 = vmatmul.mubr.f32.gmra.mrb[12].mxu1 %v1196_v31  ;;  %v5231_v31 = vpack.c.bf16 %v1594_v21, %v1589_v58 }
 0x2ca   : > { %v5763_v45 = vpop.eup %5762 }
 0x2cb   : > { %v1140_v8 = vpop.xlane.xlu1 %1139  ;;  %v1198_v24 = vmul.f32 %v5763_v45, %v7190_v40  ;;  %v5221_v40 = vpack.c.bf16 %v1563_v34, %v1558_v37  ;;  %v1593_v45 = vld [vmem:[#allocation4 + $0x1b8] sm:$0xff]  ;;  %v5239_v37 = vpack.c.bf16 %v1614_v59, %v1609_v54  ;;  %v9118_v59 = vsub.s32 1, %v6798_v23 }
 0x2cc   : > { %5768 = vrcp.f32 %v1140_v8  ;;  %v1599_v8 = vld [vmem:[#allocation4 + $0x1e8] sm:$0xff] }
 0x2cd   : > { %4904 = vmatprep.mubr.f32.mxu1 %v1198_v24  ;;  %5222 = vmatpush1.bf16.msra.mxu0 %v5221_v40  ;;  %v1604_v24 = vld [vmem:[#allocation4 + $0x210] sm:$0xff] }
 0x2ce   : > { %v5765_v25 = vpop.eup %5764  ;;  %5541 = vmatpush1.bf16.msra.mxu1 %v5221_v40  ;;  %v1541_v40 = vld [vmem:[#allocation4 + $0x18] sm:$0xff] }
 0x2cf   : > { %v1142_v14 = vpop.xlane.xlu0 %1141  ;;  %v1200_v43 = vmul.f32 %v5765_v25, %v7195_v50  ;;  %v1569_v50 = vld [vmem:[#allocation4 + $0xf8] sm:$0xff] }
 0x2d0   : > { %5770 = vrcp.f32 %v1142_v14  ;;  %v5223_v53 = vpack.c.bf16 %v1574_v19, %v1569_v50 }
 0x2d1   : > { %4905 = vmatmul.mubr.f32.gmra.mrb[14].mxu1 %v1200_v43  ;;  %v5233_v43 = vpack.c.bf16 %v1593_v45, %v1588_v62 }
 0x2d2   : > { %v5767_v39 = vpop.eup %5766  ;;  %5224 = vmatprep.subr.bf16.mxu0 %v5223_v53  ;;  %5534 = vmatprep.subr.bf16.mxu1 %v5223_v53 }
 0x2d3   : > { %v1144_v11 = vpop.xlane.xlu1 %1143  ;;  %v1202_v17 = vmul.f32 %v5767_v39, %v7200_v47  ;;  %v1573_v47 = vld [vmem:[#allocation4 + $0x118] sm:$0xff]  ;;  %v5235_v39 = vpack.c.bf16 %v1604_v24, %v1599_v8 }
 0x2d4   : > { %5772 = vrcp.f32 %v1144_v11  ;;  %v5225_v20 = vpack.c.bf16 %v1573_v47, %v1568_v26  ;;  %v1603_v11 = vld [vmem:[#allocation4 + $0x208] sm:$0xff] }
 0x2d5   : > { %4907 = vmatprep.mubr.f32.mxu1 %v1202_v17 }
 0x2d6   : > { %v5769_v3 = vpop.eup %5768  ;;  %5226 = vmatpush1.bf16.msra.mxu0 %v5225_v20  ;;  %5542 = vmatpush1.bf16.msra.mxu1 %v5225_v20 }
 0x2d7   : > { %v1204_v27 = vmul.f32 %v5769_v3, %v7203_v0  ;;  %5228 = vmatprep.subr.bf16.mxu0 %v5227_v4  ;;  %5535 = vmatprep.subr.bf16.mxu1 %v5227_v4  ;;  %v1546_v3 = vld [vmem:[#allocation4 + $0x40] sm:$0xff] }
 0x2d8   : > { %v5243_v50 = vpack.c.bf16 %v1546_v3, %v1541_v40  ;;  %v1551_v40 = vld [vmem:[#allocation4 + $0x68] sm:$0xff]  ;;  %v1556_v3 = vld [vmem:[#allocation4 + $0x90] sm:$0xff] }
 0x2d9   : > { %4908 = vmatmul.mubr.f32.gmra.mrb[16].mxu1 %v1204_v27 }
 0x2da   : > { %v5771_v48 = vpop.eup %5770  ;;  %5230 = vmatpush1.bf16.msra.mxu0 %v5229_v46  ;;  %5543 = vmatpush1.bf16.msra.mxu1 %v5229_v46 }
 0x2db   : > { %v1206_v0 = vmul.f32 %v5771_v48, %v7206_v18  ;;  %5232 = vmatprep.subr.bf16.mxu0 %v5231_v31  ;;  %v1598_v18 = vld [vmem:[#allocation4 + $0x1e0] sm:$0xff]  ;;  %5536 = vmatprep.subr.bf16.mxu1 %v5231_v31 }
 0x2dc   : > { %v5237_v17 = vpack.c.bf16 %v1603_v11, %v1598_v18 }
 0x2dd   : > { %4910 = vmatprep.mubr.f32.mxu1 %v1206_v0 }
 0x2de   : > { %v5773_v25 = vpop.eup %5772  ;;  %5234 = vmatpush1.bf16.msra.mxu0 %v5233_v43  ;;  %5544 = vmatpush1.bf16.msra.mxu1 %v5233_v43 }
 0x2df   : > { %v1208_v14 = vmul.f32 %v5773_v25, %v7209_v28  ;;  %5236 = vmatprep.subr.bf16.mxu0 %v5235_v39  ;;  %5537 = vmatprep.subr.bf16.mxu1 %v5235_v39  ;;  %v1608_v28 = vld [vmem:[#allocation4 + $0x230] sm:$0xff] }
 0x2e0   : > { %v5241_v34 = vpack.c.bf16 %v1613_v63, %v1608_v28  ;;  %v1540_v63 = vld [vmem:[#allocation4 + $0x10] sm:$0xff] }
 0x2e1   : > { %4911 = vmatmul.mubr.f32.gmra.mrb[18].mxu1 %v1208_v14 }
 0x2e2   : > { %5238 = vmatpush1.bf16.msra.mxu0 %v5237_v17  ;;  %5545 = vmatpush1.bf16.msra.mxu1 %v5237_v17 }
 0x2e3   : > { %5240 = vmatprep.subr.bf16.mxu0 %v5239_v37  ;;  %5538 = vmatprep.subr.bf16.mxu1 %v5239_v37  ;;  %v6310_v37 = vld [vmem:[#allocation2 + $0x40] ss:$8 sm:$0x3] }
 0x2e6   : > { %5242 = vmatpush1.bf16.msra.mxu0 %v5241_v34  ;;  %5546 = vmatpush1.bf16.msra.mxu1 %v5241_v34  ;;  %v1545_v34 = vld [vmem:[#allocation4 + $0x38] sm:$0xff] }
 0x2e7   : > { %5244 = vmatprep.subr.bf16.mxu0 %v5243_v50 }
 0x31d   : > { %v1146_v27 = vpop.xlane.xlu0 %1145 }
 0x31e   : > { %5774 = vrcp.f32 %v1146_v27 }
 0x321   : > { %v1148_v19 = vpop.xlane.xlu1 %1147 }
 0x322   : > { %5776 = vrcp.f32 %v1148_v19 }
 0x325   : > { %v1150_v26 = vpop.xlane.xlu0 %1149 }
 0x326   : > { %5778 = vrcp.f32 %v1150_v26  ;;  %v5245_v26 = vpack.c.bf16 %v1545_v34, %v1540_v63  ;;  %v1595_v63 = vld [vmem:[#allocation4 + $0x1c8] sm:$0xff] }
 0x328   : > { %v5775_v53 = vpop.eup %5774 }
 0x329   : > { %v1152_v47 = vpop.xlane.xlu1 %1151  ;;  %v1210_v35 = vmul.f32 %v5775_v53, %v7220_v56 }
 0x32a   : > { %5780 = vrcp.f32 %v1152_v47  ;;  %v5247_v47 = vpack.c.bf16 %v1556_v3, %v1551_v40  ;;  %v1601_v40 = vld [vmem:[#allocation4 + $0x1f8] sm:$0xff]  ;;  %v1606_v3 = vld [vmem:[#allocation4 + $0x220] sm:$0xff] }
 0x32b   : > { %4913 = vmatprep.mubr.f32.mxu1 %v1210_v35  ;;  %v1555_v35 = vld [vmem:[#allocation4 + $0x88] sm:$0xff] }
 0x32c   : > { %v5777_v15 = vpop.eup %5776 }
 0x32d   : > { %v1154_v20 = vpop.xlane.xlu0 %1153  ;;  %v1212_v4 = vmul.f32 %v5777_v15, %v7225_v61 }
 0x32e   : > { %5782 = vrcp.f32 %v1154_v20  ;;  %v1561_v20 = vld [vmem:[#allocation4 + $0xb8] sm:$0xff] }
 0x32f   : > { %4914 = vmatmul.mubr.f32.gmra.mrb[20].mxu1 %v1212_v4  ;;  %v1566_v4 = vld [vmem:[#allocation4 + $0xe0] sm:$0xff] }
 0x330   : > { %v5779_v29 = vpop.eup %5778 }
 0x331   : > { %v1156_v9 = vpop.xlane.xlu1 %1155  ;;  %v1214_v58 = vmul.f32 %v5779_v29, %v7231_v22 }
 0x332   : > { %5784 = vrcp.f32 %v1156_v9  ;;  %v5251_v9 = vpack.c.bf16 %v1566_v4, %v1561_v20 }
 0x333   : > { %4916 = vmatprep.mubr.f32.mxu1 %v1214_v58  ;;  %v1565_v58 = vld [vmem:[#allocation4 + $0xd8] sm:$0xff] }
 0x334   : > { %v5781_v48 = vpop.eup %5780 }
 0x335   : > { %v1158_v21 = vpop.xlane.xlu0 %1157  ;;  %v1216_v0 = vmul.f32 %v5781_v48, %v7237_v16  ;;  %v1571_v48 = vld [vmem:[#allocation4 + $0x108] sm:$0xff] }
 0x336   : > { %5786 = vrcp.f32 %v1158_v21  ;;  %v1576_v21 = vld [vmem:[#allocation4 + $0x130] sm:$0xff] }
 0x337   : > { %4917 = vmatmul.mubr.f32.gmra.mrb[22].mxu1 %v1216_v0 }
 0x338   : > { %v5783_v56 = vpop.eup %5782 }
 0x339   : > { %v1160_v46 = vpop.xlane.xlu1 %1159  ;;  %v1218_v31 = vmul.f32 %v5783_v56, %v7243_v10 }
 0x33a   : > { %5788 = vrcp.f32 %v1160_v46 }
 0x33b   : > { %4919 = vmatprep.mubr.f32.mxu1 %v1218_v31 }
 0x33c   : > { %v5785_v61 = vpop.eup %5784 }
 0x33d   : > { %v1162_v62 = vpop.xlane.xlu0 %1161  ;;  %v1220_v45 = vmul.f32 %v5785_v61, %v7249_v49 }
 0x33e   : > { %5790 = vrcp.f32 %v1162_v62 }
 0x33f   : > { %4920 = vmatmul.mubr.f32.gmra.mrb[24].mxu1 %v1220_v45 }
 0x340   : > { %v5787_v22 = vpop.eup %5786 }
 0x341   : > { %v1164_v8 = vpop.xlane.xlu1 %1163  ;;  %v1222_v24 = vmul.f32 %v5787_v22, %v7255_v41  ;;  %v5255_v22 = vpack.c.bf16 %v1576_v21, %v1571_v48 }
 0x342   : > { %5792 = vrcp.f32 %v1164_v8  ;;  %v1570_v8 = vld [vmem:[#allocation4 + $0x100] sm:$0xff] }
 0x343   : > { %4922 = vmatprep.mubr.f32.mxu1 %v1222_v24  ;;  %v1575_v24 = vld [vmem:[#allocation4 + $0x128] sm:$0xff] }
 0x344   : > { %v5789_v16 = vpop.eup %5788 }
 0x345   : > { %v1166_v25 = vpop.xlane.xlu0 %1165  ;;  %v1224_v14 = vmul.f32 %v5789_v16, %v7261_v7  ;;  %v9172_v7 = vmov 0.0  }
 0x346   : > { %5794 = vrcp.f32 %v1166_v25  ;;  %v1581_v25 = vld [vmem:[#allocation4 + $0x158] sm:$0xff] }
 0x347   : > { %4923 = vmatmul.mubr.f32.gmra.mrb[26].mxu1 %v1224_v14  ;;  %v1586_v14 = vld [vmem:[#allocation4 + $0x180] sm:$0xff] }
 0x348   : > { %v5791_v10 = vpop.eup %5790 }
 0x349   : > { %v1168_v43 = vpop.xlane.xlu1 %1167  ;;  %v1226_v39 = vmul.f32 %v5791_v10, %v7267_v33  ;;  %v7308_v33 = vrot.slane %v6310_v37, %v9118_v59  ;;  %v5257_v10 = vpack.c.bf16 %v1575_v24, %v1570_v8 }
 0x34a   : > { %5796 = vrcp.f32 %v1168_v43  ;;  %v1580_v43 = vld [vmem:[#allocation4 + $0x150] sm:$0xff] }
 0x34b   : > { %4925 = vmatprep.mubr.f32.mxu1 %v1226_v39  ;;  %v545_v28 = vadd.f32 %v6820_v44, %v7308_v33  ;;  %v563_v53 = vadd.f32 %v6851_v5, %v7308_v33  ;;  %v1550_v44 = vld [vmem:[#allocation4 + $0x60] sm:$0xff]  ;;  %v557_v15 = vadd.f32 %v6840_v60, %v7308_v33  ;;  %v1560_v5 = vld [vmem:[#allocation4 + $0xb0] sm:$0xff]  ;;  %v575_v62 = vadd.f32 %v6873_v32, %v7308_v33  ;;  %v1585_v39 = vld [vmem:[#allocation4 + $0x178] sm:$0xff] }
 0x34c   : > { %v5793_v49 = vpop.eup %5792  ;;  %v5249_v29 = vpack.c.bf16 %v1555_v35, %v1550_v44  ;;  %v5253_v61 = vpack.c.bf16 %v1565_v58, %v1560_v5  ;;  %v569_v16 = vadd.f32 %v6862_v13, %v7308_v33  ;;  %v5259_v32 = vpack.c.bf16 %v1586_v14, %v1581_v25  ;;  %v1615_v5 = vld [vmem:[#allocation4 + $0x268] sm:$0xff]  ;;  %v9173_v14 = vld [vmem:[#allocation13_spill] sm:$0xff] }
 0x34d   : > { %v1228_v18 = vmul.f32 %v5793_v49, %v7271_v6  ;;  %v539_v6 = vadd.f32 %v6811_v36, %v7308_v33  ;;  %v1591_v49 = vld [vmem:[#allocation4 + $0x1a8] sm:$0xff]  ;;  %v5261_v37 = vpack.c.bf16 %v1585_v39, %v1580_v43  ;;  %v581_v34 = vadd.f32 %v6884_v42, %v7308_v33 }
 0x34e   : > { %v611_v58 = vadd.f32 %v6937_v51, %v7308_v33  ;;  %v605_v21 = vadd.f32 %v6928_v38, %v7308_v33  ;;  %v1542_v51 = vld [vmem:[#allocation4 + $0x20] sm:$0xff]  ;;  %v9174_v43 = vld [vmem:[#allocation12_spill] sm:$0xff] }
 0x34f   : > { %4926 = vmatmul.mubr.f32.gmra.mrb[28].mxu1 %v1228_v18  ;;  %5798 = vtanh.f32 %v539_v6  ;;  %v1596_v18 = vld [vmem:[#allocation4 + $0x1d0] sm:$0xff]  ;;  %v587_v6 = vadd.f32 %v6895_v55, %v7308_v33  ;;  %v5267_v55 = vpack.c.bf16 %v1606_v3, %v1601_v40  ;;  %v617_v39 = vadd.f32 %v9174_v43, %v7308_v33 }
 0x350   : > { %v5795_v11 = vpop.eup %5794 }
 0x351   : > { %v1230_v41 = vmul.f32 %v5795_v11, %v7275_v1  ;;  %v533_v1 = vadd.f32 %v6806_v30, %v7308_v33 }
 0x353   : > { %4928 = vmatprep.mubr.f32.mxu1 %v1230_v41  ;;  %5800 = vtanh.f32 %v533_v1 }
 0x354   : > { %v5797_v17 = vpop.eup %5796 }
 0x355   : > { %v1232_v54 = vmul.f32 %v5797_v17, %v7279_v57  ;;  %v551_v57 = vadd.f32 %v6829_v52, %v7308_v33 }
 0x357   : > { %4929 = vmatmul.mubr.f32.gmra.mrb[30].mxu1 %v1232_v54  ;;  %5802 = vtanh.f32 %v551_v57  ;;  %v5263_v57 = vpack.c.bf16 %v1596_v18, %v1591_v49 }
 0x358   : > { %1826 = vmatprep.mubr.f32.mxu1 %v9172_v7  ;;  %5804 = vtanh.f32 %v545_v28  ;;  %v1590_v28 = vld [vmem:[#allocation4 + $0x1a0] sm:$0xff] }
 0x359   : > { %v5799_v27 = vpop.eup %5798  ;;  %5806 = vtanh.f32 %v563_v53  ;;  %v1616_v53 = vld [vmem:[#allocation4 + $0x270] sm:$0xff] }
 0x35a   : > { %5808 = vtanh.f32 %v557_v15 }
 0x35b   : > { %5810 = vtanh.f32 %v575_v62  ;;  %v1547_v62 = vld [vmem:[#allocation4 + $0x48] sm:$0xff] }
 0x35c   : > { %5812 = vtanh.f32 %v569_v16  ;;  %v7376_v8 = vpack.c.bf16 %v1547_v62, %v1542_v51  ;;  %v1572_v62 = vld [vmem:[#allocation4 + $0x110] sm:$0xff] }
 0x35d   : > { %v5801_v36 = vpop.eup %5800  ;;  %5814 = vtanh.f32 %v587_v6 }
 0x35e   : > { %5816 = vtanh.f32 %v581_v34  ;;  %5276 = vmatprep.subr.bf16.mxu1 %v7376_v8 }
 0x361   : > { %v5803_v0 = vpop.eup %5802 }
 0x362   : > { %v5805_v60 = vpop.eup %5804 }
 0x363   : > { %v5807_v11 = vpop.eup %5806 }
 0x364   : > { %v5809_v13 = vpop.eup %5808 }
 0x365   : > { %v5811_v42 = vpop.eup %5810 }
 0x366   : > { %v5813_v35 = vpop.eup %5812 }
 0x367   : > { %v5815_v48 = vpop.eup %5814 }
 0x36f   : > { %v4885_v50 = vpop.f32.mrb[0].mxu1 }
 0x370   : > { %v7318_v19 = vmul.f32 %v5799_v27, %v4885_v50  ;;  %v1347_v30 = vpop.f32.mrb[1].mxu1  ;;  %v5265_v27 = vpack.c.bf16 %v1595_v63, %v1590_v28  ;;  %v1600_v50 = vld [vmem:[#allocation4 + $0x1f0] sm:$0xff] }
 0x371   : > { %v7322_v52 = vmul.f32 %v5801_v36, %v1347_v30  ;;  %v1605_v36 = vld [vmem:[#allocation4 + $0x218] sm:$0xff]  ;;  %v599_v30 = vadd.f32 %v6917_v12, %v7308_v33 }
 0x372   : > { %v5269_v4 = vpack.c.bf16 %v1605_v36, %v1600_v50 }
 0x373   : > { %1713 = vmatmul.mubr.f32.vlgmr.msra.gmra.mrb[64].mxu0 %v7322_v52  ;;  %5818 = vtanh.f32 %v599_v30  ;;  %v9178_v30 = vld [vmem:[#allocation16_spill] sm:$0xff] }
 0x374   : > { %1718 = vmatprep.mubr.f32.mxu0 %v9172_v7  ;;  %5246 = vmatpush1.bf16.msra.mxu0 %v5245_v26  ;;  %v1611_v26 = vld [vmem:[#allocation4 + $0x248] sm:$0xff] }
 0x375   : > { %5248 = vmatprep.subr.bf16.mxu0 %v5247_v47  ;;  %v593_v47 = vadd.f32 %v6906_v2, %v7308_v33  ;;  %v5271_v12 = vpack.c.bf16 %v1616_v53, %v1611_v26  ;;  %v641_v26 = vadd.f32 %v9178_v30, %v7308_v33 }
 0x377   : > { %v4888_v56 = vpop.f32.mrb[2].mxu1  ;;  %1719 = vmatmul.mubr.f32.gmra.mrb[66].mxu0 %v7318_v19  ;;  %5820 = vtanh.f32 %v593_v47 }
 0x378   : > { %v7329_v46 = vmul.f32 %v5803_v0, %v4888_v56  ;;  %v1357_v31 = vpop.f32.mrb[3].mxu1  ;;  %1724 = vmatprep.mubr.f32.mxu0 %v9172_v7  ;;  %5250 = vmatpush1.bf16.msra.mxu0 %v5249_v29  ;;  %v5817_v56 = vpop.eup %5816  ;;  %5822 = vtanh.f32 %v611_v58 }
 0x379   : > { %v7334_v45 = vmul.f32 %v5805_v60, %v1357_v31  ;;  %5252 = vmatprep.subr.bf16.mxu0 %v5251_v9  ;;  %v1610_v9 = vld [vmem:[#allocation4 + $0x240] sm:$0xff]  ;;  %5824 = vtanh.f32 %v605_v21 }
 0x37a   : > { %v5273_v2 = vpack.c.bf16 %v1615_v5, %v1610_v9 }
 0x37b   : > { %1725 = vmatmul.mubr.f32.gmra.mrb[68].mxu0 %v7334_v45 }
 0x37c   : > { %1730 = vmatprep.mubr.f32.mxu0 %v9172_v7  ;;  %5254 = vmatpush1.bf16.msra.mxu0 %v5253_v61 }
 0x37d   : > { %5256 = vmatprep.subr.bf16.mxu0 %v5255_v22  ;;  %v5819_v22 = vpop.eup %5818 }
 0x37f   : > { %v4891_v41 = vpop.f32.mrb[4].mxu1  ;;  %1731 = vmatmul.mubr.f32.gmra.mrb[70].mxu0 %v7329_v46 }
 0x380   : > { %v7341_v17 = vmul.f32 %v5807_v11, %v4891_v41  ;;  %v1367_v54 = vpop.f32.mrb[5].mxu1  ;;  %1736 = vmatprep.mubr.f32.mxu0 %v9172_v7  ;;  %5258 = vmatpush1.bf16.msra.mxu0 %v5257_v10  ;;  %v623_v10 = vadd.f32 %v9173_v14, %v7308_v33  ;;  %v1592_v14 = vld [vmem:[#allocation4 + $0x1b0] sm:$0xff] }
 0x381   : > { %v7346_v1 = vmul.f32 %v5809_v13, %v1367_v54  ;;  %5260 = vmatprep.subr.bf16.mxu0 %v5259_v32  ;;  %v5821_v24 = vpop.eup %5820  ;;  %v9175_v54 = vld [vmem:[#allocation15_spill] sm:$0xff] }
 0x382   : > { %5826 = vtanh.f32 %v623_v10  ;;  %v5823_v49 = vpop.eup %5822  ;;  %v1597_v10 = vld [vmem:[#allocation4 + $0x1d8] sm:$0xff] }
 0x383   : > { %1737 = vmatmul.mubr.f32.gmra.mrb[72].mxu0 %v7346_v1  ;;  %5828 = vtanh.f32 %v617_v39  ;;  %v5825_v11 = vpop.eup %5824  ;;  %v5295_v43 = vpack.c.bf16 %v1597_v10, %v1592_v14  ;;  %v1602_v39 = vld [vmem:[#allocation4 + $0x200] sm:$0xff] }
 0x384   : > { %1742 = vmatprep.mubr.f32.mxu0 %v9172_v7  ;;  %5262 = vmatpush1.bf16.msra.mxu0 %v5261_v37  ;;  %v635_v37 = vadd.f32 %v9175_v54, %v7308_v33 }
 0x385   : > { %5264 = vmatprep.subr.bf16.mxu0 %v5263_v57  ;;  %v9176_v57 = vld [vmem:[#allocation14_spill] sm:$0xff] }
 0x386   : > { %v629_v28 = vadd.f32 %v9176_v57, %v7308_v33  ;;  %5830 = vtanh.f32 %v635_v37  ;;  %v9179_v37 = vld [vmem:[#allocation19_spill] sm:$0xff] }
 0x387   : > { %v4894_v44 = vpop.f32.mrb[6].mxu1  ;;  %1743 = vmatmul.mubr.f32.gmra.mrb[74].mxu0 %v7341_v17  ;;  %v659_v57 = vadd.f32 %v9179_v37, %v7308_v33 }
 0x388   : > { %v7357_v15 = vmul.f32 %v5811_v42, %v4894_v44  ;;  %v1377_v20 = vpop.f32.mrb[7].mxu1  ;;  %1748 = vmatprep.mubr.f32.mxu0 %v9172_v7  ;;  %5266 = vmatpush1.bf16.msra.mxu0 %v5265_v27  ;;  %5832 = vtanh.f32 %v629_v28  ;;  %v9180_v28 = vld [vmem:[#allocation18_spill] sm:$0xff] }
 0x389   : > { %v7360_v29 = vmul.f32 %v5813_v35, %v1377_v20  ;;  %5268 = vmatprep.subr.bf16.mxu0 %v5267_v55  ;;  %v9177_v55 = vld [vmem:[#allocation17_spill] sm:$0xff] }
 0x38a   : > { %v647_v50 = vadd.f32 %v9177_v55, %v7308_v33 }
 0x38b   : > { %1749 = vmatmul.mubr.f32.gmra.mrb[76].mxu0 %v7360_v29 }
 0x38c   : > { %1754 = vmatprep.mubr.f32.mxu0 %v9172_v7  ;;  %5270 = vmatpush1.bf16.msra.mxu0 %v5269_v4  ;;  %v5827_v63 = vpop.eup %5826  ;;  %5834 = vtanh.f32 %v647_v50  ;;  %v1552_v4 = vld [vmem:[#allocation4 + $0x70] sm:$0xff] }
 0x38d   : > { %5272 = vmatprep.subr.bf16.mxu0 %v5271_v12  ;;  %v5829_v40 = vpop.eup %5828  ;;  %5836 = vtanh.f32 %v641_v26  ;;  %v1557_v12 = vld [vmem:[#allocation4 + $0x98] sm:$0xff] }
 0x38e   : > { %5838 = vtanh.f32 %v659_v57 }
 0x38f   : > { %v4897_v0 = vpop.f32.mrb[8].mxu1  ;;  %1755 = vmatmul.mubr.f32.gmra.mrb[78].mxu0 %v7357_v15 }
 0x390   : > { %v7369_v60 = vmul.f32 %v5815_v48, %v4897_v0  ;;  %v1387_v31 = vpop.f32.mrb[9].mxu1  ;;  %1760 = vmatprep.mubr.f32.mxu0 %v9172_v7  ;;  %5274 = vmatpush1.bf16.msra.mxu0 %v5273_v2  ;;  %v5831_v53 = vpop.eup %5830  ;;  %v5279_v0 = vpack.c.bf16 %v1557_v12, %v1552_v4  ;;  %v9184_v12 = vld [vmem:[#allocation22_spill] sm:$0xff] }
 0x391   : > { %v7372_v61 = vmul.f32 %v5817_v56, %v1387_v31  ;;  %v1562_v56 = vld [vmem:[#allocation4 + $0xc0] sm:$0xff]  ;;  %v1567_v31 = vld [vmem:[#allocation4 + $0xe8] sm:$0xff] }
 0x392   : > { %v5833_v47 = vpop.eup %5832  ;;  %v5283_v51 = vpack.c.bf16 %v1567_v31, %v1562_v56  ;;  %v9185_v31 = vld [vmem:[#allocation25_spill] sm:$0xff] }
 0x393   : > { %1761 = vmatmul.mubr.f32.gmra.mrb[80].mxu0 %v7372_v61 }
 0x394   : > { %v4900_v38 = vpop.f32.mrb[10].mxu1  ;;  %1766 = vmatprep.mubr.f32.mxu0 %v9172_v7 }
 0x395   : > { %v7378_v16 = vmul.f32 %v5819_v22, %v4900_v38  ;;  %v1397_v25 = vpop.f32.mrb[11].mxu1  ;;  %v1577_v22 = vld [vmem:[#allocation4 + $0x138] sm:$0xff] }
 0x396   : > { %v7382_v32 = vmul.f32 %v5821_v24, %v1397_v25  ;;  %v5835_v9 = vpop.eup %5834  ;;  %v5287_v38 = vpack.c.bf16 %v1577_v22, %v1572_v62  ;;  %v1582_v24 = vld [vmem:[#allocation4 + $0x160] sm:$0xff]  ;;  %v1587_v25 = vld [vmem:[#allocation4 + $0x188] sm:$0xff] }
 0x397   : > { %1767 = vmatmul.mubr.f32.gmra.mrb[82].mxu0 %v7369_v60  ;;  %v5837_v2 = vpop.eup %5836  ;;  %v9186_v22 = vld [vmem:[#allocation24_spill] sm:$0xff] }
 0x398   : > { %1772 = vmatprep.mubr.f32.mxu0 %v9172_v7  ;;  %v5839_v50 = vpop.eup %5838 }
 0x39b   : > { %1773 = vmatmul.mubr.f32.gmra.mrb[84].mxu0 %v7382_v32 }
 0x39c   : > { %v4903_v18 = vpop.f32.mrb[12].mxu1  ;;  %1778 = vmatprep.mubr.f32.mxu0 %v9172_v7 }
 0x39d   : > { %v7391_v41 = vmul.f32 %v5823_v49, %v4903_v18  ;;  %v1407_v13 = vpop.f32.mrb[13].mxu1  ;;  %v1607_v49 = vld [vmem:[#allocation4 + $0x228] sm:$0xff] }
 0x39e   : > { %v7395_v6 = vmul.f32 %v5825_v11, %v1407_v13  ;;  %v5299_v18 = vpack.c.bf16 %v1607_v49, %v1602_v39  ;;  %v1612_v11 = vld [vmem:[#allocation4 + $0x250] sm:$0xff]  ;;  %v1617_v13 = vld [vmem:[#allocation4 + $0x278] sm:$0xff] }
 0x39f   : > { %1779 = vmatmul.mubr.f32.gmra.mrb[86].mxu0 %v7378_v16  ;;  %v5303_v54 = vpack.c.bf16 %v1617_v13, %v1612_v11 }
 0x3a0   : > { %1784 = vmatprep.mubr.f32.mxu0 %v9172_v7 }
 0x3a3   : > { %1785 = vmatmul.mubr.f32.gmra.mrb[88].mxu0 %v7395_v6 }
 0x3a4   : > { %v4906_v34 = vpop.f32.mrb[14].mxu1  ;;  %1790 = vmatprep.mubr.f32.mxu0 %v9172_v7 }
 0x3a5   : > { %v7403_v3 = vmul.f32 %v5827_v63, %v4906_v34  ;;  %v1417_v27 = vpop.f32.mrb[15].mxu1  ;;  %v653_v63 = vadd.f32 %v9180_v28, %v7308_v33  ;;  %v9181_v34 = vld [vmem:[#allocation21_spill] sm:$0xff] }
 0x3a6   : > { %v7407_v36 = vmul.f32 %v5829_v40, %v1417_v27  ;;  %v671_v40 = vadd.f32 %v9181_v34, %v7308_v33  ;;  %v9182_v27 = vld [vmem:[#allocation20_spill] sm:$0xff] }
 0x3a7   : > { %1791 = vmatmul.mubr.f32.gmra.mrb[90].mxu0 %v7391_v41  ;;  %5840 = vtanh.f32 %v653_v63  ;;  %v665_v55 = vadd.f32 %v9182_v27, %v7308_v33  ;;  %v9189_v63 = vld [vmem:[#allocation29_spill] sm:$0xff]  ;;  %v9190_v27 = vld [vmem:[#allocation28_spill] sm:$0xff] }
 0x3a8   : > { %1796 = vmatprep.mubr.f32.mxu0 %v9172_v7  ;;  %5842 = vtanh.f32 %v671_v40  ;;  %v719_v34 = vadd.f32 %v9189_v63, %v7308_v33  ;;  %v2556_v63 = vld [vmem:[#allocation6 + $0xc8] sm:$0xff] }
 0x3a9   : > { %5844 = vtanh.f32 %v665_v55  ;;  %v713_v55 = vadd.f32 %v9190_v27, %v7308_v33 }
 0x3ab   : > { %1797 = vmatmul.mubr.f32.gmra.mrb[92].mxu0 %v7407_v36 }
 0x3ac   : > { %v4909_v42 = vpop.f32.mrb[16].mxu1  ;;  %1802 = vmatprep.mubr.f32.mxu0 %v9172_v7 }
 0x3ad   : > { %v7415_v44 = vmul.f32 %v5831_v53, %v4909_v42  ;;  %v1427_v35 = vpop.f32.mrb[17].mxu1 }
 0x3ae   : > { %v7417_v20 = vmul.f32 %v5833_v47, %v1427_v35  ;;  %v9183_v47 = vld [vmem:[#allocation23_spill] sm:$0xff] }
 0x3af   : > { %1803 = vmatmul.mubr.f32.gmra.mrb[94].mxu0 %v7403_v3  ;;  %v683_v35 = vadd.f32 %v9183_v47, %v7308_v33 }
 0x3b0   : > { %1808 = vmatprep.mubr.f32.mxu0 %v9172_v7 }
 0x3b1   : > { %v5841_v26 = vpop.eup %5840  ;;  %5846 = vtanh.f32 %v683_v35 }
 0x3b3   : > { %1809 = vmatmul.mubr.f32.gmra.mrb[96].mxu0 %v7417_v20 }
 0x3b4   : > { %v4912_v5 = vpop.f32.mrb[18].mxu1  ;;  %1814 = vmatprep.mubr.f32.mxu0 %v9172_v7 }
 0x3b5   : > { %v7423_v58 = vmul.f32 %v5835_v9, %v4912_v5  ;;  %v1437_v48 = vpop.f32.mrb[19].mxu1  ;;  %v677_v9 = vadd.f32 %v9184_v12, %v7308_v33  ;;  %v5843_v5 = vpop.eup %5842 }
 0x3b6   : > { %v7425_v21 = vmul.f32 %v5837_v2, %v1437_v48  ;;  %v5845_v48 = vpop.eup %5844 }
 0x3b7   : > { %1815 = vmatmul.mubr.f32.gmra.mrb[98].mxu0 %v7415_v44  ;;  %1827 = vmatmul.mubr.f32.vlgmr.msra.gmra.mrb[32].mxu1 %v7423_v58  ;;  %5848 = vtanh.f32 %v677_v9 }
 0x3b8   : > { %1820 = vmatprep.mubr.f32.mxu0 %v9172_v7  ;;  %1832 = vmatprep.mubr.f32.mxu1 %v9172_v7 }
 0x3b9   : > { %5278 = vmatpush3.bf16.msra.mxu1 %v7376_v8  ;;  %v5291_v8 = vpack.c.bf16 %v1587_v25, %v1582_v24 }
 0x3ba   : > { %5280 = vmatprep.subr.bf16.mxu1 %v5279_v0 }
 0x3bb   : > { %1821 = vmatmul.mubr.f32.gmra.mrb[100].mxu0 %v7425_v21  ;;  %v5847_v24 = vpop.eup %5846 }
 0x3bc   : > { %1969 = vmatprep.mubr.f32.mxu0 %v9172_v7 }
 0x3bd   : > { %5282 = vmatpush3.bf16.msra.mxu1 %v5279_v0 }
 0x3be   : > { %5284 = vmatprep.subr.bf16.mxu1 %v5283_v51 }
 0x3bf   : > { %1970 = vmatmul.mubr.f32.vlgmr.msra.gmra.mrb[102].mxu0 %v7322_v52 }
 0x3c0   : > { %1975 = vmatprep.mubr.f32.mxu0 %v9172_v7 }
 0x3c1   : > { %5286 = vmatpush3.bf16.msra.mxu1 %v5283_v51  ;;  %v695_v51 = vadd.f32 %v9185_v31, %v7308_v33  ;;  %v2548_v31 = vld [vmem:[#allocation6 + $0x88] sm:$0xff] }
 0x3c2   : > { %5288 = vmatprep.subr.bf16.mxu1 %v5287_v38 }
 0x3c3   : > { %1976 = vmatmul.mubr.f32.gmra.mrb[104].mxu0 %v7318_v19  ;;  %5850 = vtanh.f32 %v695_v51 }
 0x3c4   : > { %1981 = vmatprep.mubr.f32.mxu0 %v9172_v7 }
 0x3c5   : > { %5290 = vmatpush3.bf16.msra.mxu1 %v5287_v38  ;;  %v689_v38 = vadd.f32 %v9186_v22, %v7308_v33  ;;  %v1619_v22 = vld [vmem:[#allocation4 + $0x280] ss:$8 sm:$0xf] }
 0x3c6   : > { %5292 = vmatprep.subr.bf16.mxu1 %v5291_v8 }
 0x3c7   : > { %1982 = vmatmul.mubr.f32.gmra.mrb[106].mxu0 %v7334_v45  ;;  %5852 = vtanh.f32 %v689_v38  ;;  %v1620_v38 = vld [vmem:[#allocation4 + $0x280] ss:$8 sm:$0x10] }
 0x3c8   : > { %1987 = vmatprep.mubr.f32.mxu0 %v9172_v7 }
 0x3c9   : > { %5294 = vmatpush3.bf16.msra.mxu1 %v5291_v8  ;;  %v5849_v8 = vpop.eup %5848 }
 0x3ca   : > { %5296 = vmatprep.subr.bf16.mxu1 %v5295_v43 }
 0x3cb   : > { %1988 = vmatmul.mubr.f32.gmra.mrb[108].mxu0 %v7329_v46 }
 0x3cc   : > { %1993 = vmatprep.mubr.f32.mxu0 %v9172_v7 }
 0x3cd   : > { %5298 = vmatpush3.bf16.msra.mxu1 %v5295_v43  ;;  %v9187_v43 = vld [vmem:[#allocation27_spill] sm:$0xff]  ;;  %v5851_v13 = vpop.eup %5850 }
 0x3ce   : > { %5300 = vmatprep.subr.bf16.mxu1 %v5299_v18  ;;  %v707_v39 = vadd.f32 %v9187_v43, %v7308_v33  ;;  %v2552_v43 = vld [vmem:[#allocation6 + $0xa8] sm:$0xff] }
 0x3cf   : > { %1994 = vmatmul.mubr.f32.gmra.mrb[110].mxu0 %v7346_v1 }
 0x3d0   : > { %1999 = vmatprep.mubr.f32.mxu0 %v9172_v7  ;;  %5854 = vtanh.f32 %v707_v39 }
 0x3d1   : > { %5302 = vmatpush3.bf16.msra.mxu1 %v5299_v18  ;;  %v9188_v18 = vld [vmem:[#allocation26_spill] sm:$0xff]  ;;  %v5853_v37 = vpop.eup %5852 }
 0x3d2   : > { %5304 = vmatprep.subr.bf16.mxu1 %v5303_v54  ;;  %v701_v11 = vadd.f32 %v9188_v18, %v7308_v33 }
 0x3d3   : > { %2000 = vmatmul.mubr.f32.gmra.mrb[112].mxu0 %v7341_v17 }
 0x3d4   : > { %2005 = vmatprep.mubr.f32.mxu0 %v9172_v7  ;;  %5856 = vtanh.f32 %v701_v11  ;;  %v2553_v11 = vld [vmem:[#allocation6 + $0xb0] sm:$0xff] }
 0x3d5   : > { %5306 = vmatpush3.bf16.msra.mxu1 %v5303_v54  ;;  %5858 = vtanh.f32 %v719_v34 }
 0x3d6   : > { %5860 = vtanh.f32 %v713_v55  ;;  %v2558_v55 = vld [vmem:[#allocation6 + $0xd8] sm:$0xff] }
 0x3d7   : > { %2006 = vmatmul.mubr.f32.gmra.mrb[114].mxu0 %v7360_v29 }
 0x3d8   : > { %2011 = vmatprep.mubr.f32.mxu0 %v9172_v7 }
 0x3db   : > { %2012 = vmatmul.mubr.f32.gmra.mrb[116].mxu0 %v7357_v15 }
 0x3dc   : > { %2017 = vmatprep.mubr.f32.mxu0 %v9172_v7 }
 0x3df   : > { %2018 = vmatmul.mubr.f32.gmra.mrb[118].mxu0 %v7372_v61 }
 0x3e0   : > { %2023 = vmatprep.mubr.f32.mxu0 %v9172_v7 }
 0x3e3   : > { %2024 = vmatmul.mubr.f32.gmra.mrb[120].mxu0 %v7369_v60 }
 0x3e4   : > { %2029 = vmatprep.mubr.f32.mxu0 %v9172_v7 }
 0x3e7   : > { %2030 = vmatmul.mubr.f32.gmra.mrb[122].mxu0 %v7382_v32 }
 0x3e8   : > { %2035 = vmatprep.mubr.f32.mxu0 %v9172_v7 }
 0x3eb   : > { %2036 = vmatmul.mubr.f32.gmra.mrb[124].mxu0 %v7378_v16 }
 0x3ec   : > { %2041 = vmatprep.mubr.f32.mxu0 %v9172_v7 }
 0x3ef   : > { %2042 = vmatmul.mubr.f32.gmra.mrb[126].mxu0 %v7395_v6 }
 0x3f0   : > { %2047 = vmatprep.mubr.f32.mxu0 %v9172_v7 }
 0x3f3   : > { %2048 = vmatmul.mubr.f32.gmra.mrb[128].mxu0 %v7391_v41 }
 0x3f4   : > { %2053 = vmatprep.mubr.f32.mxu0 %v9172_v7 }
 0x3f7   : > { %2054 = vmatmul.mubr.f32.gmra.mrb[130].mxu0 %v7407_v36 }
 0x3f8   : > { %2059 = vmatprep.mubr.f32.mxu0 %v9172_v7 }
 0x3fb   : > { %2060 = vmatmul.mubr.f32.gmra.mrb[132].mxu0 %v7403_v3 }
 0x3fc   : > { %2065 = vmatprep.mubr.f32.mxu0 %v9172_v7 }
 0x3ff   : > { %2066 = vmatmul.mubr.f32.gmra.mrb[134].mxu0 %v7417_v20 }
 0x400   : > { %2071 = vmatprep.mubr.f32.mxu0 %v9172_v7 }
 0x402   : > { %v4915_v30 = vpop.f32.mrb[20].mxu1 }
 0x403   : > { %v7476_v53 = vmul.f32 %v5839_v50, %v4915_v30  ;;  %v1447_v42 = vpop.f32.mrb[21].mxu1  ;;  %2072 = vmatmul.mubr.f32.gmra.mrb[136].mxu0 %v7415_v44  ;;  %v5855_v50 = vpop.eup %5854 }
 0x404   : > { %v7481_v4 = vmul.f32 %v5841_v26, %v1447_v42  ;;  %2077 = vmatprep.mubr.f32.mxu0 %v9172_v7  ;;  %v5857_v26 = vpop.eup %5856 }
 0x405   : > { %v5859_v35 = vpop.eup %5858 }
 0x406   : > { %1833 = vmatmul.mubr.f32.gmra.mrb[34].mxu1 %v7481_v4  ;;  %v5861_v9 = vpop.eup %5860 }
 0x407   : > { %2078 = vmatmul.mubr.f32.gmra.mrb[138].mxu0 %v7425_v21  ;;  %1838 = vmatprep.mubr.f32.mxu1 %v9172_v7 }
 0x408   : > { %2083 = vmatprep.mubr.f32.mxu0 %v9172_v7 }
 0x40a   : > { %v4918_v2 = vpop.f32.mrb[22].mxu1  ;;  %1839 = vmatmul.mubr.f32.gmra.mrb[36].mxu1 %v7476_v53 }
 0x40b   : > { %v7491_v0 = vmul.f32 %v5843_v5, %v4918_v2  ;;  %v1457_v56 = vpop.f32.mrb[23].mxu1  ;;  %2084 = vmatmul.mubr.f32.gmra.mrb[140].mxu0 %v7423_v58  ;;  %1844 = vmatprep.mubr.f32.mxu1 %v9172_v7 }
 0x40c   : > { %v7497_v62 = vmul.f32 %v5845_v48, %v1457_v56  ;;  %2089 = vmatprep.mubr.f32.mxu0 %v9172_v7  ;;  %v2547_v56 = vld [vmem:[#allocation6 + $0x80] sm:$0xff] }
 0x40d   : > { %v5307_v51 = vpack.c.bf16 %v2548_v31, %v2547_v56 }
 0x40e   : > { %1845 = vmatmul.mubr.f32.gmra.mrb[38].mxu1 %v7497_v62 }
 0x40f   : > { %2090 = vmatmul.mubr.f32.gmra.mrb[142].mxu0 %v7481_v4  ;;  %1850 = vmatprep.mubr.f32.mxu1 %v9172_v7 }
 0x410   : > { %2095 = vmatprep.mubr.f32.mxu0 %v9172_v7  ;;  %5308 = vmatprep.subr.bf16.mxu0 %v5307_v51 }
 0x411   : > { %5310 = vmatpush3.bf16.msra.mxu0 %v5307_v51 }
 0x412   : > { %v4921_v25 = vpop.f32.mrb[24].mxu1  ;;  %1851 = vmatmul.mubr.f32.gmra.mrb[40].mxu1 %v7491_v0 }
 0x413   : > { %v7507_v14 = vmul.f32 %v5847_v24, %v4921_v25  ;;  %v1467_v10 = vpop.f32.mrb[25].mxu1  ;;  %2096 = vmatmul.mubr.f32.gmra.mrb[144].mxu0 %v7476_v53  ;;  %1856 = vmatprep.mubr.f32.mxu1 %v9172_v7  ;;  %v2550_v24 = vld [vmem:[#allocation6 + $0x98] sm:$0xff] }
 0x414   : > { %v7513_v49 = vmul.f32 %v5849_v8, %v1467_v10  ;;  %2101 = vmatprep.mubr.f32.mxu0 %v9172_v7  ;;  %v2551_v10 = vld [vmem:[#allocation6 + $0xa0] sm:$0xff] }
 0x416   : > { %1857 = vmatmul.mubr.f32.gmra.mrb[42].mxu1 %v7513_v49 }
 0x417   : > { %2102 = vmatmul.mubr.f32.gmra.mrb[146].mxu0 %v7497_v62  ;;  %1862 = vmatprep.mubr.f32.mxu1 %v9172_v7 }
 0x418   : > { %2107 = vmatprep.mubr.f32.mxu0 %v9172_v7 }
 0x41a   : > { %v4924_v54 = vpop.f32.mrb[26].mxu1  ;;  %1863 = vmatmul.mubr.f32.gmra.mrb[44].mxu1 %v7507_v14 }
 0x41b   : > { %v7523_v57 = vmul.f32 %v5851_v13, %v4924_v54  ;;  %v1477_v28 = vpop.f32.mrb[27].mxu1  ;;  %2108 = vmatmul.mubr.f32.gmra.mrb[148].mxu0 %v7491_v0  ;;  %1868 = vmatprep.mubr.f32.mxu1 %v9172_v7  ;;  %v2554_v13 = vld [vmem:[#allocation6 + $0xb8] sm:$0xff] }
 0x41c   : > { %v7529_v40 = vmul.f32 %v5853_v37, %v1477_v28  ;;  %2113 = vmatprep.mubr.f32.mxu0 %v9172_v7  ;;  %v2555_v28 = vld [vmem:[#allocation6 + $0xc0] sm:$0xff] }
 0x41e   : > { %1869 = vmatmul.mubr.f32.gmra.mrb[46].mxu1 %v7529_v40 }
 0x41f   : > { %2114 = vmatmul.mubr.f32.gmra.mrb[150].mxu0 %v7513_v49  ;;  %1874 = vmatprep.mubr.f32.mxu1 %v9172_v7 }
 0x420   : > { %2119 = vmatprep.mubr.f32.mxu0 %v9172_v7 }
 0x422   : > { %v4927_v30 = vpop.f32.mrb[28].mxu1  ;;  %1875 = vmatmul.mubr.f32.gmra.mrb[48].mxu1 %v7523_v57 }
 0x423   : > { %v7539_v42 = vmul.f32 %v5855_v50, %v4927_v30  ;;  %v1487_v47 = vpop.f32.mrb[29].mxu1  ;;  %2120 = vmatmul.mubr.f32.gmra.mrb[152].mxu0 %v7507_v14  ;;  %1880 = vmatprep.mubr.f32.mxu1 %v9172_v7 }
 0x424   : > { %v7543_v33 = vmul.f32 %v5857_v26, %v1487_v47  ;;  %2125 = vmatprep.mubr.f32.mxu0 %v9172_v7  ;;  %v2560_v47 = vld [vmem:[#allocation6 + $0xe8] sm:$0xff] }
 0x426   : > { %1881 = vmatmul.mubr.f32.gmra.mrb[50].mxu1 %v7543_v33 }
 0x427   : > { %2126 = vmatmul.mubr.f32.gmra.mrb[154].mxu0 %v7529_v40  ;;  %1886 = vmatprep.mubr.f32.mxu1 %v9172_v7 }
 0x428   : > { %2131 = vmatprep.mubr.f32.mxu0 %v9172_v7 }
 0x42a   : > { %v4930_v12 = vpop.f32.mrb[30].mxu1  ;;  %1887 = vmatmul.mubr.f32.gmra.mrb[52].mxu1 %v7539_v42 }
 0x42b   : > { %v7551_v5 = vmul.f32 %v5859_v35, %v4930_v12  ;;  %v1497_v2 = vpop.f32.mrb[31].mxu1  ;;  %2132 = vmatmul.mubr.f32.gmra.mrb[156].mxu0 %v7523_v57  ;;  %1892 = vmatprep.mubr.f32.mxu1 %v9172_v7 }
 0x42c   : > { %v7555_v48 = vmul.f32 %v5861_v9, %v1497_v2  ;;  %2137 = vmatprep.mubr.f32.mxu0 %v9172_v7  ;;  %v2562_v2 = vld [vmem:[#allocation6 + $0xf8] sm:$0xff] }
 0x42e   : > { %1893 = vmatmul.mubr.f32.gmra.mrb[54].mxu1 %v7555_v48 }
 0x42f   : > { %2138 = vmatmul.mubr.f32.gmra.mrb[158].mxu0 %v7543_v33  ;;  %1898 = vmatprep.mubr.f32.mxu1 %v9172_v7 }
 0x430   : > { %2143 = vmatprep.mubr.f32.mxu0 %v9172_v7 }
 0x432   : > { %1899 = vmatmul.mubr.f32.gmra.mrb[56].mxu1 %v7551_v5 }
 0x433   : > { %2144 = vmatmul.mubr.f32.gmra.mrb[160].mxu0 %v7539_v42  ;;  %4963 = vmatprep.mubr.f32.mxu1 %v7322_v52  ;;  %v2549_v52 = vld [vmem:[#allocation6 + $0x90] sm:$0xff] }
 0x434   : > { %2149 = vmatprep.mubr.f32.mxu0 %v9172_v7  ;;  %v5311_v25 = vpack.c.bf16 %v2550_v24, %v2549_v52 }
 0x436   : > { %4964 = vmatmul.mubr.f32.vlgmr.msra.gmra.mrb[58].mxu1 %v7318_v19  ;;  %v7575_v19 = vor.u32 %v1620_v38, %v1619_v22  ;;  %5312 = vmatprep.subr.bf16.mxu0 %v5311_v25 }
 0x437   : > { %2150 = vmatmul.mubr.f32.gmra.mrb[162].mxu0 %v7555_v48  ;;  %4966 = vmatprep.mubr.f32.mxu1 %v7334_v45 }
 0x438   : > { %2155 = vmatprep.mubr.f32.mxu0 %v9172_v7  ;;  %5314 = vmatpush3.bf16.msra.mxu0 %v5311_v25 }
 0x43a   : > { %4967 = vmatmul.mubr.f32.gmra.mrb[60].mxu1 %v7329_v46  ;;  %v9191_v46 = vsub.s32 0, %v6798_v23 }
 0x43b   : > { %2156 = vmatmul.mubr.f32.gmra.mrb[164].mxu0 %v7551_v5  ;;  %4969 = vmatprep.mubr.f32.mxu1 %v7346_v1 }
 0x43c   : > { %v7582_v45 = vrot.slane %v7575_v19, %v9191_v46 }
 0x43e   : > { %4970 = vmatmul.mubr.f32.gmra.mrb[62].mxu1 %v7341_v17 }
 0x43f   : > { %4972 = vmatprep.mubr.f32.mxu1 %v7360_v29 }
 0x442   : > { %4973 = vmatmul.mubr.f32.gmra.mrb[64].mxu1 %v7357_v15 }
 0x443   : > { %4975 = vmatprep.mubr.f32.mxu1 %v7372_v61 }
 0x446   : > { %v1714_v1 = vpop.f32.mrb[64].mxu0  ;;  %4976 = vmatmul.mubr.f32.gmra.mrb[66].mxu1 %v7369_v60 }
 0x447   : > { %v7586_v17 = vadd.f32 %v1714_v1, %v7582_v45  ;;  %v7588_v29 = vpop.f32.mrb[65].mxu0  ;;  %4978 = vmatprep.mubr.f32.mxu1 %v7382_v32 }
 0x449   : > { %2387 = vmax.xlane.f32.xlu0 %v7586_v17 }
 0x44a   : > { %v1720_v15 = vpop.f32.mrb[66].mxu0  ;;  %4979 = vmatmul.mubr.f32.gmra.mrb[68].mxu1 %v7378_v16  ;;  %v5315_v16 = vpack.c.bf16 %v2552_v43, %v2551_v10 }
 0x44b   : > { %v7594_v61 = vadd.f32 %v1720_v15, %v7582_v45  ;;  %v7596_v8 = vpop.f32.mrb[67].mxu0  ;;  %4981 = vmatprep.mubr.f32.mxu1 %v7395_v6 }
 0x44c   : > { %5316 = vmatprep.subr.bf16.mxu0 %v5315_v16 }
 0x44d   : > { %2389 = vmax.xlane.f32.xlu1 %v7594_v61  ;;  %5318 = vmatpush3.bf16.msra.mxu0 %v5315_v16 }
 0x44e   : > { %v1726_v60 = vpop.f32.mrb[68].mxu0  ;;  %4982 = vmatmul.mubr.f32.gmra.mrb[70].mxu1 %v7391_v41 }
 0x44f   : > { %v7602_v32 = vadd.f32 %v1726_v60, %v7582_v45  ;;  %v7604_v39 = vpop.f32.mrb[69].mxu0  ;;  %4984 = vmatprep.mubr.f32.mxu1 %v7407_v36  ;;  %v5319_v36 = vpack.c.bf16 %v2554_v13, %v2553_v11 }
 0x451   : > { %2391 = vmax.xlane.f32.xlu0 %v7602_v32  ;;  %5320 = vmatprep.subr.bf16.mxu0 %v5319_v36 }
 0x452   : > { %v1732_v18 = vpop.f32.mrb[70].mxu0  ;;  %4985 = vmatmul.mubr.f32.gmra.mrb[72].mxu1 %v7403_v3  ;;  %5322 = vmatpush3.bf16.msra.mxu0 %v5319_v36 }
 0x453   : > { %v7610_v6 = vadd.f32 %v1732_v18, %v7582_v45  ;;  %v7612_v41 = vpop.f32.mrb[71].mxu0  ;;  %4987 = vmatprep.mubr.f32.mxu1 %v7417_v20  ;;  %v5323_v20 = vpack.c.bf16 %v2556_v63, %v2555_v28 }
 0x455   : > { %2393 = vmax.xlane.f32.xlu1 %v7610_v6  ;;  %5324 = vmatprep.subr.bf16.mxu0 %v5323_v20 }
 0x456   : > { %v1738_v54 = vpop.f32.mrb[72].mxu0  ;;  %4988 = vmatmul.mubr.f32.gmra.mrb[74].mxu1 %v7415_v44  ;;  %5326 = vmatpush3.bf16.msra.mxu0 %v5323_v20 }
 0x457   : > { %v7618_v37 = vadd.f32 %v1738_v54, %v7582_v45  ;;  %v7620_v3 = vpop.f32.mrb[73].mxu0  ;;  %4990 = vmatprep.mubr.f32.mxu1 %v7425_v21  ;;  %v2557_v21 = vld [vmem:[#allocation6 + $0xd0] sm:$0xff] }
 0x458   : > { %v5327_v30 = vpack.c.bf16 %v2558_v55, %v2557_v21 }
 0x459   : > { %2395 = vmax.xlane.f32.xlu0 %v7618_v37 }
 0x45a   : > { %v1744_v34 = vpop.f32.mrb[74].mxu0  ;;  %4991 = vmatmul.mubr.f32.gmra.mrb[76].mxu1 %v7423_v58  ;;  %5328 = vmatprep.subr.bf16.mxu0 %v5327_v30 }
 0x45b   : > { %v7626_v27 = vadd.f32 %v1744_v34, %v7582_v45  ;;  %v7628_v44 = vpop.f32.mrb[75].mxu0  ;;  %4993 = vmatprep.mubr.f32.mxu1 %v7481_v4  ;;  %5330 = vmatpush3.bf16.msra.mxu0 %v5327_v30  ;;  %v2559_v4 = vld [vmem:[#allocation6 + $0xe0] sm:$0xff] }
 0x45c   : > { %v5331_v12 = vpack.c.bf16 %v2560_v47, %v2559_v4 }
 0x45d   : > { %2397 = vmax.xlane.f32.xlu1 %v7626_v27 }
 0x45e   : > { %v1750_v50 = vpop.f32.mrb[76].mxu0  ;;  %4994 = vmatmul.mubr.f32.gmra.mrb[78].mxu1 %v7476_v53  ;;  %5332 = vmatprep.subr.bf16.mxu0 %v5331_v12 }
 0x45f   : > { %v7634_v26 = vadd.f32 %v1750_v50, %v7582_v45  ;;  %v7636_v58 = vpop.f32.mrb[77].mxu0  ;;  %4996 = vmatprep.mubr.f32.mxu1 %v7497_v62  ;;  %5334 = vmatpush3.bf16.msra.mxu0 %v5331_v12  ;;  %v2561_v62 = vld [vmem:[#allocation6 + $0xf0] sm:$0xff] }
 0x460   : > { %9192 = vst [vmem:[#allocation13_spill] sm:$0xff] %v7636_v58  ;;  %v5335_v31 = vpack.c.bf16 %v2562_v2, %v2561_v62  ;;  %v3019_v58 = vld [vmem:[#allocation7 + $0x138] sm:$0xff] }
 0x461   : > { %2399 = vmax.xlane.f32.xlu0 %v7634_v26 }
 0x462   : > { %v1756_v35 = vpop.f32.mrb[78].mxu0  ;;  %4997 = vmatmul.mubr.f32.gmra.mrb[80].mxu1 %v7491_v0  ;;  %5336 = vmatprep.subr.bf16.mxu0 %v5335_v31 }
 0x463   : > { %v7642_v53 = vadd.f32 %v1756_v35, %v7582_v45  ;;  %v7644_v9 = vpop.f32.mrb[79].mxu0  ;;  %4999 = vmatprep.mubr.f32.mxu1 %v7513_v49  ;;  %5338 = vmatpush3.bf16.msra.mxu0 %v5335_v31 }
 0x464   : > { %9193 = vst [vmem:[#allocation12_spill] sm:$0xff] %v7644_v9  ;;  %v3005_v9 = vld [vmem:[#allocation7 + $0xc8] sm:$0xff] }
 0x465   : > { %2401 = vmax.xlane.f32.xlu1 %v7642_v53 }
 0x466   : > { %v1762_v56 = vpop.f32.mrb[80].mxu0  ;;  %5000 = vmatmul.mubr.f32.gmra.mrb[82].mxu1 %v7507_v14 }
 0x467   : > { %v7650_v0 = vadd.f32 %v1762_v56, %v7582_v45  ;;  %v7652_v51 = vpop.f32.mrb[81].mxu0  ;;  %5002 = vmatprep.mubr.f32.mxu1 %v7529_v40 }
 0x468   : > { %9194 = vst [vmem:[#allocation15_spill] sm:$0xff] %v7652_v51  ;;  %v3001_v51 = vld [vmem:[#allocation7 + $0xa8] sm:$0xff] }
 0x469   : > { %2403 = vmax.xlane.f32.xlu0 %v7650_v0 }
 0x46a   : > { %v1768_v49 = vpop.f32.mrb[82].mxu0  ;;  %5003 = vmatmul.mubr.f32.gmra.mrb[84].mxu1 %v7523_v57 }
 0x46b   : > { %v7658_v22 = vadd.f32 %v1768_v49, %v7582_v45  ;;  %v7660_v38 = vpop.f32.mrb[83].mxu0  ;;  %5005 = vmatprep.mubr.f32.mxu1 %v7543_v33 }
 0x46c   : > { %9195 = vst [vmem:[#allocation14_spill] sm:$0xff] %v7660_v38  ;;  %v2993_v38 = vld [vmem:[#allocation7 + $0x68] sm:$0xff] }
 0x46d   : > { %2405 = vmax.xlane.f32.xlu1 %v7658_v22 }
 0x46e   : > { %v1774_v14 = vpop.f32.mrb[84].mxu0  ;;  %5006 = vmatmul.mubr.f32.gmra.mrb[86].mxu1 %v7539_v42 }
 0x46f   : > { %v7666_v40 = vadd.f32 %v1774_v14, %v7582_v45  ;;  %v7668_v52 = vpop.f32.mrb[85].mxu0  ;;  %5008 = vmatprep.mubr.f32.mxu1 %v7555_v48 }
 0x470   : > { %9196 = vst [vmem:[#allocation17_spill] sm:$0xff] %v7668_v52 }
 0x471   : > { %2407 = vmax.xlane.f32.xlu0 %v7666_v40 }
 0x472   : > { %v1780_v57 = vpop.f32.mrb[86].mxu0  ;;  %5009 = vmatmul.mubr.f32.gmra.mrb[88].mxu1 %v7551_v5 }
 0x473   : > { %v7674_v24 = vadd.f32 %v1780_v57, %v7582_v45  ;;  %v7676_v33 = vpop.f32.mrb[87].mxu0  ;;  %3108 = vmatprep.mubr.f32.mxu1 %v9172_v7 }
 0x474   : > { %9197 = vst [vmem:[#allocation16_spill] sm:$0xff] %v7676_v33 }
 0x475   : > { %2409 = vmax.xlane.f32.xlu1 %v7674_v24 }
 0x476   : > { %v1786_v42 = vpop.f32.mrb[88].mxu0 }
 0x477   : > { %v7681_v25 = vadd.f32 %v1786_v42, %v7582_v45  ;;  %v7683_v46 = vpop.f32.mrb[89].mxu0 }
 0x478   : > { %9198 = vst [vmem:[#allocation19_spill] sm:$0xff] %v7683_v46 }
 0x479   : > { %2411 = vmax.xlane.f32.xlu0 %v7681_v25 }
 0x47a   : > { %v1792_v48 = vpop.f32.mrb[90].mxu0 }
 0x47b   : > { %v7687_v5 = vadd.f32 %v1792_v48, %v7582_v45  ;;  %v7689_v1 = vpop.f32.mrb[91].mxu0 }
 0x47c   : > { %9199 = vst [vmem:[#allocation18_spill] sm:$0xff] %v7689_v1 }
 0x47d   : > { %2413 = vmax.xlane.f32.xlu1 %v7687_v5 }
 0x47e   : > { %v1798_v15 = vpop.f32.mrb[92].mxu0 }
 0x47f   : > { %v7693_v60 = vadd.f32 %v1798_v15, %v7582_v45  ;;  %v7695_v10 = vpop.f32.mrb[93].mxu0 }
 0x480   : > { %9200 = vst [vmem:[#allocation21_spill] sm:$0xff] %v7695_v10 }
 0x481   : > { %2415 = vmax.xlane.f32.xlu0 %v7693_v60 }
 0x482   : > { %v1804_v43 = vpop.f32.mrb[94].mxu0 }
 0x483   : > { %v7699_v16 = vadd.f32 %v1804_v43, %v7582_v45  ;;  %v7701_v18 = vpop.f32.mrb[95].mxu0 }
 0x484   : > { %9201 = vst [vmem:[#allocation20_spill] sm:$0xff] %v7701_v18 }
 0x485   : > { %2417 = vmax.xlane.f32.xlu1 %v7699_v16 }
 0x486   : > { %v1810_v11 = vpop.f32.mrb[96].mxu0 }
 0x487   : > { %v7705_v13 = vadd.f32 %v1810_v11, %v7582_v45  ;;  %v7707_v36 = vpop.f32.mrb[97].mxu0 }
 0x488   : > { %9202 = vst [vmem:[#allocation23_spill] sm:$0xff] %v7707_v36 }
 0x489   : > { %2419 = vmax.xlane.f32.xlu0 %v7705_v13 }
 0x48a   : > { %v1816_v54 = vpop.f32.mrb[98].mxu0  ;;  %v1828_v28 = vpop.f32.mrb[32].mxu1 }
 0x48b   : > { %v7711_v63 = vadd.f32 %v1816_v54, %v7582_v45  ;;  %v7713_v20 = vpop.f32.mrb[99].mxu0  ;;  %v7715_v34 = vpop.f32.mrb[33].mxu1  ;;  %v7719_v55 = vadd.f32 %v1828_v28, %v7582_v45 }
 0x48c   : > { %9203 = vst [vmem:[#allocation22_spill] sm:$0xff] %v7713_v20  ;;  %9204 = vst [vmem:[#allocation25_spill] sm:$0xff] %v7715_v34 }
 0x48d   : > { %2421 = vmax.xlane.f32.xlu1 %v7711_v63 }
 0x48e   : > { %v1822_v21 = vpop.f32.mrb[100].mxu0 }
 0x48f   : > { %v7722_v50 = vadd.f32 %v1822_v21, %v7582_v45  ;;  %v7724_v30 = vpop.f32.mrb[101].mxu0 }
 0x490   : > { %9205 = vst [vmem:[#allocation24_spill] sm:$0xff] %v7724_v30 }
 0x491   : > { %2423 = vmax.xlane.f32.xlu0 %v7722_v50  ;;  %2425 = vmax.xlane.f32.xlu1 %v7719_v55 }
 0x492   : > { %v7728_v4 = vpop.f32.mrb[102].mxu0 }
 0x493   : > { %9206 = vst [vmem:[#allocation27_spill] sm:$0xff] %v7728_v4  ;;  %v7730_v47 = vpop.f32.mrb[103].mxu0 }
 0x494   : > { %9207 = vst [vmem:[#allocation26_spill] sm:$0xff] %v7730_v47  ;;  %v3002_v47 = vld [vmem:[#allocation7 + $0xb0] sm:$0xff] }
 0x496   : > { %v7732_v35 = vpop.f32.mrb[104].mxu0 }
 0x497   : > { %9208 = vst [vmem:[#allocation29_spill] sm:$0xff] %v7732_v35  ;;  %v7734_v12 = vpop.f32.mrb[105].mxu0 }
 0x498   : > { %9209 = vst [vmem:[#allocation28_spill] sm:$0xff] %v7734_v12  ;;  %v2995_v12 = vld [vmem:[#allocation7 + $0x78] sm:$0xff] }
 0x49a   : > { %v7736_v62 = vpop.f32.mrb[106].mxu0 }
 0x49b   : > { %9210 = vst [vmem:[#allocation30_spill] sm:$0xff] %v7736_v62  ;;  %v7738_v2 = vpop.f32.mrb[107].mxu0 }
 0x49c   : > { %9211 = vst [vmem:[#allocation31_spill] sm:$0xff] %v7738_v2  ;;  %v2986_v2 = vld [vmem:[#allocation7 + $0x30] sm:$0xff] }
 0x49e   : > { %v7740_v56 = vpop.f32.mrb[108].mxu0 }
 0x49f   : > { %9212 = vst [vmem:[#allocation32_spill] sm:$0xff] %v7740_v56  ;;  %v7742_v31 = vpop.f32.mrb[109].mxu0 }
 0x4a0   : > { %9213 = vst [vmem:[#allocation33_spill] sm:$0xff] %v7742_v31 }
 0x4a2   : > { %v7744_v49 = vpop.f32.mrb[110].mxu0 }
 0x4a3   : > { %9214 = vst [vmem:[#allocation34_spill] sm:$0xff] %v7744_v49  ;;  %v7746_v14 = vpop.f32.mrb[111].mxu0 }
 0x4a4   : > { %9215 = vst [vmem:[#allocation35_spill] sm:$0xff] %v7746_v14 }
 0x4a6   : > { %v7748_v57 = vpop.f32.mrb[112].mxu0 }
 0x4a7   : > { %9216 = vst [vmem:[#allocation36_spill] sm:$0xff] %v7748_v57  ;;  %v7750_v42 = vpop.f32.mrb[113].mxu0 }
 0x4a8   : > { %9217 = vst [vmem:[#allocation37_spill] sm:$0xff] %v7750_v42 }
 0x4aa   : > { %v7752_v48 = vpop.f32.mrb[114].mxu0 }
 0x4ab   : > { %9218 = vst [vmem:[#allocation38_spill] sm:$0xff] %v7752_v48  ;;  %v7754_v15 = vpop.f32.mrb[115].mxu0 }
 0x4ac   : > { %9219 = vst [vmem:[#allocation39_spill] sm:$0xff] %v7754_v15 }
 0x4ae   : > { %v7756_v43 = vpop.f32.mrb[116].mxu0 }
 0x4af   : > { %9220 = vst [vmem:[#allocation40_spill] sm:$0xff] %v7756_v43  ;;  %v7758_v11 = vpop.f32.mrb[117].mxu0 }
 0x4b0   : > { %9221 = vst [vmem:[#allocation41_spill] sm:$0xff] %v7758_v11 }
 0x4b2   : > { %v7760_v54 = vpop.f32.mrb[118].mxu0 }
 0x4b3   : > { %9222 = vst [vmem:[#allocation42_spill] sm:$0xff] %v7760_v54  ;;  %v7762_v28 = vpop.f32.mrb[119].mxu0 }
 0x4b4   : > { %9223 = vst [vmem:[#allocation43_spill] sm:$0xff] %v7762_v28 }
 0x4b6   : > { %v7764_v21 = vpop.f32.mrb[120].mxu0 }
 0x4b7   : > { %9224 = vst [vmem:[#allocation44_spill] sm:$0xff] %v7764_v21  ;;  %v7766_v59 = vpop.f32.mrb[121].mxu0 }
 0x4b8   : > { %9225 = vst [vmem:[#allocation45_spill] sm:$0xff] %v7766_v59 }
 0x4ba   : > { %v7768_v34 = vpop.f32.mrb[122].mxu0 }
 0x4bb   : > { %9226 = vst [vmem:[#allocation46_spill] sm:$0xff] %v7768_v34  ;;  %v7770_v30 = vpop.f32.mrb[123].mxu0 }
 0x4bc   : > { %9227 = vst [vmem:[#allocation47_spill] sm:$0xff] %v7770_v30 }
 0x4be   : > { %v7772_v20 = vpop.f32.mrb[124].mxu0 }
 0x4bf   : > { %9228 = vst [vmem:[#allocation48_spill] sm:$0xff] %v7772_v20  ;;  %v7774_v36 = vpop.f32.mrb[125].mxu0 }
 0x4c0   : > { %9229 = vst [vmem:[#allocation49_spill] sm:$0xff] %v7774_v36 }
 0x4c2   : > { %v7776_v18 = vpop.f32.mrb[126].mxu0 }
 0x4c3   : > { %9230 = vst [vmem:[#allocation50_spill] sm:$0xff] %v7776_v18  ;;  %v7778_v10 = vpop.f32.mrb[127].mxu0 }
 0x4c4   : > { %9231 = vst [vmem:[#allocation51_spill] sm:$0xff] %v7778_v10 }
 0x4c6   : > { %v7780_v1 = vpop.f32.mrb[128].mxu0 }
 0x4c7   : > { %9232 = vst [vmem:[#allocation52_spill] sm:$0xff] %v7780_v1  ;;  %v7782_v54 = vpop.f32.mrb[129].mxu0 }
 0x4c8   : > { %9233 = vst [vmem:[#allocation53_spill] sm:$0xff] %v7782_v54 }
 0x4ca   : > { %v7784_v28 = vpop.f32.mrb[130].mxu0 }
 0x4cb   : > { %9234 = vst [vmem:[#allocation54_spill] sm:$0xff] %v7784_v28  ;;  %v7786_v21 = vpop.f32.mrb[131].mxu0 }
 0x4cc   : > { %9235 = vst [vmem:[#allocation55_spill] sm:$0xff] %v7786_v21 }
 0x4ce   : > { %v7788_v59 = vpop.f32.mrb[132].mxu0 }
 0x4cf   : > { %9236 = vst [vmem:[#allocation56_spill] sm:$0xff] %v7788_v59  ;;  %v7790_v34 = vpop.f32.mrb[133].mxu0 }
 0x4d0   : > { %9237 = vst [vmem:[#allocation57_spill] sm:$0xff] %v7790_v34 }
 0x4d2   : > { %v7792_v30 = vpop.f32.mrb[134].mxu0 }
 0x4d3   : > { %9238 = vst [vmem:[#allocation58_spill] sm:$0xff] %v7792_v30  ;;  %v7794_v20 = vpop.f32.mrb[135].mxu0 }
 0x4d4   : > { %9239 = vst [vmem:[#allocation59_spill] sm:$0xff] %v7794_v20 }
 0x4d6   : > { %v7796_v36 = vpop.f32.mrb[136].mxu0  ;;  %v2388_v18 = vpop.xlane.xlu0 %2387 }
 0x4d7   : > { %9240 = vst [vmem:[#allocation60_spill] sm:$0xff] %v7796_v36  ;;  %v2451_v10 = vsub.f32 %v7586_v17, %v2388_v18  ;;  %v7799_v1 = vpop.f32.mrb[137].mxu0 }
 0x4d8   : > { %9241 = vst [vmem:[#allocation61_spill] sm:$0xff] %v7799_v1 }
 0x4d9   : > { %v2483_v54 = vmul.f32 1.442695, %v2451_v10  ;;  %v1834_v11 = vpop.f32.mrb[34].mxu1 }
 0x4da   : > { %v7802_v28 = vadd.f32 %v1834_v11, %v7582_v45  ;;  %v2390_v21 = vpop.xlane.xlu1 %2389  ;;  %v7804_v59 = vpop.f32.mrb[35].mxu1 }
 0x4db   : > { %9242 = vst [vmem:[#allocation62_spill] sm:$0xff] %v7804_v59  ;;  %5862 = vpow2.f32 %v2483_v54  ;;  %v2452_v30 = vsub.f32 %v7594_v61, %v2390_v21  ;;  %v7807_v34 = vpop.f32.mrb[138].mxu0 }
 0x4dc   : > { %9243 = vst [vmem:[#allocation63_spill] sm:$0xff] %v7807_v34  ;;  %v7809_v20 = vpop.f32.mrb[139].mxu0  ;;  %2427 = vmax.xlane.f32.xlu0 %v7802_v28 }
 0x4dd   : > { %9244 = vst [vmem:[#allocation64_spill] sm:$0xff] %v7809_v20  ;;  %v2485_v17 = vmul.f32 1.442695, %v2452_v30  ;;  %v1840_v18 = vpop.f32.mrb[36].mxu1 }
 0x4de   : > { %v7813_v10 = vadd.f32 %v1840_v18, %v7582_v45  ;;  %v7815_v1 = vpop.f32.mrb[37].mxu1  ;;  %v7817_v11 = vpop.f32.mrb[140].mxu0 }
 0x4df   : > { %9245 = vst [vmem:[#allocation65_spill] sm:$0xff] %v7815_v1  ;;  %9246 = vst [vmem:[#allocation66_spill] sm:$0xff] %v7817_v11  ;;  %5864 = vpow2.f32 %v2485_v17  ;;  %v2392_v59 = vpop.xlane.xlu0 %2391  ;;  %v7819_v54 = vpop.f32.mrb[141].mxu0 }
 0x4e0   : > { %9247 = vst [vmem:[#allocation67_spill] sm:$0xff] %v7819_v54  ;;  %v2453_v61 = vsub.f32 %v7602_v32, %v2392_v59  ;;  %2429 = vmax.xlane.f32.xlu1 %v7813_v10 }
 0x4e1   : > { %v1846_v21 = vpop.f32.mrb[38].mxu1 }
 0x4e2   : > { %v2487_v20 = vmul.f32 1.442695, %v2453_v61  ;;  %v7824_v30 = vadd.f32 %v1846_v21, %v7582_v45  ;;  %v2394_v34 = vpop.xlane.xlu1 %2393  ;;  %v7826_v18 = vpop.f32.mrb[39].mxu1 }
 0x4e3   : > { %9248 = vst [vmem:[#allocation68_spill] sm:$0xff] %v7826_v18  ;;  %v2454_v1 = vsub.f32 %v7610_v6, %v2394_v34  ;;  %v7829_v36 = vpop.f32.mrb[142].mxu0 }
 0x4e4   : > { %9249 = vst [vmem:[#allocation69_spill] sm:$0xff] %v7829_v36  ;;  %5866 = vpow2.f32 %v2487_v20  ;;  %v7831_v17 = vpop.f32.mrb[143].mxu0  ;;  %2431 = vmax.xlane.f32.xlu0 %v7824_v30 }
 0x4e5   : > { %9250 = vst [vmem:[#allocation70_spill] sm:$0xff] %v7831_v17  ;;  %v7834_v59 = vpop.eup %5862  ;;  %v2489_v32 = vmul.f32 1.442695, %v2454_v1  ;;  %v1852_v54 = vpop.f32.mrb[40].mxu1 }
 0x4e6   : > { %v7837_v61 = vadd.f32 %v1852_v54, %v7582_v45  ;;  %v7839_v21 = vpop.f32.mrb[41].mxu1  ;;  %v7841_v11 = vpop.f32.mrb[144].mxu0  ;;  %5043 = vmatprep.mubr.f32.mxu0 %v7834_v59 }
 0x4e7   : > { %9251 = vst [vmem:[#allocation71_spill] sm:$0xff] %v7839_v21  ;;  %9252 = vst [vmem:[#allocation72_spill] sm:$0xff] %v7841_v11  ;;  %5868 = vpow2.f32 %v2489_v32  ;;  %v2396_v6 = vpop.xlane.xlu0 %2395  ;;  %v7844_v20 = vpop.f32.mrb[145].mxu0 }
 0x4e8   : > { %9253 = vst [vmem:[#allocation73_spill] sm:$0xff] %v7844_v20  ;;  %v2455_v34 = vsub.f32 %v7618_v37, %v2396_v6  ;;  %2433 = vmax.xlane.f32.xlu1 %v7837_v61 }
 0x4e9   : > { %v7848_v18 = vpop.eup %5864  ;;  %v1858_v1 = vpop.f32.mrb[42].mxu1 }
 0x4ea   : > { %v2491_v17 = vmul.f32 1.442695, %v2455_v34  ;;  %v7851_v54 = vadd.f32 %v1858_v1, %v7582_v45  ;;  %v2398_v21 = vpop.xlane.xlu1 %2397  ;;  %v7853_v36 = vpop.f32.mrb[43].mxu1  ;;  %5044 = vmatmul.mubr.f32.vlgmr.msra.gmra.mrb[166].mxu0 %v7848_v18 }
 0x4eb   : > { %9254 = vst [vmem:[#allocation74_spill] sm:$0xff] %v7853_v36  ;;  %v2456_v32 = vsub.f32 %v7626_v27, %v2398_v21  ;;  %v7857_v11 = vpop.f32.mrb[146].mxu0 }
 0x4ec   : > { %9255 = vst [vmem:[#allocation75_spill] sm:$0xff] %v7857_v11  ;;  %5870 = vpow2.f32 %v2491_v17  ;;  %v7859_v37 = vpop.f32.mrb[147].mxu0  ;;  %2435 = vmax.xlane.f32.xlu0 %v7851_v54 }
 0x4ed   : > { %9256 = vst [vmem:[#allocation76_spill] sm:$0xff] %v7859_v37  ;;  %v2493_v6 = vmul.f32 1.442695, %v2456_v32  ;;  %v1864_v20 = vpop.f32.mrb[44].mxu1 }
 0x4ee   : > { %v7862_v34 = vpop.eup %5866  ;;  %v7865_v1 = vadd.f32 %v1864_v20, %v7582_v45  ;;  %v7867_v43 = vpop.f32.mrb[45].mxu1 }
 0x4ef   : > { %9257 = vst [vmem:[#allocation77_spill] sm:$0xff] %v7867_v43  ;;  %v7869_v36 = vpop.f32.mrb[148].mxu0  ;;  %5872 = vpow2.f32 %v2493_v6  ;;  %5046 = vmatprep.mubr.f32.mxu0 %v7862_v34  ;;  %v2400_v27 = vpop.xlane.xlu0 %2399 }
 0x4f0   : > { %9258 = vst [vmem:[#allocation78_spill] sm:$0xff] %v7869_v36  ;;  %v7872_v17 = vpop.f32.mrb[149].mxu0  ;;  %v2457_v21 = vsub.f32 %v7634_v26, %v2400_v27  ;;  %2437 = vmax.xlane.f32.xlu1 %v7865_v1 }
 0x4f1   : > { %9259 = vst [vmem:[#allocation79_spill] sm:$0xff] %v7872_v17  ;;  %v7876_v32 = vpop.eup %5868  ;;  %v1870_v37 = vpop.f32.mrb[46].mxu1 }
 0x4f2   : > { %v2495_v11 = vmul.f32 1.442695, %v2457_v21  ;;  %v7879_v20 = vadd.f32 %v1870_v37, %v7582_v45  ;;  %v2402_v43 = vpop.xlane.xlu1 %2401  ;;  %v7881_v46 = vpop.f32.mrb[47].mxu1  ;;  %5047 = vmatmul.mubr.f32.gmra.mrb[168].mxu0 %v7876_v32 }
 0x4f3   : > { %9260 = vst [vmem:[#allocation80_spill] sm:$0xff] %v7881_v46  ;;  %v2458_v6 = vsub.f32 %v7642_v53, %v2402_v43  ;;  %v7885_v36 = vpop.f32.mrb[150].mxu0 }
 0x4f4   : > { %9261 = vst [vmem:[#allocation81_spill] sm:$0xff] %v7885_v36  ;;  %5874 = vpow2.f32 %v2495_v11  ;;  %v7887_v26 = vpop.f32.mrb[151].mxu0  ;;  %2439 = vmax.xlane.f32.xlu0 %v7879_v20 }
 0x4f5   : > { %9262 = vst [vmem:[#allocation82_spill] sm:$0xff] %v7887_v26  ;;  %v2497_v27 = vmul.f32 1.442695, %v2458_v6  ;;  %v1876_v17 = vpop.f32.mrb[48].mxu1 }
 0x4f6   : > { %v7890_v21 = vpop.eup %5870  ;;  %v7893_v37 = vadd.f32 %v1876_v17, %v7582_v45  ;;  %v7895_v15 = vpop.f32.mrb[49].mxu1 }
 0x4f7   : > { %9263 = vst [vmem:[#allocation83_spill] sm:$0xff] %v7895_v15  ;;  %v7897_v46 = vpop.f32.mrb[152].mxu0  ;;  %5876 = vpow2.f32 %v2497_v27  ;;  %5049 = vmatprep.mubr.f32.mxu0 %v7890_v21  ;;  %v2404_v53 = vpop.xlane.xlu0 %2403 }
 0x4f8   : > { %9264 = vst [vmem:[#allocation84_spill] sm:$0xff] %v7897_v46  ;;  %v7900_v43 = vpop.f32.mrb[153].mxu0  ;;  %v2459_v11 = vsub.f32 %v7650_v0, %v2404_v53  ;;  %2441 = vmax.xlane.f32.xlu1 %v7893_v37 }
 0x4f9   : > { %9265 = vst [vmem:[#allocation85_spill] sm:$0xff] %v7900_v43  ;;  %v7904_v6 = vpop.eup %5872  ;;  %v1882_v26 = vpop.f32.mrb[50].mxu1 }
 0x4fa   : > { %v2499_v36 = vmul.f32 1.442695, %v2459_v11  ;;  %v7907_v17 = vadd.f32 %v1882_v26, %v7582_v45  ;;  %v2406_v15 = vpop.xlane.xlu1 %2405  ;;  %v7909_v48 = vpop.f32.mrb[51].mxu1  ;;  %5050 = vmatmul.mubr.f32.gmra.mrb[170].mxu0 %v7904_v6 }
 0x4fb   : > { %9266 = vst [vmem:[#allocation86_spill] sm:$0xff] %v7909_v48  ;;  %v2460_v27 = vsub.f32 %v7658_v22, %v2406_v15  ;;  %v7913_v46 = vpop.f32.mrb[154].mxu0 }
 0x4fc   : > { %9267 = vst [vmem:[#allocation87_spill] sm:$0xff] %v7913_v46  ;;  %5878 = vpow2.f32 %v2499_v36  ;;  %v7915_v0 = vpop.f32.mrb[155].mxu0  ;;  %2443 = vmax.xlane.f32.xlu0 %v7907_v17 }
 0x4fd   : > { %9268 = vst [vmem:[#allocation88_spill] sm:$0xff] %v7915_v0  ;;  %v2501_v53 = vmul.f32 1.442695, %v2460_v27  ;;  %v1888_v43 = vpop.f32.mrb[52].mxu1 }
 0x4fe   : > { %v7918_v11 = vpop.eup %5874  ;;  %v7921_v26 = vadd.f32 %v1888_v43, %v7582_v45  ;;  %v7923_v42 = vpop.f32.mrb[53].mxu1 }
 0x4ff   : > { %9269 = vst [vmem:[#allocation89_spill] sm:$0xff] %v7923_v42  ;;  %v7925_v48 = vpop.f32.mrb[156].mxu0  ;;  %5880 = vpow2.f32 %v2501_v53  ;;  %5052 = vmatprep.mubr.f32.mxu0 %v7918_v11  ;;  %v2408_v22 = vpop.xlane.xlu0 %2407 }
 0x500   : > { %9270 = vst [vmem:[#allocation90_spill] sm:$0xff] %v7925_v48  ;;  %v7928_v36 = vpop.f32.mrb[157].mxu0  ;;  %v2461_v15 = vsub.f32 %v7666_v40, %v2408_v22  ;;  %2445 = vmax.xlane.f32.xlu1 %v7921_v26 }
 0x501   : > { %9271 = vst [vmem:[#allocation91_spill] sm:$0xff] %v7928_v36  ;;  %v7932_v27 = vpop.eup %5876  ;;  %v1894_v0 = vpop.f32.mrb[54].mxu1 }
 0x502   : > { %v2503_v46 = vmul.f32 1.442695, %v2461_v15  ;;  %v7935_v43 = vadd.f32 %v1894_v0, %v7582_v45  ;;  %v2410_v42 = vpop.xlane.xlu1 %2409  ;;  %v7937_v57 = vpop.f32.mrb[55].mxu1  ;;  %5053 = vmatmul.mubr.f32.gmra.mrb[172].mxu0 %v7932_v27 }
 0x503   : > { %9272 = vst [vmem:[#allocation92_spill] sm:$0xff] %v7937_v57  ;;  %v2462_v53 = vsub.f32 %v7674_v24, %v2410_v42  ;;  %v7941_v48 = vpop.f32.mrb[158].mxu0 }
 0x504   : > { %9273 = vst [vmem:[#allocation93_spill] sm:$0xff] %v7941_v48  ;;  %5882 = vpow2.f32 %v2503_v46  ;;  %v7943_v40 = vpop.f32.mrb[159].mxu0  ;;  %2447 = vmax.xlane.f32.xlu0 %v7935_v43 }
 0x505   : > { %9274 = vst [vmem:[#allocation94_spill] sm:$0xff] %v7943_v40  ;;  %v2505_v22 = vmul.f32 1.442695, %v2462_v53  ;;  %v1900_v36 = vpop.f32.mrb[56].mxu1 }
 0x506   : > { %v7946_v15 = vpop.eup %5878  ;;  %v7949_v0 = vadd.f32 %v1900_v36, %v7582_v45  ;;  %v7951_v33 = vpop.f32.mrb[57].mxu1 }
 0x507   : > { %9275 = vst [vmem:[#allocation95_spill] sm:$0xff] %v7951_v33  ;;  %v7953_v57 = vpop.f32.mrb[160].mxu0  ;;  %5884 = vpow2.f32 %v2505_v22  ;;  %5055 = vmatprep.mubr.f32.mxu0 %v7946_v15  ;;  %v2412_v24 = vpop.xlane.xlu0 %2411 }
 0x508   : > { %9276 = vst [vmem:[#allocation96_spill] sm:$0xff] %v7953_v57  ;;  %v7956_v46 = vpop.f32.mrb[161].mxu0  ;;  %v2463_v42 = vsub.f32 %v7681_v25, %v2412_v24  ;;  %2449 = vmax.xlane.f32.xlu1 %v7949_v0 }
 0x509   : > { %9277 = vst [vmem:[#allocation97_spill] sm:$0xff] %v7956_v46  ;;  %v7960_v53 = vpop.eup %5880  ;;  %v7962_v40 = vpop.f32.mrb[58].mxu1 }
 0x50a   : > { %9278 = vst [vmem:[#allocation98_spill] sm:$0xff] %v7962_v40  ;;  %v2507_v45 = vmul.f32 1.442695, %v2463_v42  ;;  %v2414_v36 = vpop.xlane.xlu1 %2413  ;;  %v7964_v48 = vpop.f32.mrb[162].mxu0  ;;  %5056 = vmatmul.mubr.f32.gmra.mrb[174].mxu0 %v7960_v53  ;;  %v2991_v40 = vld [vmem:[#allocation7 + $0x58] sm:$0xff] }
 0x50b   : > { %9279 = vst [vmem:[#allocation99_spill] sm:$0xff] %v7964_v48  ;;  %v2464_v22 = vsub.f32 %v7687_v5, %v2414_v36  ;;  %v7968_v33 = vpop.f32.mrb[59].mxu1  ;;  %v7970_v57 = vpop.f32.mrb[163].mxu0  ;;  %v5375_v35 = vpack.c.bf16 %v2995_v12, %v2991_v40  ;;  %v2999_v40 = vld [vmem:[#allocation7 + $0x98] sm:$0xff] }
 0x50c   : > { %9280 = vst [vmem:[#allocation100_spill] sm:$0xff] %v7968_v33  ;;  %9281 = vst [vmem:[#allocation101_spill] sm:$0xff] %v7970_v57  ;;  %5886 = vpow2.f32 %v2507_v45 }
 0x50d   : > { %v2509_v25 = vmul.f32 1.442695, %v2464_v22  ;;  %v7972_v24 = vpop.f32.mrb[60].mxu1 }
 0x50e   : > { %9282 = vst [vmem:[#allocation102_spill] sm:$0xff] %v7972_v24  ;;  %v7974_v46 = vpop.eup %5882  ;;  %v7976_v14 = vpop.f32.mrb[164].mxu0 }
 0x50f   : > { %9283 = vst [vmem:[#allocation103_spill] sm:$0xff] %v7976_v14  ;;  %v7978_v42 = vpop.f32.mrb[61].mxu1  ;;  %5888 = vpow2.f32 %v2509_v25  ;;  %5058 = vmatprep.mubr.f32.mxu0 %v7974_v46  ;;  %v2416_v48 = vpop.xlane.xlu0 %2415 }
 0x510   : > { %9284 = vst [vmem:[#allocation104_spill] sm:$0xff] %v7978_v42  ;;  %v7981_v49 = vpop.f32.mrb[165].mxu0  ;;  %v2465_v5 = vsub.f32 %v7693_v60, %v2416_v48  ;;  %v2982_v42 = vld [vmem:[#allocation7 + $0x10] sm:$0xff] }
 0x511   : > { %9285 = vst [vmem:[#allocation105_spill] sm:$0xff] %v7981_v49  ;;  %v7984_v36 = vpop.eup %5884  ;;  %v7986_v45 = vpop.f32.mrb[62].mxu1  ;;  %v5373_v62 = vpack.c.bf16 %v2986_v2, %v2982_v42  ;;  %v2994_v42 = vld [vmem:[#allocation7 + $0x70] sm:$0xff] }
 0x512   : > { %9286 = vst [vmem:[#allocation106_spill] sm:$0xff] %v7986_v45  ;;  %v2511_v22 = vmul.f32 1.442695, %v2465_v5  ;;  %v2418_v57 = vpop.xlane.xlu1 %2417  ;;  %v7988_v24 = vpop.f32.mrb[63].mxu1  ;;  %5059 = vmatmul.mubr.f32.gmra.mrb[176].mxu0 %v7984_v36 }
 0x513   : > { %9287 = vst [vmem:[#allocation107_spill] sm:$0xff] %v7988_v24  ;;  %v2466_v14 = vsub.f32 %v7699_v16, %v2418_v57 }
 0x514   : > { %5890 = vpow2.f32 %v2511_v22 }
 0x515   : > { %v2513_v25 = vmul.f32 1.442695, %v2466_v14  ;;  %v7992_v31 = vpop.f32.mrb[64].mxu1 }
 0x516   : > { %9288 = vst [vmem:[#allocation108_spill] sm:$0xff] %v7992_v31  ;;  %v7994_v56 = vpop.eup %5886  ;;  %v7996_v49 = vpop.f32.mrb[65].mxu1 }
 0x517   : > { %9289 = vst [vmem:[#allocation109_spill] sm:$0xff] %v7996_v49  ;;  %v2420_v60 = vpop.xlane.xlu0 %2419  ;;  %5061 = vmatprep.mubr.f32.mxu0 %v7994_v56  ;;  %5892 = vpow2.f32 %v2513_v25 }
 0x518   : > { %v2467_v48 = vsub.f32 %v7705_v13, %v2420_v60 }
 0x519   : > { %v8000_v5 = vpop.eup %5888  ;;  %v8002_v24 = vpop.f32.mrb[66].mxu1 }
 0x51a   : > { %v2515_v45 = vmul.f32 1.442695, %v2467_v48  ;;  %9290 = vst [vmem:[#allocation110_spill] sm:$0xff] %v8002_v24  ;;  %v2422_v16 = vpop.xlane.xlu1 %2421  ;;  %v8004_v57 = vpop.f32.mrb[67].mxu1  ;;  %5062 = vmatmul.mubr.f32.gmra.mrb[178].mxu0 %v8000_v5 }
 0x51b   : > { %9291 = vst [vmem:[#allocation111_spill] sm:$0xff] %v8004_v57  ;;  %v2468_v14 = vsub.f32 %v7711_v63, %v2422_v16 }
 0x51c   : > { %5894 = vpow2.f32 %v2515_v45 }
 0x51d   : > { %v2517_v22 = vmul.f32 1.442695, %v2468_v14  ;;  %v8008_v31 = vpop.f32.mrb[68].mxu1  ;;  %v1641_v14 = vsub.s32 4, %v6798_v23 }
 0x51e   : > { %9292 = vst [vmem:[#allocation112_spill] sm:$0xff] %v8008_v31  ;;  %v2426_v49 = vpop.xlane.xlu1 %2425  ;;  %v8010_v52 = vpop.f32.mrb[69].mxu1  ;;  %v2983_v31 = vld [vmem:[#allocation7 + $0x18] sm:$0xff] }
 0x51f   : > { %9293 = vst [vmem:[#allocation113_spill] sm:$0xff] %v8010_v52  ;;  %v8012_v13 = vpop.eup %5890  ;;  %5896 = vpow2.f32 %v2517_v22  ;;  %v2470_v25 = vsub.f32 %v7719_v55, %v2426_v49  ;;  %v2424_v60 = vpop.xlane.xlu0 %2423  ;;  %v2981_v49 = vld [vmem:[#allocation7 + $0x8] sm:$0xff]  ;;  %v2984_v52 = vld [vmem:[#allocation7 + $0x20] sm:$0xff] }
 0x520   : > { %5064 = vmatprep.mubr.f32.mxu0 %v8012_v13  ;;  %v2469_v48 = vsub.f32 %v7722_v50, %v2424_v60  ;;  %v2985_v22 = vld [vmem:[#allocation7 + $0x28] sm:$0xff] }
 0x521   : > { %v2521_v24 = vmul.f32 1.442695, %v2470_v25  ;;  %v8017_v57 = vpop.f32.mrb[70].mxu1  ;;  %v8019_v63 = vpop.eup %5892  ;;  %v5339_v60 = vpack.c.bf16 %v2985_v22, %v2981_v49 }
 0x522   : > { %9294 = vst [vmem:[#allocation114_spill] sm:$0xff] %v8017_v57  ;;  %v2519_v45 = vmul.f32 1.442695, %v2469_v48  ;;  %v8021_v16 = vpop.f32.mrb[71].mxu1  ;;  %5065 = vmatmul.mubr.f32.gmra.mrb[180].mxu0 %v8019_v63  ;;  %v2987_v57 = vld [vmem:[#allocation7 + $0x38] sm:$0xff]  ;;  %v2980_v48 = vld [vmem:[#allocation7] sm:$0xff] }
 0x523   : > { %9295 = vst [vmem:[#allocation115_spill] sm:$0xff] %v8021_v16  ;;  %5898 = vpow2.f32 %v2521_v24  ;;  %v5371_v24 = vpack.c.bf16 %v2987_v57, %v2983_v31  ;;  %v5341_v16 = vpack.c.bf16 %v2984_v52, %v2980_v48  ;;  %5340 = vmatprep.subr.bf16.mxu1 %v5339_v60  ;;  %v2988_v31 = vld [vmem:[#allocation7 + $0x40] sm:$0xff]  ;;  %v2990_v57 = vld [vmem:[#allocation7 + $0x50] sm:$0xff]  ;;  %v2997_v60 = vld [vmem:[#allocation7 + $0x88] sm:$0xff] }
 0x524   : > { %5900 = vpow2.f32 %v2519_v45  ;;  %v2989_v45 = vld [vmem:[#allocation7 + $0x48] sm:$0xff]  ;;  %v2992_v52 = vld [vmem:[#allocation7 + $0x60] sm:$0xff]  ;;  %v5347_v12 = vpack.c.bf16 %v3001_v51, %v2997_v60 }
 0x525   : > { %v8025_v55 = vpop.f32.mrb[72].mxu1  ;;  %5372 = vmatprep.subr.bf16.mxu0 %v5371_v24  ;;  %5342 = vmatpush1.bf16.msra.mxu1 %v5341_v16  ;;  %v5343_v22 = vpack.c.bf16 %v2993_v38, %v2989_v45  ;;  %v5345_v2 = vpack.c.bf16 %v2992_v52, %v2988_v31  ;;  %v5377_v38 = vpack.c.bf16 %v2994_v42, %v2990_v57  ;;  %v3003_v16 = vld [vmem:[#allocation7 + $0xb8] sm:$0xff]  ;;  %v2996_v24 = vld [vmem:[#allocation7 + $0x80] sm:$0xff] }
 0x526   : > { %9296 = vst [vmem:[#allocation116_spill] sm:$0xff] %v8025_v55  ;;  %v8027_v50 = vpop.eup %5894  ;;  %v8029_v25 = vpop.f32.mrb[73].mxu1  ;;  %v8033_v55 = vrot.slane %v7575_v19, %v1641_v14  ;;  %5374 = vmatpush1.bf16.msra.mxu0 %v5373_v62  ;;  %v5379_v45 = vpack.c.bf16 %v3003_v16, %v2999_v40  ;;  %v3011_v57 = vld [vmem:[#allocation7 + $0xf8] sm:$0xff]  ;;  %v3004_v42 = vld [vmem:[#allocation7 + $0xc0] sm:$0xff]  ;;  %v3013_v16 = vld [vmem:[#allocation7 + $0x108] sm:$0xff] }
 0x527   : > { %9297 = vst [vmem:[#allocation117_spill] sm:$0xff] %v8029_v25  ;;  %5067 = vmatprep.mubr.f32.mxu0 %v8027_v50  ;;  %5344 = vmatprep.subr.bf16.mxu1 %v5343_v22  ;;  %v3008_v60 = vld [vmem:[#allocation7 + $0xe0] sm:$0xff] }
 0x528   : > { %5376 = vmatprep.subr.bf16.mxu0 %v5375_v35 }
 0x529   : > { %v8035_v25 = vpop.eup %5896  ;;  %v4989_v49 = vpop.f32.mrb[74].mxu1  ;;  %5346 = vmatpush1.bf16.msra.mxu1 %v5345_v2 }
 0x52a   : > { %v8038_v48 = vadd.f32 %v4989_v49, %v8033_v55  ;;  %v2308_v14 = vpop.f32.mrb[75].mxu1  ;;  %5068 = vmatmul.mubr.f32.gmra.mrb[182].mxu0 %v8035_v25  ;;  %v3000_v49 = vld [vmem:[#allocation7 + $0xa0] sm:$0xff]  ;;  %5348 = vmatprep.subr.bf16.mxu1 %v5347_v12 }
 0x52b   : > { %v8042_v33 = vadd.f32 %v2308_v14, %v8033_v55  ;;  %v5349_v52 = vpack.c.bf16 %v3000_v49, %v2996_v24  ;;  %v3009_v14 = vld [vmem:[#allocation7 + $0xe8] sm:$0xff]  ;;  %5378 = vmatpush1.bf16.msra.mxu0 %v5377_v38  ;;  %v3006_v49 = vld [vmem:[#allocation7 + $0xd0] sm:$0xff] }
 0x52c   : > { %9298 = vst [vmem:[#allocation118_spill] sm:$0xff] %v8038_v48  ;;  %v2998_v48 = vld [vmem:[#allocation7 + $0x90] sm:$0xff]  ;;  %v5351_v35 = vpack.c.bf16 %v3009_v14, %v3005_v9  ;;  %5380 = vmatprep.subr.bf16.mxu0 %v5379_v45  ;;  %v5353_v9 = vpack.c.bf16 %v3008_v60, %v3004_v42  ;;  %v3015_v14 = vld [vmem:[#allocation7 + $0x118] sm:$0xff] }
 0x52d   : > { %9299 = vst [vmem:[#allocation119_spill] sm:$0xff] %v8042_v33  ;;  %v8044_v4 = vpop.eup %5898  ;;  %v4992_v31 = vpop.f32.mrb[76].mxu1  ;;  %v3007_v33 = vld [vmem:[#allocation7 + $0xd8] sm:$0xff]  ;;  %v5381_v2 = vpack.c.bf16 %v3002_v47, %v2998_v48  ;;  %5350 = vmatpush1.bf16.msra.mxu1 %v5349_v52 }
 0x52e   : > { %v8046_v62 = vpop.eup %5900  ;;  %v8049_v51 = vadd.f32 %v4992_v31, %v8033_v55  ;;  %v2318_v22 = vpop.f32.mrb[77].mxu1  ;;  %v5383_v24 = vpack.c.bf16 %v3011_v57, %v3007_v33  ;;  %v3010_v31 = vld [vmem:[#allocation7 + $0xf0] sm:$0xff]  ;;  %5352 = vmatprep.subr.bf16.mxu1 %v5351_v35  ;;  %v5387_v33 = vpack.c.bf16 %v3019_v58, %v3015_v14 }
 0x52f   : > { %v8052_v40 = vadd.f32 %v2318_v22, %v8033_v55  ;;  %5070 = vmatprep.mubr.f32.mxu0 %v8046_v62  ;;  %5382 = vmatpush1.bf16.msra.mxu0 %v5381_v2  ;;  %v5385_v48 = vpack.c.bf16 %v3010_v31, %v3006_v49  ;;  %v3016_v49 = vld [vmem:[#allocation7 + $0x120] sm:$0xff]  ;;  %v3014_v31 = vld [vmem:[#allocation7 + $0x110] sm:$0xff] }
 0x530   : > { %9300 = vst [vmem:[#allocation120_spill] sm:$0xff] %v8049_v51  ;;  %5071 = vmatmul.mubr.f32.gmra.mrb[184].mxu0 %v8044_v4  ;;  %v3017_v51 = vld [vmem:[#allocation7 + $0x128] sm:$0xff]  ;;  %5384 = vmatprep.subr.bf16.mxu0 %v5383_v24  ;;  %v3012_v24 = vld [vmem:[#allocation7 + $0x100] sm:$0xff]  ;;  %v3018_v14 = vld [vmem:[#allocation7 + $0x130] sm:$0xff] }
 0x531   : > { %9301 = vst [vmem:[#allocation121_spill] sm:$0xff] %v8052_v40  ;;  %v4995_v12 = vpop.f32.mrb[78].mxu1  ;;  %v5355_v38 = vpack.c.bf16 %v3017_v51, %v3013_v16  ;;  %5354 = vmatpush1.bf16.msra.mxu1 %v5353_v9  ;;  %v5357_v9 = vpack.c.bf16 %v3016_v49, %v3012_v24 }
 0x532   : > { %v8057_v22 = vadd.f32 %v4995_v12, %v8033_v55  ;;  %v2328_v40 = vpop.f32.mrb[79].mxu1 }
 0x533   : > { %v8060_v47 = vadd.f32 %v2328_v40, %v8033_v55  ;;  %5356 = vmatprep.subr.bf16.mxu1 %v5355_v38  ;;  %5386 = vmatpush1.bf16.msra.mxu0 %v5385_v48  ;;  %v5389_v38 = vpack.c.bf16 %v3018_v14, %v3014_v31  ;;  %v3022_v31 = vld [vmem:[#allocation7 + $0x150] sm:$0xff] }
 0x534   : > { %9302 = vst [vmem:[#allocation122_spill] sm:$0xff] %v8057_v22  ;;  %5388 = vmatprep.subr.bf16.mxu0 %v5387_v33  ;;  %v3021_v33 = vld [vmem:[#allocation7 + $0x148] sm:$0xff]  ;;  %v3026_v14 = vld [vmem:[#allocation7 + $0x170] sm:$0xff] }
 0x535   : > { %v4998_v45 = vpop.f32.mrb[80].mxu1  ;;  %5358 = vmatpush1.bf16.msra.mxu1 %v5357_v9  ;;  %v5393_v9 = vpack.c.bf16 %v3026_v14, %v3022_v31  ;;  %v3037_v31 = vld [vmem:[#allocation7 + $0x1c8] sm:$0xff]  ;;  %v3039_v14 = vld [vmem:[#allocation7 + $0x1d8] sm:$0xff] }
 0x536   : > { %v8063_v52 = vadd.f32 %v4998_v45, %v8033_v55  ;;  %v2338_v57 = vpop.f32.mrb[81].mxu1  ;;  %v3025_v45 = vld [vmem:[#allocation7 + $0x168] sm:$0xff] }
 0x537   : > { %v8066_v42 = vadd.f32 %v2338_v57, %v8033_v55  ;;  %v3023_v57 = vld [vmem:[#allocation7 + $0x158] sm:$0xff]  ;;  %5390 = vmatpush1.bf16.msra.mxu0 %v5389_v38 }
 0x538   : > { %9303 = vst [vmem:[#allocation123_spill] sm:$0xff] %v8063_v52  ;;  %v3031_v52 = vld [vmem:[#allocation7 + $0x198] sm:$0xff] }
 0x539   : > { %9304 = vst [vmem:[#allocation124_spill] sm:$0xff] %v8066_v42  ;;  %v5001_v51 = vpop.f32.mrb[82].mxu1 }
 0x53a   : > { %v8069_v35 = vadd.f32 %v5001_v51, %v8033_v55  ;;  %v2348_v60 = vpop.f32.mrb[83].mxu1 }
 0x53b   : > { %v8072_v40 = vadd.f32 %v2348_v60, %v8033_v55 }
 0x53c   : > { %9305 = vst [vmem:[#allocation125_spill] sm:$0xff] %v8069_v35  ;;  %v3020_v35 = vld [vmem:[#allocation7 + $0x140] sm:$0xff] }
 0x53d   : > { %9306 = vst [vmem:[#allocation126_spill] sm:$0xff] %v8072_v40  ;;  %v5004_v58 = vpop.f32.mrb[84].mxu1  ;;  %v3024_v40 = vld [vmem:[#allocation7 + $0x160] sm:$0xff] }
 0x53e   : > { %v8075_v2 = vadd.f32 %v5004_v58, %v8033_v55  ;;  %v2358_v16 = vpop.f32.mrb[85].mxu1  ;;  %v5359_v58 = vpack.c.bf16 %v3025_v45, %v3021_v33  ;;  %v5361_v49 = vpack.c.bf16 %v3024_v40, %v3020_v35 }
 0x53f   : > { %v8078_v12 = vadd.f32 %v2358_v16, %v8033_v55 }
 0x540   : > { %9307 = vst [vmem:[#allocation127_spill] sm:$0xff] %v8075_v2  ;;  %v3027_v2 = vld [vmem:[#allocation7 + $0x178] sm:$0xff]  ;;  %5360 = vmatprep.subr.bf16.mxu1 %v5359_v58  ;;  %v3030_v58 = vld [vmem:[#allocation7 + $0x190] sm:$0xff] }
 0x541   : > { %9308 = vst [vmem:[#allocation128_spill] sm:$0xff] %v8078_v12  ;;  %v5007_v48 = vpop.f32.mrb[86].mxu1  ;;  %v5391_v24 = vpack.c.bf16 %v3027_v2, %v3023_v57  ;;  %5362 = vmatpush1.bf16.msra.mxu1 %v5361_v49  ;;  %v3032_v2 = vld [vmem:[#allocation7 + $0x1a0] sm:$0xff] }
 0x542   : > { %v8081_v51 = vadd.f32 %v5007_v48, %v8033_v55  ;;  %v2368_v60 = vpop.f32.mrb[87].mxu1  ;;  %v3029_v48 = vld [vmem:[#allocation7 + $0x188] sm:$0xff] }
 0x543   : > { %v8084_v16 = vadd.f32 %v2368_v60, %v8033_v55  ;;  %5392 = vmatprep.subr.bf16.mxu0 %v5391_v24  ;;  %v3035_v60 = vld [vmem:[#allocation7 + $0x1b8] sm:$0xff]  ;;  %v3034_v24 = vld [vmem:[#allocation7 + $0x1b0] sm:$0xff] }
 0x544   : > { %9309 = vst [vmem:[#allocation129_spill] sm:$0xff] %v8081_v51  ;;  %v3033_v51 = vld [vmem:[#allocation7 + $0x1a8] sm:$0xff]  ;;  %5394 = vmatpush1.bf16.msra.mxu0 %v5393_v9  ;;  %v5395_v40 = vpack.c.bf16 %v3035_v60, %v3031_v52  ;;  %v5397_v49 = vpack.c.bf16 %v3034_v24, %v3030_v58 }
 0x545   : > { %9310 = vst [vmem:[#allocation130_spill] sm:$0xff] %v8084_v16  ;;  %v5010_v12 = vpop.f32.mrb[88].mxu1  ;;  %v5363_v45 = vpack.c.bf16 %v3033_v51, %v3029_v48  ;;  %v3028_v16 = vld [vmem:[#allocation7 + $0x180] sm:$0xff]  ;;  %v3043_v51 = vld [vmem:[#allocation7 + $0x1f8] sm:$0xff] }
 0x546   : > { %v8087_v38 = vadd.f32 %v5010_v12, %v8033_v55  ;;  %v2378_v33 = vpop.f32.mrb[89].mxu1  ;;  %v5365_v57 = vpack.c.bf16 %v3032_v2, %v3028_v16  ;;  %5396 = vmatprep.subr.bf16.mxu0 %v5395_v40  ;;  %v3041_v12 = vld [vmem:[#allocation7 + $0x1e8] sm:$0xff]  ;;  %v3036_v48 = vld [vmem:[#allocation7 + $0x1c0] sm:$0xff]  ;;  %v5399_v42 = vpack.c.bf16 %v3043_v51, %v3039_v14 }
 0x547   : > { %v8090_v35 = vadd.f32 %v2378_v33, %v8033_v55  ;;  %5364 = vmatprep.subr.bf16.mxu1 %v5363_v45  ;;  %v5367_v9 = vpack.c.bf16 %v3041_v12, %v3037_v31  ;;  %v3038_v33 = vld [vmem:[#allocation7 + $0x1d0] sm:$0xff] }
 0x548   : > { %9311 = vst [vmem:[#allocation131_spill] sm:$0xff] %v8087_v38  ;;  %5366 = vmatpush1.bf16.msra.mxu1 %v5365_v57  ;;  %5398 = vmatpush1.bf16.msra.mxu0 %v5397_v49  ;;  %v3040_v38 = vld [vmem:[#allocation7 + $0x1e0] sm:$0xff] }
 0x549   : > { %9312 = vst [vmem:[#allocation132_spill] sm:$0xff] %v8090_v35  ;;  %v5369_v22 = vpack.c.bf16 %v3040_v38, %v3036_v48  ;;  %v3042_v35 = vld [vmem:[#allocation7 + $0x1f0] sm:$0xff]  ;;  %5368 = vmatprep.subr.bf16.mxu1 %v5367_v9  ;;  %5400 = vmatprep.subr.bf16.mxu0 %v5399_v42 }
 0x54a   : > { %v5401_v52 = vpack.c.bf16 %v3042_v35, %v3038_v33 }
 0x54c   : > { %5370 = vmatpush1.bf16.msra.mxu1 %v5369_v22  ;;  %5402 = vmatpush1.bf16.msra.mxu0 %v5401_v52 }
 0x569   : > { %v2428_v16 = vpop.xlane.xlu0 %2427 }
 0x56a   : > { %v2471_v45 = vsub.f32 %v7802_v28, %v2428_v16 }
 0x56c   : > { %v2523_v60 = vmul.f32 1.442695, %v2471_v45 }
 0x56d   : > { %v2430_v2 = vpop.xlane.xlu1 %2429 }
 0x56e   : > { %5902 = vpow2.f32 %v2523_v60  ;;  %v2472_v40 = vsub.f32 %v7813_v10, %v2430_v2 }
 0x570   : > { %v2525_v57 = vmul.f32 1.442695, %v2472_v40 }
 0x571   : > { %v2432_v58 = vpop.xlane.xlu0 %2431 }
 0x572   : > { %5904 = vpow2.f32 %v2525_v57  ;;  %v2473_v38 = vsub.f32 %v7824_v30, %v2432_v58 }
 0x574   : > { %v2527_v24 = vmul.f32 1.442695, %v2473_v38 }
 0x575   : > { %v2434_v49 = vpop.xlane.xlu1 %2433 }
 0x576   : > { %5906 = vpow2.f32 %v2527_v24  ;;  %v2474_v42 = vsub.f32 %v7837_v61, %v2434_v49 }
 0x578   : > { %v8096_v22 = vpop.eup %5902  ;;  %v2529_v35 = vmul.f32 1.442695, %v2474_v42 }
 0x579   : > { %5073 = vmatprep.mubr.f32.mxu0 %v8096_v22  ;;  %v2436_v28 = vpop.xlane.xlu0 %2435 }
 0x57a   : > { %5908 = vpow2.f32 %v2529_v35  ;;  %v2475_v31 = vsub.f32 %v7851_v54, %v2436_v28 }
 0x57c   : > { %v8100_v10 = vpop.eup %5904  ;;  %v2531_v12 = vmul.f32 1.442695, %v2475_v31 }
 0x57d   : > { %v2438_v14 = vpop.xlane.xlu1 %2437  ;;  %5074 = vmatmul.mubr.f32.gmra.mrb[186].mxu0 %v8100_v10 }
 0x57e   : > { %5910 = vpow2.f32 %v2531_v12  ;;  %v2476_v30 = vsub.f32 %v7865_v1, %v2438_v14 }
 0x580   : > { %v8104_v9 = vpop.eup %5906  ;;  %v2533_v61 = vmul.f32 1.442695, %v2476_v30 }
 0x581   : > { %5076 = vmatprep.mubr.f32.mxu0 %v8104_v9  ;;  %v2440_v51 = vpop.xlane.xlu0 %2439 }
 0x582   : > { %5912 = vpow2.f32 %v2533_v61  ;;  %v2477_v48 = vsub.f32 %v7879_v20, %v2440_v51 }
 0x584   : > { %v8108_v33 = vpop.eup %5908  ;;  %v2535_v54 = vmul.f32 1.442695, %v2477_v48 }
 0x585   : > { %v2442_v52 = vpop.xlane.xlu1 %2441  ;;  %5077 = vmatmul.mubr.f32.gmra.mrb[188].mxu0 %v8108_v33 }
 0x586   : > { %5914 = vpow2.f32 %v2535_v54  ;;  %v2478_v16 = vsub.f32 %v7893_v37, %v2442_v52 }
 0x588   : > { %v8112_v45 = vpop.eup %5910  ;;  %v2537_v1 = vmul.f32 1.442695, %v2478_v16 }
 0x589   : > { %5079 = vmatprep.mubr.f32.mxu0 %v8112_v45  ;;  %v2444_v60 = vpop.xlane.xlu0 %2443 }
 0x58a   : > { %5916 = vpow2.f32 %v2537_v1  ;;  %v2479_v2 = vsub.f32 %v7907_v17, %v2444_v60 }
 0x58c   : > { %v8116_v40 = vpop.eup %5912  ;;  %v2539_v20 = vmul.f32 1.442695, %v2479_v2 }
 0x58d   : > { %v2446_v57 = vpop.xlane.xlu1 %2445  ;;  %5080 = vmatmul.mubr.f32.gmra.mrb[190].mxu0 %v8116_v40 }
 0x58e   : > { %5918 = vpow2.f32 %v2539_v20  ;;  %v2480_v58 = vsub.f32 %v7921_v26, %v2446_v57 }
 0x590   : > { %v8120_v38 = vpop.eup %5914  ;;  %v2541_v37 = vmul.f32 1.442695, %v2480_v58 }
 0x591   : > { %5082 = vmatprep.mubr.f32.mxu0 %v8120_v38  ;;  %v2448_v24 = vpop.xlane.xlu0 %2447 }
 0x592   : > { %5920 = vpow2.f32 %v2541_v37  ;;  %v2481_v49 = vsub.f32 %v7935_v43, %v2448_v24 }
 0x594   : > { %v8124_v42 = vpop.eup %5916  ;;  %v2543_v17 = vmul.f32 1.442695, %v2481_v49 }
 0x595   : > { %v2450_v35 = vpop.xlane.xlu1 %2449  ;;  %5083 = vmatmul.mubr.f32.gmra.mrb[192].mxu0 %v8124_v42 }
 0x596   : > { %5922 = vpow2.f32 %v2543_v17  ;;  %v2482_v28 = vsub.f32 %v7949_v0, %v2450_v35 }
 0x598   : > { %v8128_v31 = vpop.eup %5918  ;;  %v2545_v26 = vmul.f32 1.442695, %v2482_v28 }
 0x599   : > { %5085 = vmatprep.mubr.f32.mxu0 %v8128_v31 }
 0x59a   : > { %5924 = vpow2.f32 %v2545_v26  ;;  %v3686_v26 = vld [vmem:[%s9080_s4] sm:$0xff] }
 0x59c   : > { %v8131_v12 = vpop.eup %5920 }
 0x59d   : > { %5086 = vmatmul.mubr.f32.gmra.mrb[194].mxu0 %v8131_v12 }
 0x5a0   : > { %v8134_v43 = vpop.eup %5922 }
 0x5a1   : > { %5088 = vmatprep.mubr.f32.mxu0 %v8134_v43 }
 0x5a4   : > { %v8137_v14 = vpop.eup %5924 }
 0x5a5   : > { %5089 = vmatmul.mubr.f32.gmra.mrb[196].mxu0 %v8137_v14 }
 0x5a6   : > { %3365 = vmatprep.mubr.f32.mxu0 %v9172_v7 }
 0x5bd   : > { %v5045_v0 = vpop.f32.mrb[166].mxu0 }
 0x5be   : > { %v2629_v30 = vpop.f32.mrb[167].mxu0 }
 0x5bf   : > { %5926 = vrcp.f32 %v2629_v30 }
 0x5c0   : > { %5928 = vrcp.f32 %v5045_v0 }
 0x5c5   : > { %v5048_v61 = vpop.f32.mrb[168].mxu0 }
 0x5c6   : > { %v2639_v51 = vpop.f32.mrb[169].mxu0 }
 0x5c7   : > { %5930 = vrcp.f32 %v2639_v51  ;;  %v6456_v51 = vmov 0.0|0.0  }
 0x5c8   : > { %5932 = vrcp.f32 %v5048_v61  ;;  %5403 = vmatprep.subr.bf16.mxu1 %v6456_v51 }
 0x5c9   : > { %v5927_v48 = vpop.eup %5926 }
 0x5ca   : > { %v2789_v54 = vmul.f32 %v5927_v48, %v7834_v59  ;;  %v5929_v52 = vpop.eup %5928 }
 0x5cb   : > { %v2791_v60 = vmul.f32 %v5929_v52, %v7848_v18  ;;  %v3689_v52 = vld [vmem:[%s9080_s4 + $0x18] sm:$0xff] }
 0x5cc   : > { %3109 = vmatmul.mubr.f32.vlgmr.msra.gmra.mrb[90].mxu1 %v2789_v54  ;;  %3366 = vmatmul.mubr.f32.vlgmr.msra.gmra.mrb[198].mxu0 %v2789_v54 }
 0x5cd   : > { %v5051_v16 = vpop.f32.mrb[170].mxu0  ;;  %3114 = vmatprep.mubr.f32.mxu1 %v9172_v7  ;;  %3371 = vmatprep.mubr.f32.mxu0 %v9172_v7 }
 0x5ce   : > { %v2649_v1 = vpop.f32.mrb[171].mxu0 }
 0x5cf   : > { %5934 = vrcp.f32 %v2649_v1 }
 0x5d0   : > { %3115 = vmatmul.mubr.f32.gmra.mrb[92].mxu1 %v2791_v60  ;;  %3372 = vmatmul.mubr.f32.gmra.mrb[200].mxu0 %v2791_v60  ;;  %5936 = vrcp.f32 %v5051_v16  ;;  %v3690_v60 = vld [vmem:[%s9080_s4 + $0x20] sm:$0xff] }
 0x5d1   : > { %v5931_v2 = vpop.eup %5930  ;;  %3120 = vmatprep.mubr.f32.mxu1 %v9172_v7  ;;  %3377 = vmatprep.mubr.f32.mxu0 %v9172_v7 }
 0x5d2   : > { %v2793_v59 = vmul.f32 %v5931_v2, %v7862_v34  ;;  %v5933_v20 = vpop.eup %5932 }
 0x5d3   : > { %v2795_v58 = vmul.f32 %v5933_v20, %v7876_v32 }
 0x5d4   : > { %3121 = vmatmul.mubr.f32.gmra.mrb[94].mxu1 %v2793_v59  ;;  %3378 = vmatmul.mubr.f32.gmra.mrb[202].mxu0 %v2793_v59 }
 0x5d5   : > { %v5054_v57 = vpop.f32.mrb[172].mxu0  ;;  %3126 = vmatprep.mubr.f32.mxu1 %v9172_v7  ;;  %3383 = vmatprep.mubr.f32.mxu0 %v9172_v7 }
 0x5d6   : > { %v2659_v18 = vpop.f32.mrb[173].mxu0 }
 0x5d7   : > { %5938 = vrcp.f32 %v2659_v18 }
 0x5d8   : > { %3127 = vmatmul.mubr.f32.gmra.mrb[96].mxu1 %v2795_v58  ;;  %3384 = vmatmul.mubr.f32.gmra.mrb[204].mxu0 %v2795_v58  ;;  %5940 = vrcp.f32 %v5054_v57 }
 0x5d9   : > { %v5935_v37 = vpop.eup %5934  ;;  %3132 = vmatprep.mubr.f32.mxu1 %v9172_v7  ;;  %3389 = vmatprep.mubr.f32.mxu0 %v9172_v7 }
 0x5da   : > { %v2797_v34 = vmul.f32 %v5935_v37, %v7890_v21  ;;  %v5937_v24 = vpop.eup %5936  ;;  %v3693_v37 = vld [vmem:[%s9080_s4 + $0x38] sm:$0xff] }
 0x5db   : > { %v2799_v17 = vmul.f32 %v5937_v24, %v7904_v6  ;;  %v3687_v6 = vld [vmem:[%s9080_s4 + $0x8] sm:$0xff] }
 0x5dc   : > { %3133 = vmatmul.mubr.f32.gmra.mrb[98].mxu1 %v2797_v34  ;;  %3390 = vmatmul.mubr.f32.gmra.mrb[206].mxu0 %v2797_v34  ;;  %v5404_v0 = vpack.c.bf16 %v3687_v6, %v3686_v26  ;;  %v3697_v6 = vld [vmem:[%s9080_s4 + $0x58] sm:$0xff] }
 0x5dd   : > { %v5057_v49 = vpop.f32.mrb[174].mxu0  ;;  %3138 = vmatprep.mubr.f32.mxu1 %v9172_v7  ;;  %3395 = vmatprep.mubr.f32.mxu0 %v9172_v7 }
 0x5de   : > { %v2669_v32 = vpop.f32.mrb[175].mxu0  ;;  %5405 = vmatpush1.bf16.msra.mxu1 %v5404_v0 }
 0x5df   : > { %5942 = vrcp.f32 %v2669_v32  ;;  %5406 = vmatprep.subr.bf16.mxu1 %v6456_v51 }
 0x5e0   : > { %3139 = vmatmul.mubr.f32.gmra.mrb[100].mxu1 %v2799_v17  ;;  %3396 = vmatmul.mubr.f32.gmra.mrb[208].mxu0 %v2799_v17  ;;  %5944 = vrcp.f32 %v5057_v49  ;;  %v3694_v49 = vld [vmem:[%s9080_s4 + $0x40] sm:$0xff] }
 0x5e1   : > { %v5939_v35 = vpop.eup %5938  ;;  %3144 = vmatprep.mubr.f32.mxu1 %v9172_v7  ;;  %3401 = vmatprep.mubr.f32.mxu0 %v9172_v7 }
 0x5e2   : > { %v2801_v21 = vmul.f32 %v5939_v35, %v7918_v11  ;;  %v5941_v28 = vpop.eup %5940 }
 0x5e3   : > { %v2803_v11 = vmul.f32 %v5941_v28, %v7932_v27  ;;  %v3688_v27 = vld [vmem:[%s9080_s4 + $0x10] sm:$0xff] }
 0x5e4   : > { %3145 = vmatmul.mubr.f32.gmra.mrb[102].mxu1 %v2801_v21  ;;  %3402 = vmatmul.mubr.f32.gmra.mrb[210].mxu0 %v2801_v21  ;;  %v5407_v1 = vpack.c.bf16 %v3689_v52, %v3688_v27  ;;  %v3700_v52 = vld [vmem:[%s9080_s4 + $0x70] sm:$0xff] }
 0x5e5   : > { %v5060_v30 = vpop.f32.mrb[176].mxu0  ;;  %3150 = vmatprep.mubr.f32.mxu1 %v9172_v7  ;;  %3407 = vmatprep.mubr.f32.mxu0 %v9172_v7 }
 0x5e6   : > { %v2679_v61 = vpop.f32.mrb[177].mxu0  ;;  %5408 = vmatpush1.bf16.msra.mxu1 %v5407_v1 }
 0x5e7   : > { %5946 = vrcp.f32 %v2679_v61  ;;  %5409 = vmatprep.subr.bf16.mxu1 %v6456_v51  ;;  %v3698_v61 = vld [vmem:[%s9080_s4 + $0x60] sm:$0xff] }
 0x5e8   : > { %3151 = vmatmul.mubr.f32.gmra.mrb[104].mxu1 %v2803_v11  ;;  %3408 = vmatmul.mubr.f32.gmra.mrb[212].mxu0 %v2803_v11  ;;  %5948 = vrcp.f32 %v5060_v30 }
 0x5e9   : > { %v5943_v48 = vpop.eup %5942  ;;  %3156 = vmatprep.mubr.f32.mxu1 %v9172_v7  ;;  %3413 = vmatprep.mubr.f32.mxu0 %v9172_v7 }
 0x5ea   : > { %v2805_v54 = vmul.f32 %v5943_v48, %v7946_v15  ;;  %v5945_v16 = vpop.eup %5944  ;;  %v3691_v15 = vld [vmem:[%s9080_s4 + $0x28] sm:$0xff] }
 0x5eb   : > { %v2807_v20 = vmul.f32 %v5945_v16, %v7960_v53  ;;  %v5410_v57 = vpack.c.bf16 %v3691_v15, %v3690_v60  ;;  %v3692_v53 = vld [vmem:[%s9080_s4 + $0x30] sm:$0xff]  ;;  %v3701_v16 = vld [vmem:[%s9080_s4 + $0x78] sm:$0xff] }
 0x5ec   : > { %3157 = vmatmul.mubr.f32.gmra.mrb[106].mxu1 %v2805_v54  ;;  %3414 = vmatmul.mubr.f32.gmra.mrb[214].mxu0 %v2805_v54  ;;  %v5413_v24 = vpack.c.bf16 %v3693_v37, %v3692_v53  ;;  %v5425_v15 = vpack.c.bf16 %v3701_v16, %v3700_v52  ;;  %v3705_v53 = vld [vmem:[%s9080_s4 + $0x98] sm:$0xff] }
 0x5ed   : > { %v5063_v2 = vpop.f32.mrb[178].mxu0  ;;  %3162 = vmatprep.mubr.f32.mxu1 %v9172_v7  ;;  %3419 = vmatprep.mubr.f32.mxu0 %v9172_v7 }
 0x5ee   : > { %v2689_v59 = vpop.f32.mrb[179].mxu0  ;;  %5411 = vmatpush1.bf16.msra.mxu1 %v5410_v57  ;;  %v3703_v57 = vld [vmem:[%s9080_s4 + $0x88] sm:$0xff] }
 0x5ef   : > { %5950 = vrcp.f32 %v2689_v59  ;;  %5412 = vmatprep.subr.bf16.mxu1 %v6456_v51 }
 0x5f0   : > { %3163 = vmatmul.mubr.f32.gmra.mrb[108].mxu1 %v2807_v20  ;;  %3420 = vmatmul.mubr.f32.gmra.mrb[216].mxu0 %v2807_v20  ;;  %5952 = vrcp.f32 %v5063_v2  ;;  %v3702_v20 = vld [vmem:[%s9080_s4 + $0x80] sm:$0xff] }
 0x5f1   : > { %v5947_v18 = vpop.eup %5946  ;;  %3168 = vmatprep.mubr.f32.mxu1 %v9172_v7  ;;  %3425 = vmatprep.mubr.f32.mxu0 %v9172_v7 }
 0x5f2   : > { %v2809_v58 = vmul.f32 %v5947_v18, %v7974_v46  ;;  %v5949_v34 = vpop.eup %5948  ;;  %v3695_v46 = vld [vmem:[%s9080_s4 + $0x48] sm:$0xff]  ;;  %5414 = vmatpush1.bf16.msra.mxu1 %v5413_v24  ;;  %v5428_v18 = vpack.c.bf16 %v3703_v57, %v3702_v20 }
 0x5f3   : > { %v2811_v17 = vmul.f32 %v5949_v34, %v7984_v36  ;;  %v5416_v35 = vpack.c.bf16 %v3695_v46, %v3694_v49  ;;  %5415 = vmatprep.subr.bf16.mxu1 %v6456_v51  ;;  %v3696_v36 = vld [vmem:[%s9080_s4 + $0x50] sm:$0xff]  ;;  %v3706_v49 = vld [vmem:[%s9080_s4 + $0xa0] sm:$0xff]  ;;  %v3707_v46 = vld [vmem:[%s9080_s4 + $0xa8] sm:$0xff] }
 0x5f4   : > { %3169 = vmatmul.mubr.f32.gmra.mrb[110].mxu1 %v2809_v58  ;;  %3426 = vmatmul.mubr.f32.gmra.mrb[218].mxu0 %v2809_v58  ;;  %v5419_v30 = vpack.c.bf16 %v3697_v6, %v3696_v36  ;;  %v3704_v58 = vld [vmem:[%s9080_s4 + $0x90] sm:$0xff]  ;;  %v3710_v36 = vld [vmem:[%s9080_s4 + $0xc0] sm:$0xff]  ;;  %v3711_v6 = vld [vmem:[%s9080_s4 + $0xc8] sm:$0xff] }
 0x5f5   : > { %3174 = vmatprep.mubr.f32.mxu1 %v9172_v7  ;;  %3431 = vmatprep.mubr.f32.mxu0 %v9172_v7  ;;  %v5066_v32 = vpop.f32.mrb[180].mxu0  ;;  %v5431_v34 = vpack.c.bf16 %v3705_v53, %v3704_v58 }
 0x5f6   : > { %v2699_v21 = vpop.f32.mrb[181].mxu0  ;;  %5417 = vmatpush1.bf16.msra.mxu1 %v5416_v35  ;;  %v3708_v35 = vld [vmem:[%s9080_s4 + $0xb0] sm:$0xff] }
 0x5f7   : > { %5954 = vrcp.f32 %v2699_v21  ;;  %5418 = vmatprep.subr.bf16.mxu1 %v6456_v51  ;;  %v3709_v21 = vld [vmem:[%s9080_s4 + $0xb8] sm:$0xff] }
 0x5f8   : > { %3175 = vmatmul.mubr.f32.gmra.mrb[112].mxu1 %v2811_v17  ;;  %3432 = vmatmul.mubr.f32.gmra.mrb[220].mxu0 %v2811_v17  ;;  %5956 = vrcp.f32 %v5066_v32  ;;  %v5434_v32 = vpack.c.bf16 %v3707_v46, %v3706_v49 }
 0x5f9   : > { %v5951_v28 = vpop.eup %5950  ;;  %3180 = vmatprep.mubr.f32.mxu1 %v9172_v7  ;;  %3437 = vmatprep.mubr.f32.mxu0 %v9172_v7 }
 0x5fa   : > { %v2813_v26 = vmul.f32 %v5951_v28, %v7994_v56  ;;  %v5953_v0 = vpop.eup %5952  ;;  %v3699_v56 = vld [vmem:[%s9080_s4 + $0x68] sm:$0xff]  ;;  %5420 = vmatpush1.bf16.msra.mxu1 %v5419_v30  ;;  %v5437_v28 = vpack.c.bf16 %v3709_v21, %v3708_v35  ;;  %v3712_v30 = vld [vmem:[%s9080_s4 + $0xd0] sm:$0xff] }
 0x5fb   : > { %v2815_v54 = vmul.f32 %v5953_v0, %v8000_v5  ;;  %v5422_v27 = vpack.c.bf16 %v3699_v56, %v3698_v61  ;;  %5421 = vmatprep.subr.bf16.mxu1 %v6456_v51  ;;  %v5440_v0 = vpack.c.bf16 %v3711_v6, %v3710_v36  ;;  %v3713_v61 = vld [vmem:[%s9080_s4 + $0xd8] sm:$0xff]  ;;  %v3714_v56 = vld [vmem:[%s9080_s4 + $0xe0] sm:$0xff]  ;;  %v1633_v6 = vsub.s32 2, %v6798_v23 }
 0x5fc   : > { %3181 = vmatmul.mubr.f32.gmra.mrb[114].mxu1 %v2813_v26  ;;  %3438 = vmatmul.mubr.f32.gmra.mrb[222].mxu0 %v2813_v26 }
 0x5fd   : > { %v5069_v11 = vpop.f32.mrb[182].mxu0  ;;  %3186 = vmatprep.mubr.f32.mxu1 %v9172_v7  ;;  %3443 = vmatprep.mubr.f32.mxu0 %v9172_v7 }
 0x5fe   : > { %v2709_v48 = vpop.f32.mrb[183].mxu0  ;;  %5423 = vmatpush1.bf16.msra.mxu1 %v5422_v27  ;;  %v3717_v27 = vld [vmem:[%s9080_s4 + $0xf8] sm:$0xff] }
 0x5ff   : > { %5958 = vrcp.f32 %v2709_v48  ;;  %5424 = vmatprep.subr.bf16.mxu1 %v6456_v51 }
 0x600   : > { %3187 = vmatmul.mubr.f32.gmra.mrb[116].mxu1 %v2815_v54  ;;  %3444 = vmatmul.mubr.f32.gmra.mrb[224].mxu0 %v2815_v54  ;;  %5960 = vrcp.f32 %v5069_v11  ;;  %v3715_v11 = vld [vmem:[%s9080_s4 + $0xe8] sm:$0xff]  ;;  %v3716_v54 = vld [vmem:[%s9080_s4 + $0xf0] sm:$0xff] }
 0x601   : > { %3192 = vmatprep.mubr.f32.mxu1 %v9172_v7  ;;  %3449 = vmatprep.mubr.f32.mxu0 %v9172_v7  ;;  %v5955_v5 = vpop.eup %5954  ;;  %v5446_v48 = vpack.c.bf16 %v3715_v11, %v3714_v56  ;;  %v5449_v52 = vpack.c.bf16 %v3717_v27, %v3716_v54  ;;  %v9317_v11 = vld [vmem:[#allocation26_spill] sm:$0xff]  ;;  %v9319_v54 = vld [vmem:[#allocation15_spill] sm:$0xff] }
 0x602   : > { %v2817_v60 = vmul.f32 %v5955_v5, %v8012_v13  ;;  %v5957_v2 = vpop.eup %5956  ;;  %5426 = vmatpush1.bf16.msra.mxu1 %v5425_v15 }
 0x603   : > { %v5072_v1 = vpop.f32.mrb[184].mxu0  ;;  %v2819_v13 = vmul.f32 %v5957_v2, %v8019_v63  ;;  %5427 = vmatprep.subr.bf16.mxu1 %v6456_v51 }
 0x604   : > { %v2719_v59 = vpop.f32.mrb[185].mxu0  ;;  %3193 = vmatmul.mubr.f32.gmra.mrb[118].mxu1 %v2817_v60  ;;  %3450 = vmatmul.mubr.f32.gmra.mrb[226].mxu0 %v2817_v60 }
 0x605   : > { %5962 = vrcp.f32 %v2719_v59  ;;  %3198 = vmatprep.mubr.f32.mxu1 %v9172_v7  ;;  %3455 = vmatprep.mubr.f32.mxu0 %v9172_v7 }
 0x606   : > { %5964 = vrcp.f32 %v5072_v1  ;;  %5429 = vmatpush1.bf16.msra.mxu1 %v5428_v18 }
 0x607   : > { %5430 = vmatprep.subr.bf16.mxu1 %v6456_v51 }
 0x608   : > { %3199 = vmatmul.mubr.f32.gmra.mrb[120].mxu1 %v2819_v13  ;;  %3456 = vmatmul.mubr.f32.gmra.mrb[228].mxu0 %v2819_v13 }
 0x609   : > { %v5959_v37 = vpop.eup %5958  ;;  %3204 = vmatprep.mubr.f32.mxu1 %v9172_v7  ;;  %3461 = vmatprep.mubr.f32.mxu0 %v9172_v7 }
 0x60a   : > { %v2821_v63 = vmul.f32 %v5959_v37, %v8027_v50  ;;  %v5961_v24 = vpop.eup %5960  ;;  %5432 = vmatpush1.bf16.msra.mxu1 %v5431_v34 }
 0x60b   : > { %v2823_v50 = vmul.f32 %v5961_v24, %v8035_v25  ;;  %5433 = vmatprep.subr.bf16.mxu1 %v6456_v51 }
 0x60c   : > { %3205 = vmatmul.mubr.f32.gmra.mrb[122].mxu1 %v2821_v63  ;;  %3462 = vmatmul.mubr.f32.gmra.mrb[230].mxu0 %v2821_v63 }
 0x60d   : > { %3210 = vmatprep.mubr.f32.mxu1 %v9172_v7  ;;  %3467 = vmatprep.mubr.f32.mxu0 %v9172_v7 }
 0x60e   : > { %5435 = vmatpush1.bf16.msra.mxu1 %v5434_v32 }
 0x60f   : > { %v5963_v17 = vpop.eup %5962  ;;  %5436 = vmatprep.subr.bf16.mxu1 %v6456_v51 }
 0x610   : > { %3211 = vmatmul.mubr.f32.gmra.mrb[124].mxu1 %v2823_v50  ;;  %3468 = vmatmul.mubr.f32.gmra.mrb[232].mxu0 %v2823_v50  ;;  %v2825_v25 = vmul.f32 %v5963_v17, %v8046_v62  ;;  %v5965_v26 = vpop.eup %5964 }
 0x611   : > { %3216 = vmatprep.mubr.f32.mxu1 %v9172_v7  ;;  %3473 = vmatprep.mubr.f32.mxu0 %v9172_v7  ;;  %v2827_v62 = vmul.f32 %v5965_v26, %v8044_v4  ;;  %v5443_v4 = vpack.c.bf16 %v3713_v61, %v3712_v30 }
 0x612   : > { %5438 = vmatpush1.bf16.msra.mxu1 %v5437_v28  ;;  %v9313_v28 = vsub.s32 1, %v6798_v23 }
 0x613   : > { %5439 = vmatprep.subr.bf16.mxu1 %v6456_v51 }
 0x614   : > { %3217 = vmatmul.mubr.f32.gmra.mrb[126].mxu1 %v2825_v25  ;;  %3474 = vmatmul.mubr.f32.gmra.mrb[234].mxu0 %v2825_v25  ;;  %v8345_v26 = vrot.slane %v7575_v19, %v9313_v28  ;;  %v9331_v28 = vld [vmem:[#allocation34_spill] sm:$0xff] }
 0x615   : > { %3222 = vmatprep.mubr.f32.mxu1 %v9172_v7  ;;  %3479 = vmatprep.mubr.f32.mxu0 %v9172_v7 }
 0x616   : > { %5441 = vmatpush1.bf16.msra.mxu1 %v5440_v0  ;;  %v1637_v0 = vsub.s32 3, %v6798_v23  ;;  %v1735_v61 = vadd.f32 %v7612_v41, %v8345_v26  ;;  %v1747_v23 = vadd.f32 %v7628_v44, %v8345_v26  ;;  %v1765_v27 = vadd.f32 %v9319_v54, %v8345_v26 }
 0x617   : > { %5442 = vmatprep.subr.bf16.mxu1 %v6456_v51 }
 0x618   : > { %3223 = vmatmul.mubr.f32.gmra.mrb[128].mxu1 %v2827_v62  ;;  %3480 = vmatmul.mubr.f32.gmra.mrb[236].mxu0 %v2827_v62  ;;  %v1723_v62 = vadd.f32 %v7596_v8, %v8345_v26  ;;  %v8371_v8 = vrot.slane %v7575_v19, %v1637_v0 }
 0x619   : > { %3228 = vmatprep.mubr.f32.mxu1 %v9172_v7  ;;  %3485 = vmatprep.mubr.f32.mxu0 %v9172_v7 }
 0x61a   : > { %5444 = vmatpush1.bf16.msra.mxu1 %v5443_v4 }
 0x61b   : > { %5445 = vmatprep.subr.bf16.mxu1 %v6456_v51 }
 0x61e   : > { %5447 = vmatpush1.bf16.msra.mxu1 %v5446_v48  ;;  %v1974_v48 = vadd.f32 %v9317_v11, %v8371_v8  ;;  %v3720_v11 = vld [vmem:[%s9080_s4 + $0x110] sm:$0xff] }
 0x61f   : > { %5448 = vmatprep.subr.bf16.mxu1 %v6456_v51 }
 0x622   : > { %5450 = vmatpush1.bf16.msra.mxu1 %v5449_v52  ;;  %v9320_v52 = vld [vmem:[#allocation29_spill] sm:$0xff] }
 0x623   : > { %5451 = vmatprep.subr.bf16.mxu1 %v6456_v51 }
 0x650   : > { %v5075_v16 = vpop.f32.mrb[186].mxu0 }
 0x651   : > { %v2729_v5 = vpop.f32.mrb[187].mxu0 }
 0x652   : > { %5966 = vrcp.f32 %v2729_v5  ;;  %v9321_v5 = vld [vmem:[#allocation28_spill] sm:$0xff] }
 0x653   : > { %5968 = vrcp.f32 %v5075_v16 }
 0x658   : > { %v5078_v1 = vpop.f32.mrb[188].mxu0 }
 0x659   : > { %v2739_v60 = vpop.f32.mrb[189].mxu0 }
 0x65a   : > { %5970 = vrcp.f32 %v2739_v60 }
 0x65b   : > { %5972 = vrcp.f32 %v5078_v1  ;;  %v1980_v1 = vadd.f32 %v9321_v5, %v8371_v8  ;;  %v9335_v5 = vld [vmem:[#allocation36_spill] sm:$0xff] }
 0x65c   : > { %v5967_v15 = vpop.eup %5966 }
 0x65d   : > { %v2829_v2 = vmul.f32 %v5967_v15, %v8096_v22  ;;  %v5969_v59 = vpop.eup %5968  ;;  %v9322_v15 = vld [vmem:[#allocation98_spill] sm:$0xff] }
 0x65e   : > { %v2831_v13 = vmul.f32 %v5969_v59, %v8100_v10 }
 0x65f   : > { %3229 = vmatmul.mubr.f32.gmra.mrb[130].mxu1 %v2829_v2  ;;  %3486 = vmatmul.mubr.f32.gmra.mrb[238].mxu0 %v2829_v2  ;;  %v2234_v2 = vadd.f32 %v9322_v15, %v8033_v55 }
 0x660   : > { %v5081_v20 = vpop.f32.mrb[190].mxu0  ;;  %3234 = vmatprep.mubr.f32.mxu1 %v9172_v7  ;;  %3491 = vmatprep.mubr.f32.mxu0 %v9172_v7 }
 0x661   : > { %v2749_v57 = vpop.f32.mrb[191].mxu0 }
 0x662   : > { %5974 = vrcp.f32 %v2749_v57 }
 0x663   : > { %3235 = vmatmul.mubr.f32.gmra.mrb[132].mxu1 %v2831_v13  ;;  %3492 = vmatmul.mubr.f32.gmra.mrb[240].mxu0 %v2831_v13  ;;  %5976 = vrcp.f32 %v5081_v20  ;;  %v9323_v20 = vld [vmem:[#allocation14_spill] sm:$0xff] }
 0x664   : > { %v5971_v18 = vpop.eup %5970  ;;  %3240 = vmatprep.mubr.f32.mxu1 %v9172_v7  ;;  %3497 = vmatprep.mubr.f32.mxu0 %v9172_v7  ;;  %v1771_v57 = vadd.f32 %v9323_v20, %v8345_v26 }
 0x665   : > { %v2833_v22 = vmul.f32 %v5971_v18, %v8104_v9  ;;  %v5973_v58 = vpop.eup %5972  ;;  %v9324_v18 = vld [vmem:[#allocation30_spill] sm:$0xff] }
 0x666   : > { %v2835_v37 = vmul.f32 %v5973_v58, %v8108_v33 }
 0x667   : > { %3241 = vmatmul.mubr.f32.gmra.mrb[134].mxu1 %v2833_v22  ;;  %3498 = vmatmul.mubr.f32.gmra.mrb[242].mxu0 %v2833_v22 }
 0x668   : > { %v5084_v53 = vpop.f32.mrb[192].mxu0  ;;  %3246 = vmatprep.mubr.f32.mxu1 %v9172_v7  ;;  %3503 = vmatprep.mubr.f32.mxu0 %v9172_v7 }
 0x669   : > { %v2759_v10 = vpop.f32.mrb[193].mxu0 }
 0x66a   : > { %5978 = vrcp.f32 %v2759_v10 }
 0x66b   : > { %3247 = vmatmul.mubr.f32.gmra.mrb[136].mxu1 %v2835_v37  ;;  %3504 = vmatmul.mubr.f32.gmra.mrb[244].mxu0 %v2835_v37  ;;  %5980 = vrcp.f32 %v5084_v53  ;;  %v9325_v53 = vld [vmem:[#allocation31_spill] sm:$0xff] }
 0x66c   : > { %v5975_v63 = vpop.eup %5974  ;;  %3252 = vmatprep.mubr.f32.mxu1 %v9172_v7  ;;  %3509 = vmatprep.mubr.f32.mxu0 %v9172_v7  ;;  %v1986_v10 = vadd.f32 %v9325_v53, %v8371_v8 }
 0x66d   : > { %v2837_v9 = vmul.f32 %v5975_v63, %v8112_v45  ;;  %v5977_v34 = vpop.eup %5976  ;;  %v9326_v63 = vld [vmem:[#allocation104_spill] sm:$0xff] }
 0x66e   : > { %v2839_v49 = vmul.f32 %v5977_v34, %v8116_v40 }
 0x66f   : > { %3253 = vmatmul.mubr.f32.gmra.mrb[138].mxu1 %v2837_v9  ;;  %3510 = vmatmul.mubr.f32.gmra.mrb[246].mxu0 %v2837_v9  ;;  %v2239_v9 = vadd.f32 %v9326_v63, %v8033_v55 }
 0x670   : > { %v5087_v24 = vpop.f32.mrb[194].mxu0  ;;  %3258 = vmatprep.mubr.f32.mxu1 %v9172_v7  ;;  %3515 = vmatprep.mubr.f32.mxu0 %v9172_v7 }
 0x671   : > { %v2769_v33 = vpop.f32.mrb[195].mxu0 }
 0x672   : > { %5982 = vrcp.f32 %v2769_v33 }
 0x673   : > { %3259 = vmatmul.mubr.f32.gmra.mrb[140].mxu1 %v2839_v49  ;;  %3516 = vmatmul.mubr.f32.gmra.mrb[248].mxu0 %v2839_v49  ;;  %5984 = vrcp.f32 %v5087_v24  ;;  %v9327_v24 = vld [vmem:[#allocation17_spill] sm:$0xff] }
 0x674   : > { %v5979_v46 = vpop.eup %5978  ;;  %3264 = vmatprep.mubr.f32.mxu1 %v9172_v7  ;;  %3521 = vmatprep.mubr.f32.mxu0 %v9172_v7  ;;  %v1777_v33 = vadd.f32 %v9327_v24, %v8345_v26  ;;  %v9337_v24 = vld [vmem:[#allocation106_spill] sm:$0xff] }
 0x675   : > { %v2841_v45 = vmul.f32 %v5979_v46, %v8120_v38  ;;  %v5981_v50 = vpop.eup %5980  ;;  %v9328_v46 = vld [vmem:[#allocation32_spill] sm:$0xff] }
 0x676   : > { %v2843_v17 = vmul.f32 %v5981_v50, %v8124_v42 }
 0x677   : > { %3265 = vmatmul.mubr.f32.gmra.mrb[142].mxu1 %v2841_v45  ;;  %3522 = vmatmul.mubr.f32.gmra.mrb[250].mxu0 %v2841_v45 }
 0x678   : > { %v5090_v32 = vpop.f32.mrb[196].mxu0  ;;  %3270 = vmatprep.mubr.f32.mxu1 %v9172_v7  ;;  %3527 = vmatprep.mubr.f32.mxu0 %v9172_v7 }
 0x679   : > { %v2779_v40 = vpop.f32.mrb[197].mxu0 }
 0x67a   : > { %5986 = vrcp.f32 %v2779_v40 }
 0x67b   : > { %3271 = vmatmul.mubr.f32.gmra.mrb[144].mxu1 %v2843_v17  ;;  %3528 = vmatmul.mubr.f32.gmra.mrb[252].mxu0 %v2843_v17  ;;  %5988 = vrcp.f32 %v5090_v32  ;;  %v9329_v32 = vld [vmem:[#allocation33_spill] sm:$0xff] }
 0x67c   : > { %v5983_v35 = vpop.eup %5982  ;;  %3276 = vmatprep.mubr.f32.mxu1 %v9172_v7  ;;  %3533 = vmatprep.mubr.f32.mxu0 %v9172_v7  ;;  %v1992_v40 = vadd.f32 %v9329_v32, %v8371_v8  ;;  %v9338_v32 = vld [vmem:[#allocation38_spill] sm:$0xff] }
 0x67d   : > { %v2845_v38 = vmul.f32 %v5983_v35, %v8128_v31  ;;  %v5985_v21 = vpop.eup %5984  ;;  %v9330_v35 = vld [vmem:[#allocation102_spill] sm:$0xff] }
 0x67e   : > { %v2847_v42 = vmul.f32 %v5985_v21, %v8131_v12  ;;  %v1717_v12 = vadd.f32 %v7588_v29, %v8345_v26  ;;  %v1741_v29 = vadd.f32 %v7620_v3, %v8345_v26  ;;  %v9316_v3 = vld [vmem:[#allocation27_spill] sm:$0xff]  ;;  %v3718_v21 = vld [vmem:[%s9080_s4 + $0x100] sm:$0xff] }
 0x67f   : > { %3277 = vmatmul.mubr.f32.gmra.mrb[146].mxu1 %v2845_v38  ;;  %3534 = vmatmul.mubr.f32.gmra.mrb[254].mxu0 %v2845_v38  ;;  %v2244_v38 = vadd.f32 %v9330_v35, %v8033_v55 }
 0x680   : > { %3282 = vmatprep.mubr.f32.mxu1 %v9172_v7  ;;  %3539 = vmatprep.mubr.f32.mxu0 %v9172_v7  ;;  %5990 = vtanh.f32 %v1717_v12 }
 0x681   : > { %5992 = vtanh.f32 %v1723_v62  ;;  %v9332_v62 = vld [vmem:[#allocation35_spill] sm:$0xff] }
 0x682   : > { %v1998_v0 = vadd.f32 %v9332_v62, %v8371_v8 }
 0x683   : > { %3283 = vmatmul.mubr.f32.gmra.mrb[148].mxu1 %v2847_v42  ;;  %3540 = vmatmul.mubr.f32.gmra.mrb[0].mxu0 %v2847_v42  ;;  %v3719_v42 = vld [vmem:[%s9080_s4 + $0x108] sm:$0xff] }
 0x684   : > { %v5987_v25 = vpop.eup %5986  ;;  %3288 = vmatprep.mubr.f32.mxu1 %v9172_v7  ;;  %3545 = vmatprep.mubr.f32.mxu0 %v9172_v7 }
 0x685   : > { %v2849_v31 = vmul.f32 %v5987_v25, %v8134_v43  ;;  %v5989_v36 = vpop.eup %5988  ;;  %v1729_v43 = vadd.f32 %v7604_v39, %v8345_v26  ;;  %v9314_v39 = vld [vmem:[#allocation13_spill] sm:$0xff] }
 0x686   : > { %v2851_v30 = vmul.f32 %v5989_v36, %v8137_v14  ;;  %v1753_v41 = vadd.f32 %v9314_v39, %v8345_v26  ;;  %v9315_v14 = vld [vmem:[#allocation12_spill] sm:$0xff] }
 0x687   : > { %3289 = vmatmul.mubr.f32.gmra.mrb[150].mxu1 %v2849_v31  ;;  %3546 = vmatmul.mubr.f32.gmra.mrb[2].mxu0 %v2849_v31  ;;  %5994 = vtanh.f32 %v1729_v43  ;;  %v1759_v4 = vadd.f32 %v9315_v14, %v8345_v26  ;;  %v5452_v14 = vpack.c.bf16 %v3719_v42, %v3718_v21  ;;  %v9339_v21 = vld [vmem:[#allocation39_spill] sm:$0xff] }
 0x688   : > { %3294 = vmatprep.mubr.f32.mxu1 %v9172_v7  ;;  %3551 = vmatprep.mubr.f32.mxu0 %v9172_v7  ;;  %v8366_v7 = vrot.slane %v7575_v19, %v1633_v6  ;;  %5996 = vtanh.f32 %v1735_v61  ;;  %v9318_v19 = vld [vmem:[#allocation100_spill] sm:$0xff]  ;;  %v2010_v42 = vadd.f32 %v9339_v21, %v8371_v8 }
 0x689   : > { %5998 = vtanh.f32 %v1741_v29  ;;  %v2229_v44 = vadd.f32 %v9318_v19, %v8033_v55 }
 0x68a   : > { %v1972_v56 = vadd.f32 %v9316_v3, %v8366_v7  ;;  %6000 = vtanh.f32 %v1747_v23  ;;  %v1978_v16 = vadd.f32 %v9320_v52, %v8366_v7  ;;  %v5991_v60 = vpop.eup %5990  ;;  %v1984_v22 = vadd.f32 %v9324_v18, %v8366_v7  ;;  %v9333_v3 = vld [vmem:[#allocation107_spill] sm:$0xff]  ;;  %v9336_v18 = vld [vmem:[#allocation37_spill] sm:$0xff] }
 0x68b   : > { %3295 = vmatmul.mubr.f32.gmra.mrb[152].mxu1 %v2851_v30  ;;  %3552 = vmatmul.mubr.f32.gmra.mrb[4].mxu0 %v2851_v30  ;;  %6002 = vtanh.f32 %v1753_v41  ;;  %v5993_v59 = vpop.eup %5992  ;;  %v1990_v45 = vadd.f32 %v9328_v46, %v8366_v7  ;;  %v1996_v31 = vadd.f32 %v9331_v28, %v8366_v7  ;;  %v3723_v46 = vld [vmem:[%s9080_s4 + $0x128] sm:$0xff] }
 0x68c   : > { %6004 = vtanh.f32 %v1759_v4 }
 0x68d   : > { %6006 = vtanh.f32 %v1972_v56  ;;  %v2249_v56 = vadd.f32 %v9333_v3, %v8033_v55 }
 0x68e   : > { %6008 = vtanh.f32 %v1974_v48  ;;  %v3721_v48 = vld [vmem:[%s9080_s4 + $0x118] sm:$0xff] }
 0x68f   : > { %6010 = vtanh.f32 %v2229_v44  ;;  %v9334_v44 = vld [vmem:[#allocation16_spill] sm:$0xff]  ;;  %v5455_v63 = vpack.c.bf16 %v3721_v48, %v3720_v11 }
 0x690   : > { %6012 = vtanh.f32 %v1765_v27  ;;  %v1783_v54 = vadd.f32 %v9334_v44, %v8345_v26 }
 0x691   : > { %v8393_v13 = vpop.eup %5994  ;;  %6014 = vtanh.f32 %v1978_v16 }
 0x692   : > { %v8397_v58 = vpop.eup %5996  ;;  %6016 = vtanh.f32 %v1980_v1  ;;  %v2002_v1 = vadd.f32 %v9335_v5, %v8366_v7 }
 0x693   : > { %v8401_v37 = vpop.eup %5998  ;;  %6018 = vtanh.f32 %v2234_v2 }
 0x694   : > { %v8405_v34 = vpop.eup %6000  ;;  %6020 = vtanh.f32 %v1771_v57 }
 0x695   : > { %v8409_v49 = vpop.eup %6002  ;;  %6022 = vtanh.f32 %v1984_v22  ;;  %v2004_v22 = vadd.f32 %v9336_v18, %v8371_v8 }
 0x696   : > { %v8413_v50 = vpop.eup %6004  ;;  %6024 = vtanh.f32 %v1986_v10 }
 0x697   : > { %v6007_v17 = vpop.eup %6006  ;;  %6026 = vtanh.f32 %v2239_v9 }
 0x698   : > { %v6009_v25 = vpop.eup %6008  ;;  %6028 = vtanh.f32 %v1777_v33  ;;  %v2254_v33 = vadd.f32 %v9337_v24, %v8033_v55  ;;  %v9345_v24 = vld [vmem:[#allocation42_spill] sm:$0xff] }
 0x699   : > { %v6011_v6 = vpop.eup %6010  ;;  %6030 = vtanh.f32 %v1990_v45 }
 0x69a   : > { %v8431_v23 = vpop.eup %6012  ;;  %6032 = vtanh.f32 %v1992_v40  ;;  %v2008_v40 = vadd.f32 %v9338_v32, %v8366_v7  ;;  %v9346_v32 = vld [vmem:[#allocation43_spill] sm:$0xff] }
 0x69b   : > { %v6015_v4 = vpop.eup %6014  ;;  %6034 = vtanh.f32 %v2244_v38 }
 0x69c   : > { %v6017_v19 = vpop.eup %6016  ;;  %6036 = vtanh.f32 %v1996_v31 }
 0x69d   : > { %v6019_v16 = vpop.eup %6018  ;;  %6038 = vtanh.f32 %v1998_v0 }
 0x69e   : > { %v8449_v57 = vpop.eup %6020  ;;  %6040 = vtanh.f32 %v2249_v56 }
 0x69f   : > { %v3110_v36 = vpop.f32.mrb[90].mxu1  ;;  %v3367_v12 = vpop.f32.mrb[198].mxu0  ;;  %6042 = vtanh.f32 %v1783_v54 }
 0x6a0   : > { %v3558_v30 = vmul.f32 %v5991_v60, %v3110_v36  ;;  %v8429_v43 = vmul.f32 %v6009_v25, %v3367_v12  ;;  %v3112_v61 = vpop.f32.mrb[91].mxu1  ;;  %v3369_v29 = vpop.f32.mrb[199].mxu0  ;;  %6044 = vtanh.f32 %v2002_v1  ;;  %v9343_v1 = vld [vmem:[#allocation41_spill] sm:$0xff] }
 0x6a1   : > { %v3559_v39 = vmul.f32 %v6007_v17, %v3112_v61  ;;  %v8433_v41 = vmul.f32 %v6011_v6, %v3369_v29  ;;  %v6023_v9 = vpop.eup %6022  ;;  %6046 = vtanh.f32 %v2004_v22  ;;  %v9340_v61 = vld [vmem:[#allocation109_spill] sm:$0xff] }
 0x6a2   : > { %v6025_v45 = vpop.eup %6024  ;;  %6048 = vtanh.f32 %v2254_v33  ;;  %v2259_v29 = vadd.f32 %v9340_v61, %v8033_v55  ;;  %v2020_v33 = vadd.f32 %v9345_v24, %v8366_v7  ;;  %v3729_v61 = vld [vmem:[%s9080_s4 + $0x158] sm:$0xff] }
 0x6a3   : > { %v3116_v27 = vpop.f32.mrb[92].mxu1  ;;  %v3373_v52 = vpop.f32.mrb[200].mxu0  ;;  %3814 = vmatprep.mubr.f32.mxu1 %v3559_v39  ;;  %v3725_v39 = vld [vmem:[%s9080_s4 + $0x138] sm:$0xff]  ;;  %6050 = vtanh.f32 %v2008_v40  ;;  %v2022_v40 = vadd.f32 %v9346_v32, %v8371_v8 }
 0x6a4   : > { %v3562_v60 = vmul.f32 %v5993_v59, %v3116_v27  ;;  %v8447_v15 = vmul.f32 %v6017_v19, %v3373_v52  ;;  %v3118_v2 = vpop.f32.mrb[93].mxu1  ;;  %v3375_v20 = vpop.f32.mrb[201].mxu0  ;;  %3815 = vmatmul.mubr.f32.vlgmr.msra.gmra.mrb[154].mxu1 %v3558_v30  ;;  %v3722_v59 = vld [vmem:[%s9080_s4 + $0x120] sm:$0xff]  ;;  %6052 = vtanh.f32 %v2010_v42  ;;  %v9342_v19 = vld [vmem:[#allocation40_spill] sm:$0xff] }
 0x6a5   : > { %v3563_v53 = vmul.f32 %v6015_v4, %v3118_v2  ;;  %v8453_v10 = vmul.f32 %v6019_v16, %v3375_v20  ;;  %5453 = vmatpush1.bf16.msra.mxu1 %v5452_v14  ;;  %v6027_v38 = vpop.eup %6026  ;;  %v5458_v0 = vpack.c.bf16 %v3723_v46, %v3722_v59  ;;  %v9341_v4 = vld [vmem:[#allocation19_spill] sm:$0xff]  ;;  %v2014_v44 = vadd.f32 %v9342_v19, %v8366_v7 }
 0x6a6   : > { %5454 = vmatprep.subr.bf16.mxu1 %v6456_v51  ;;  %v8471_v12 = vpop.eup %6028  ;;  %v1789_v3 = vadd.f32 %v9341_v4, %v8345_v26  ;;  %6054 = vtanh.f32 %v2259_v29 }
 0x6a7   : > { %v3122_v17 = vpop.f32.mrb[94].mxu1  ;;  %v3379_v35 = vpop.f32.mrb[202].mxu0  ;;  %3819 = vmatprep.mubr.f32.mxu1 %v3563_v53  ;;  %v9344_v53 = vld [vmem:[#allocation108_spill] sm:$0xff] }
 0x6a8   : > { %v3566_v25 = vmul.f32 %v8393_v13, %v3122_v17  ;;  %v8469_v28 = vmul.f32 %v6025_v45, %v3379_v35  ;;  %v3124_v31 = vpop.f32.mrb[95].mxu1  ;;  %v3381_v36 = vpop.f32.mrb[203].mxu0  ;;  %3820 = vmatmul.mubr.f32.gmra.mrb[156].mxu1 %v3562_v60  ;;  %v3724_v13 = vld [vmem:[%s9080_s4 + $0x130] sm:$0xff]  ;;  %v2016_v60 = vadd.f32 %v9343_v1, %v8371_v8  ;;  %6056 = vtanh.f32 %v1789_v3 }
 0x6a9   : > { %v3567_v6 = vmul.f32 %v6023_v9, %v3124_v31  ;;  %v8473_v62 = vmul.f32 %v6027_v38, %v3381_v36  ;;  %5456 = vmatpush1.bf16.msra.mxu1 %v5455_v63  ;;  %v6031_v30 = vpop.eup %6030  ;;  %v5461_v18 = vpack.c.bf16 %v3725_v39, %v3724_v13  ;;  %v2264_v63 = vadd.f32 %v9344_v53, %v8033_v55  ;;  %v3727_v9 = vld [vmem:[%s9080_s4 + $0x148] sm:$0xff] }
 0x6aa   : > { %5457 = vmatprep.subr.bf16.mxu1 %v6456_v51  ;;  %v6033_v14 = vpop.eup %6032  ;;  %6058 = vtanh.f32 %v2014_v44  ;;  %v9348_v13 = vld [vmem:[#allocation18_spill] sm:$0xff] }
 0x6ab   : > { %v3128_v56 = vpop.f32.mrb[96].mxu1  ;;  %v3385_v11 = vpop.f32.mrb[204].mxu0  ;;  %3824 = vmatprep.mubr.f32.mxu1 %v3567_v6  ;;  %6060 = vtanh.f32 %v2016_v60  ;;  %v1795_v39 = vadd.f32 %v9348_v13, %v8345_v26  ;;  %v9355_v13 = vld [vmem:[#allocation21_spill] sm:$0xff] }
 0x6ac   : > { %v6035_v48 = vpop.eup %6034  ;;  %v3570_v54 = vmul.f32 %v8397_v58, %v3128_v56  ;;  %v8489_v27 = vmul.f32 %v6033_v14, %v3385_v11  ;;  %v3130_v52 = vpop.f32.mrb[97].mxu1  ;;  %3825 = vmatmul.mubr.f32.gmra.mrb[158].mxu1 %v3566_v25  ;;  %v3726_v58 = vld [vmem:[%s9080_s4 + $0x140] sm:$0xff]  ;;  %6062 = vtanh.f32 %v2264_v63  ;;  %v9349_v56 = vld [vmem:[#allocation44_spill] sm:$0xff]  ;;  %v3731_v63 = vld [vmem:[%s9080_s4 + $0x168] sm:$0xff] }
 0x6ad   : > { %v3387_v16 = vpop.f32.mrb[205].mxu0  ;;  %v6037_v5 = vpop.eup %6036  ;;  %v3571_v2 = vmul.f32 %v6031_v30, %v3130_v52  ;;  %5459 = vmatpush1.bf16.msra.mxu1 %v5458_v0  ;;  %v5464_v36 = vpack.c.bf16 %v3727_v9, %v3726_v58  ;;  %v9347_v0 = vld [vmem:[#allocation111_spill] sm:$0xff]  ;;  %6064 = vtanh.f32 %v2020_v33  ;;  %v2026_v11 = vadd.f32 %v9349_v56, %v8366_v7  ;;  %v9352_v58 = vld [vmem:[#allocation46_spill] sm:$0xff]  ;;  %v9356_v56 = vld [vmem:[#allocation48_spill] sm:$0xff] }
 0x6ae   : > { %v8493_v20 = vmul.f32 %v6035_v48, %v3387_v16  ;;  %v6039_v22 = vpop.eup %6038  ;;  %5460 = vmatprep.subr.bf16.mxu1 %v6456_v51  ;;  %v2269_v30 = vadd.f32 %v9347_v0, %v8033_v55  ;;  %6066 = vtanh.f32 %v2022_v40  ;;  %v9350_v16 = vld [vmem:[#allocation45_spill] sm:$0xff]  ;;  %v2032_v9 = vadd.f32 %v9352_v58, %v8366_v7  ;;  %v3735_v58 = vld [vmem:[%s9080_s4 + $0x188] sm:$0xff] }
 0x6af   : > { %v3134_v59 = vpop.f32.mrb[98].mxu1  ;;  %v3391_v46 = vpop.f32.mrb[206].mxu0  ;;  %3829 = vmatprep.mubr.f32.mxu1 %v3571_v2 }
 0x6b0   : > { %v6041_v45 = vpop.eup %6040  ;;  %v3574_v17 = vmul.f32 %v8401_v37, %v3134_v59  ;;  %v8509_v35 = vmul.f32 %v6039_v22, %v3391_v46  ;;  %v3136_v38 = vpop.f32.mrb[99].mxu1  ;;  %3830 = vmatmul.mubr.f32.gmra.mrb[160].mxu1 %v3570_v54  ;;  %v3728_v37 = vld [vmem:[%s9080_s4 + $0x150] sm:$0xff]  ;;  %v9351_v22 = vld [vmem:[#allocation110_spill] sm:$0xff]  ;;  %6068 = vtanh.f32 %v2269_v30  ;;  %v9354_v30 = vld [vmem:[#allocation113_spill] sm:$0xff] }
 0x6b1   : > { %v3393_v21 = vpop.f32.mrb[207].mxu0  ;;  %v8511_v42 = vpop.eup %6042  ;;  %v3575_v25 = vmul.f32 %v6037_v5, %v3136_v38  ;;  %5462 = vmatpush1.bf16.msra.mxu1 %v5461_v18  ;;  %v2028_v5 = vadd.f32 %v9350_v16, %v8371_v8  ;;  %v5467_v2 = vpack.c.bf16 %v3729_v61, %v3728_v37  ;;  %v2274_v53 = vadd.f32 %v9351_v22, %v8033_v55  ;;  %v9353_v46 = vld [vmem:[#allocation47_spill] sm:$0xff]  ;;  %v3733_v61 = vld [vmem:[%s9080_s4 + $0x178] sm:$0xff] }
 0x6b2   : > { %v8513_v31 = vmul.f32 %v6041_v45, %v3393_v21  ;;  %v6045_v6 = vpop.eup %6044  ;;  %5463 = vmatprep.subr.bf16.mxu1 %v6456_v51  ;;  %6070 = vtanh.f32 %v1795_v39  ;;  %v2034_v45 = vadd.f32 %v9353_v46, %v8371_v8  ;;  %v2279_v37 = vadd.f32 %v9354_v30, %v8033_v55 }
 0x6b3   : > { %v6047_v29 = vpop.eup %6046  ;;  %v3140_v14 = vpop.f32.mrb[100].mxu1  ;;  %3834 = vmatprep.mubr.f32.mxu1 %v3575_v25  ;;  %6072 = vtanh.f32 %v2026_v11  ;;  %v1801_v39 = vadd.f32 %v9355_v13, %v8345_v26  ;;  %v2038_v11 = vadd.f32 %v9356_v56, %v8366_v7 }
 0x6b4   : > { %v3397_v4 = vpop.f32.mrb[208].mxu0  ;;  %v6049_v3 = vpop.eup %6048  ;;  %v3578_v48 = vmul.f32 %v8405_v34, %v3140_v14  ;;  %3835 = vmatmul.mubr.f32.gmra.mrb[162].mxu1 %v3574_v17  ;;  %v3730_v34 = vld [vmem:[%s9080_s4 + $0x160] sm:$0xff]  ;;  %6074 = vtanh.f32 %v2028_v5 }
 0x6b5   : > { %v8529_v19 = vmul.f32 %v6047_v29, %v3397_v4  ;;  %v3142_v44 = vpop.f32.mrb[101].mxu1  ;;  %v3399_v54 = vpop.f32.mrb[209].mxu0  ;;  %5465 = vmatpush1.bf16.msra.mxu1 %v5464_v36  ;;  %6076 = vtanh.f32 %v2274_v53  ;;  %v9357_v5 = vld [vmem:[#allocation49_spill] sm:$0xff] }
 0x6b6   : > { %v6051_v52 = vpop.eup %6050  ;;  %v3579_v1 = vmul.f32 %v6045_v6, %v3142_v44  ;;  %v8533_v60 = vmul.f32 %v6049_v3, %v3399_v54  ;;  %5466 = vmatprep.subr.bf16.mxu1 %v6456_v51  ;;  %v5470_v6 = vpack.c.bf16 %v3731_v63, %v3730_v34  ;;  %6078 = vtanh.f32 %v2032_v9  ;;  %v9358_v34 = vld [vmem:[#allocation112_spill] sm:$0xff]  ;;  %v9359_v9 = vld [vmem:[#allocation50_spill] sm:$0xff] }
 0x6b7   : > { %v6053_v18 = vpop.eup %6052  ;;  %v3146_v24 = vpop.f32.mrb[102].mxu1  ;;  %6080 = vtanh.f32 %v2034_v45  ;;  %v2284_v63 = vadd.f32 %v9358_v34, %v8033_v55  ;;  %v9360_v45 = vld [vmem:[#allocation51_spill] sm:$0xff] }
 0x6b8   : > { %v3403_v33 = vpop.f32.mrb[210].mxu0  ;;  %3839 = vmatprep.mubr.f32.mxu1 %v3579_v1  ;;  %v6055_v59 = vpop.eup %6054  ;;  %v3582_v32 = vmul.f32 %v8409_v49, %v3146_v24  ;;  %v3732_v49 = vld [vmem:[%s9080_s4 + $0x170] sm:$0xff]  ;;  %v2040_v1 = vadd.f32 %v9357_v5, %v8371_v8  ;;  %6082 = vtanh.f32 %v2279_v37  ;;  %v2044_v24 = vadd.f32 %v9359_v9, %v8366_v7 }
 0x6b9   : > { %v8549_v40 = vmul.f32 %v6053_v18, %v3403_v33  ;;  %v3148_v17 = vpop.f32.mrb[103].mxu1  ;;  %v3405_v38 = vpop.f32.mrb[211].mxu0  ;;  %3840 = vmatmul.mubr.f32.gmra.mrb[164].mxu1 %v3578_v48  ;;  %v5473_v22 = vpack.c.bf16 %v3733_v61, %v3732_v49  ;;  %6084 = vtanh.f32 %v1801_v39  ;;  %v3737_v39 = vld [vmem:[%s9080_s4 + $0x198] sm:$0xff] }
 0x6ba   : > { %v8551_v21 = vpop.eup %6056  ;;  %v3583_v25 = vmul.f32 %v6051_v52, %v3148_v17  ;;  %v8553_v36 = vmul.f32 %v6055_v59, %v3405_v38  ;;  %5468 = vmatpush1.bf16.msra.mxu1 %v5467_v2  ;;  %6086 = vtanh.f32 %v2038_v11 }
 0x6bb   : > { %v6059_v0 = vpop.eup %6058  ;;  %5469 = vmatprep.subr.bf16.mxu1 %v6456_v51  ;;  %v3152_v14 = vpop.f32.mrb[104].mxu1  ;;  %6088 = vtanh.f32 %v2040_v1 }
 0x6bc   : > { %v6061_v29 = vpop.eup %6060  ;;  %v3409_v4 = vpop.f32.mrb[212].mxu0  ;;  %3844 = vmatprep.mubr.f32.mxu1 %v3583_v25  ;;  %v3586_v48 = vmul.f32 %v8413_v50, %v3152_v14  ;;  %v3734_v50 = vld [vmem:[%s9080_s4 + $0x180] sm:$0xff]  ;;  %6090 = vtanh.f32 %v2284_v63 }
 0x6bd   : > { %v6063_v3 = vpop.eup %6062  ;;  %v8569_v44 = vmul.f32 %v6061_v29, %v3409_v4  ;;  %v3154_v54 = vpop.f32.mrb[105].mxu1  ;;  %3845 = vmatmul.mubr.f32.gmra.mrb[166].mxu1 %v3582_v32  ;;  %v2046_v32 = vadd.f32 %v9360_v45, %v8371_v8  ;;  %v5476_v49 = vpack.c.bf16 %v3735_v58, %v3734_v50  ;;  %v9361_v29 = vld [vmem:[#allocation115_spill] sm:$0xff]  ;;  %v9362_v4 = vld [vmem:[#allocation20_spill] sm:$0xff]  ;;  %6092 = vtanh.f32 %v2044_v24  ;;  %v9365_v24 = vld [vmem:[#allocation114_spill] sm:$0xff] }
 0x6be   : > { %v3411_v52 = vpop.f32.mrb[213].mxu0  ;;  %v6065_v16 = vpop.eup %6064  ;;  %v3587_v2 = vmul.f32 %v6059_v0, %v3154_v54  ;;  %5471 = vmatpush1.bf16.msra.mxu1 %v5470_v6  ;;  %v2289_v13 = vadd.f32 %v9361_v29, %v8033_v55  ;;  %v9363_v54 = vld [vmem:[#allocation52_spill] sm:$0xff] }
 0x6bf   : > { %v8573_v18 = vmul.f32 %v6063_v3, %v3411_v52  ;;  %v6067_v53 = vpop.eup %6066  ;;  %5472 = vmatprep.subr.bf16.mxu1 %v6456_v51  ;;  %v3158_v33 = vpop.f32.mrb[106].mxu1  ;;  %v1807_v3 = vadd.f32 %v9362_v4, %v8345_v26  ;;  %6094 = vtanh.f32 %v2046_v32  ;;  %v2050_v52 = vadd.f32 %v9363_v54, %v8366_v7 }
 0x6c0   : > { %v3415_v59 = vpop.f32.mrb[214].mxu0  ;;  %3849 = vmatprep.mubr.f32.mxu1 %v3587_v2  ;;  %v6069_v46 = vpop.eup %6068  ;;  %v3590_v17 = vmul.f32 %v8431_v23, %v3158_v33  ;;  %v3736_v23 = vld [vmem:[%s9080_s4 + $0x190] sm:$0xff]  ;;  %v2294_v33 = vadd.f32 %v9365_v24, %v8033_v55  ;;  %6096 = vtanh.f32 %v2289_v13 }
 0x6c1   : > { %v8589_v38 = vmul.f32 %v6067_v53, %v3415_v59  ;;  %v3160_v25 = vpop.f32.mrb[107].mxu1  ;;  %v3417_v6 = vpop.f32.mrb[215].mxu0  ;;  %3850 = vmatmul.mubr.f32.gmra.mrb[168].mxu1 %v3586_v48  ;;  %v9364_v53 = vld [vmem:[#allocation53_spill] sm:$0xff]  ;;  %v5479_v58 = vpack.c.bf16 %v3737_v39, %v3736_v23  ;;  %v3739_v59 = vld [vmem:[%s9080_s4 + $0x1a8] sm:$0xff]  ;;  %6098 = vtanh.f32 %v1807_v3 }
 0x6c2   : > { %v8591_v0 = vpop.eup %6070  ;;  %v3591_v30 = vmul.f32 %v6065_v16, %v3160_v25  ;;  %v8593_v37 = vmul.f32 %v6069_v46, %v3417_v6  ;;  %5474 = vmatpush1.bf16.msra.mxu1 %v5473_v22  ;;  %v2052_v34 = vadd.f32 %v9364_v53, %v8371_v8  ;;  %v9366_v46 = vld [vmem:[#allocation23_spill] sm:$0xff]  ;;  %6100 = vtanh.f32 %v2050_v52  ;;  %v9367_v6 = vld [vmem:[#allocation54_spill] sm:$0xff]  ;;  %v9369_v52 = vld [vmem:[#allocation117_spill] sm:$0xff] }
 0x6c3   : > { %v6073_v61 = vpop.eup %6072  ;;  %5475 = vmatprep.subr.bf16.mxu1 %v6456_v51  ;;  %v3164_v56 = vpop.f32.mrb[108].mxu1  ;;  %v1813_v45 = vadd.f32 %v9366_v46, %v8345_v26  ;;  %v9370_v53 = vld [vmem:[#allocation22_spill] sm:$0xff] }
 0x6c4   : > { %v6075_v14 = vpop.eup %6074  ;;  %v3421_v11 = vpop.f32.mrb[216].mxu0  ;;  %3854 = vmatprep.mubr.f32.mxu1 %v3591_v30  ;;  %v3594_v16 = vmul.f32 %v8449_v57, %v3164_v56  ;;  %v3738_v57 = vld [vmem:[%s9080_s4 + $0x1a0] sm:$0xff]  ;;  %v2056_v30 = vadd.f32 %v9367_v6, %v8366_v7  ;;  %6102 = vtanh.f32 %v2052_v34  ;;  %v9368_v56 = vld [vmem:[#allocation55_spill] sm:$0xff]  ;;  %v1819_v34 = vadd.f32 %v9370_v53, %v8345_v26 }
 0x6c5   : > { %v6077_v48 = vpop.eup %6076  ;;  %v8609_v5 = vmul.f32 %v6075_v14, %v3421_v11  ;;  %v3166_v1 = vpop.f32.mrb[109].mxu1  ;;  %3855 = vmatmul.mubr.f32.gmra.mrb[170].mxu1 %v3590_v17  ;;  %v5482_v4 = vpack.c.bf16 %v3739_v59, %v3738_v57  ;;  %v2058_v11 = vadd.f32 %v9368_v56, %v8371_v8  ;;  %6104 = vtanh.f32 %v2294_v33  ;;  %v9371_v57 = vld [vmem:[#allocation56_spill] sm:$0xff] }
 0x6c6   : > { %v3423_v2 = vpop.f32.mrb[217].mxu0  ;;  %v6079_v22 = vpop.eup %6078  ;;  %v3595_v63 = vmul.f32 %v6073_v61, %v3166_v1  ;;  %5477 = vmatpush1.bf16.msra.mxu1 %v5476_v49  ;;  %6106 = vtanh.f32 %v1813_v45  ;;  %v2062_v59 = vadd.f32 %v9371_v57, %v8366_v7  ;;  %v9376_v57 = vld [vmem:[#allocation60_spill] sm:$0xff] }
 0x6c7   : > { %v8613_v50 = vmul.f32 %v6077_v48, %v3423_v2  ;;  %v6081_v9 = vpop.eup %6080  ;;  %5478 = vmatprep.subr.bf16.mxu1 %v6456_v51  ;;  %v3170_v32 = vpop.f32.mrb[110].mxu1  ;;  %v3741_v48 = vld [vmem:[%s9080_s4 + $0x1b8] sm:$0xff]  ;;  %6108 = vtanh.f32 %v2056_v30  ;;  %v3743_v30 = vld [vmem:[%s9080_s4 + $0x1c8] sm:$0xff] }
 0x6c8   : > { %v3427_v17 = vpop.f32.mrb[218].mxu0  ;;  %3859 = vmatprep.mubr.f32.mxu1 %v3595_v63  ;;  %v6083_v25 = vpop.eup %6082  ;;  %v3598_v49 = vmul.f32 %v8471_v12, %v3170_v32  ;;  %v3740_v12 = vld [vmem:[%s9080_s4 + $0x1b0] sm:$0xff]  ;;  %6110 = vtanh.f32 %v2058_v11 }
 0x6c9   : > { %v8629_v61 = vmul.f32 %v6081_v9, %v3427_v17  ;;  %v3172_v29 = vpop.f32.mrb[111].mxu1  ;;  %v3429_v13 = vpop.f32.mrb[219].mxu0  ;;  %3860 = vmatmul.mubr.f32.gmra.mrb[172].mxu1 %v3594_v16  ;;  %v2299_v16 = vadd.f32 %v9369_v52, %v8033_v55  ;;  %v5485_v32 = vpack.c.bf16 %v3741_v48, %v3740_v12 }
 0x6ca   : > { %v8631_v23 = vpop.eup %6084  ;;  %v3599_v39 = vmul.f32 %v6079_v22, %v3172_v29  ;;  %v8633_v14 = vmul.f32 %v6083_v25, %v3429_v13  ;;  %5480 = vmatpush1.bf16.msra.mxu1 %v5479_v58  ;;  %v9372_v25 = vld [vmem:[#allocation57_spill] sm:$0xff] }
 0x6cb   : > { %v6087_v3 = vpop.eup %6086  ;;  %5481 = vmatprep.subr.bf16.mxu1 %v6456_v51  ;;  %v3176_v1 = vpop.f32.mrb[112].mxu1  ;;  %v2064_v6 = vadd.f32 %v9372_v25, %v8371_v8  ;;  %6112 = vtanh.f32 %v2299_v16 }
 0x6cc   : > { %v6089_v54 = vpop.eup %6088  ;;  %v3433_v2 = vpop.f32.mrb[220].mxu0  ;;  %3864 = vmatprep.mubr.f32.mxu1 %v3599_v39  ;;  %v3602_v63 = vmul.f32 %v8511_v42, %v3176_v1  ;;  %v3742_v42 = vld [vmem:[%s9080_s4 + $0x1c0] sm:$0xff]  ;;  %6114 = vtanh.f32 %v1819_v34  ;;  %v3745_v34 = vld [vmem:[%s9080_s4 + $0x1d8] sm:$0xff] }
 0x6cd   : > { %v6091_v22 = vpop.eup %6090  ;;  %v8649_v58 = vmul.f32 %v6089_v54, %v3433_v2  ;;  %v3178_v9 = vpop.f32.mrb[113].mxu1  ;;  %3865 = vmatmul.mubr.f32.gmra.mrb[174].mxu1 %v3598_v49  ;;  %v9373_v49 = vld [vmem:[#allocation116_spill] sm:$0xff]  ;;  %6116 = vtanh.f32 %v2062_v59  ;;  %v5488_v1 = vpack.c.bf16 %v3743_v30, %v3742_v42  ;;  %v2074_v59 = vadd.f32 %v9376_v57, %v8366_v7  ;;  %v9377_v42 = vld [vmem:[#allocation61_spill] sm:$0xff] }
 0x6ce   : > { %v3435_v24 = vpop.f32.mrb[221].mxu0  ;;  %v6093_v33 = vpop.eup %6092  ;;  %v3603_v46 = vmul.f32 %v6087_v3, %v3178_v9  ;;  %5483 = vmatpush1.bf16.msra.mxu1 %v5482_v4  ;;  %v2304_v29 = vadd.f32 %v9373_v49, %v8033_v55  ;;  %v9374_v3 = vld [vmem:[#allocation58_spill] sm:$0xff]  ;;  %6118 = vtanh.f32 %v2064_v6  ;;  %v2076_v30 = vadd.f32 %v9377_v42, %v8371_v8 }
 0x6cf   : > { %v8653_v45 = vmul.f32 %v6091_v22, %v3435_v24  ;;  %v6095_v17 = vpop.eup %6094  ;;  %5484 = vmatprep.subr.bf16.mxu1 %v6456_v51  ;;  %v3182_v13 = vpop.f32.mrb[114].mxu1  ;;  %v2068_v56 = vadd.f32 %v9374_v3, %v8366_v7  ;;  %v9375_v22 = vld [vmem:[#allocation59_spill] sm:$0xff]  ;;  %v9379_v3 = vld [vmem:[#allocation24_spill] sm:$0xff] }
 0x6d0   : > { %v3439_v39 = vpop.f32.mrb[222].mxu0  ;;  %3869 = vmatprep.mubr.f32.mxu1 %v3603_v46  ;;  %v6097_v4 = vpop.eup %6096  ;;  %v3606_v11 = vmul.f32 %v8551_v21, %v3182_v13  ;;  %v2070_v53 = vadd.f32 %v9375_v22, %v8371_v8  ;;  %v3744_v21 = vld [vmem:[%s9080_s4 + $0x1d0] sm:$0xff]  ;;  %6120 = vtanh.f32 %v2304_v29 }
 0x6d1   : > { %v8669_v12 = vmul.f32 %v6095_v17, %v3439_v39  ;;  %v3184_v48 = vpop.f32.mrb[115].mxu1  ;;  %v3441_v54 = vpop.f32.mrb[223].mxu0  ;;  %3870 = vmatmul.mubr.f32.gmra.mrb[176].mxu1 %v3602_v63  ;;  %6122 = vtanh.f32 %v2068_v56  ;;  %v5491_v13 = vpack.c.bf16 %v3745_v34, %v3744_v21  ;;  %v1825_v56 = vadd.f32 %v9379_v3, %v8345_v26 }
 0x6d2   : > { %v8671_v52 = vpop.eup %6098  ;;  %v3607_v55 = vmul.f32 %v6093_v33, %v3184_v48  ;;  %v8673_v16 = vmul.f32 %v6097_v4, %v3441_v54  ;;  %5486 = vmatpush1.bf16.msra.mxu1 %v5485_v32  ;;  %6124 = vtanh.f32 %v2070_v53  ;;  %v3746_v54 = vld [vmem:[%s9080_s4 + $0x1e0] sm:$0xff] }
 0x6d3   : > { %v6101_v2 = vpop.eup %6100  ;;  %5487 = vmatprep.subr.bf16.mxu1 %v6456_v51  ;;  %v3188_v9 = vpop.f32.mrb[116].mxu1 }
 0x6d4   : > { %v6103_v63 = vpop.eup %6102  ;;  %v3445_v24 = vpop.f32.mrb[224].mxu0  ;;  %3874 = vmatprep.mubr.f32.mxu1 %v3607_v55  ;;  %v3610_v46 = vmul.f32 %v8591_v0, %v3188_v9  ;;  %v9378_v0 = vld [vmem:[#allocation119_spill] sm:$0xff]  ;;  %v3747_v55 = vld [vmem:[%s9080_s4 + $0x1e8] sm:$0xff] }
 0x6d5   : > { %v6105_v33 = vpop.eup %6104  ;;  %v8687_v32 = vmul.f32 %v6103_v63, %v3445_v24  ;;  %v3190_v17 = vpop.f32.mrb[117].mxu1  ;;  %3875 = vmatmul.mubr.f32.gmra.mrb[178].mxu1 %v3606_v11  ;;  %6126 = vtanh.f32 %v9378_v0  ;;  %v9381_v24 = vld [vmem:[#allocation64_spill] sm:$0xff] }
 0x6d6   : > { %v3447_v25 = vpop.f32.mrb[225].mxu0  ;;  %v8689_v6 = vpop.eup %6106  ;;  %v3611_v49 = vmul.f32 %v6101_v2, %v3190_v17  ;;  %5489 = vmatpush1.bf16.msra.mxu1 %v5488_v1  ;;  %6128 = vtanh.f32 %v2074_v59  ;;  %v9380_v2 = vld [vmem:[#allocation63_spill] sm:$0xff] }
 0x6d7   : > { %v8693_v29 = vmul.f32 %v6105_v33, %v3447_v25  ;;  %v6109_v39 = vpop.eup %6108  ;;  %5490 = vmatprep.subr.bf16.mxu1 %v6456_v51  ;;  %v3194_v11 = vpop.f32.mrb[118].mxu1  ;;  %6130 = vtanh.f32 %v2076_v30  ;;  %v2080_v22 = vadd.f32 %v9380_v2, %v8366_v7  ;;  %v2082_v33 = vadd.f32 %v9381_v24, %v8371_v8  ;;  %v9382_v25 = vld [vmem:[#allocation118_spill] sm:$0xff] }
 0x6d8   : > { %3879 = vmatprep.mubr.f32.mxu1 %v3611_v49  ;;  %v6111_v4 = vpop.eup %6110  ;;  %v3451_v48 = vpop.f32.mrb[226].mxu0  ;;  %v3614_v53 = vmul.f32 %v8631_v23, %v3194_v11  ;;  %6132 = vtanh.f32 %v9382_v25  ;;  %v9383_v23 = vld [vmem:[#allocation25_spill] sm:$0xff] }
 0x6d9   : > { %3880 = vmatmul.mubr.f32.gmra.mrb[180].mxu1 %v3610_v46  ;;  %v6113_v1 = vpop.eup %6112  ;;  %v8708_v21 = vmul.f32 %v6111_v4, %v3451_v48  ;;  %v3196_v34 = vpop.f32.mrb[119].mxu1  ;;  %v5494_v46 = vpack.c.bf16 %v3747_v55, %v3746_v54  ;;  %v1831_v30 = vadd.f32 %v9383_v23, %v8345_v26  ;;  %6134 = vtanh.f32 %v1825_v56 }
 0x6da   : > { %v3453_v63 = vpop.f32.mrb[227].mxu0  ;;  %5492 = vmatpush1.bf16.msra.mxu1 %v5491_v13  ;;  %v6115_v9 = vpop.eup %6114  ;;  %v3615_v57 = vmul.f32 %v6109_v39, %v3196_v34  ;;  %6136 = vtanh.f32 %v2080_v22  ;;  %v9384_v39 = vld [vmem:[#allocation66_spill] sm:$0xff]  ;;  %v9386_v22 = vld [vmem:[#allocation121_spill] sm:$0xff] }
 0x6db   : > { %v8712_v59 = vmul.f32 %v6113_v1, %v3453_v63  ;;  %5493 = vmatprep.subr.bf16.mxu1 %v6456_v51  ;;  %v6117_v17 = vpop.eup %6116  ;;  %v3200_v49 = vpop.f32.mrb[120].mxu1  ;;  %v2086_v4 = vadd.f32 %v9384_v39, %v8366_v7  ;;  %6138 = vtanh.f32 %v2082_v33  ;;  %v9385_v1 = vld [vmem:[#allocation67_spill] sm:$0xff]  ;;  %v3749_v33 = vld [vmem:[%s9080_s4 + $0x1f8] sm:$0xff] }
 0x6dc   : > { %v6119_v42 = vpop.eup %6118  ;;  %v3457_v13 = vpop.f32.mrb[228].mxu0  ;;  %3884 = vmatprep.mubr.f32.mxu1 %v3615_v57  ;;  %v3618_v3 = vmul.f32 %v8671_v52, %v3200_v49  ;;  %v2088_v56 = vadd.f32 %v9385_v1, %v8371_v8  ;;  %6140 = vtanh.f32 %v9386_v22 }
 0x6dd   : > { %v6121_v0 = vpop.eup %6120  ;;  %v8721_v11 = vmul.f32 %v6119_v42, %v3457_v13  ;;  %v3202_v48 = vpop.f32.mrb[121].mxu1  ;;  %3885 = vmatmul.mubr.f32.gmra.mrb[182].mxu1 %v3614_v53  ;;  %6142 = vtanh.f32 %v1831_v30  ;;  %v3748_v53 = vld [vmem:[%s9080_s4 + $0x1f0] sm:$0xff] }
 0x6de   : > { %v3459_v54 = vpop.f32.mrb[229].mxu0  ;;  %v6123_v55 = vpop.eup %6122  ;;  %v3619_v2 = vmul.f32 %v6117_v17, %v3202_v48  ;;  %5495 = vmatpush1.bf16.msra.mxu1 %v5494_v46  ;;  %6144 = vtanh.f32 %v2086_v4  ;;  %v5497_v42 = vpack.c.bf16 %v3749_v33, %v3748_v53 }
 0x6df   : > { %v8725_v34 = vmul.f32 %v6121_v0, %v3459_v54  ;;  %5496 = vmatprep.subr.bf16.mxu1 %v6456_v51  ;;  %v6125_v63 = vpop.eup %6124  ;;  %v3206_v52 = vpop.f32.mrb[122].mxu1  ;;  %6146 = vtanh.f32 %v2088_v56  ;;  %v9387_v0 = vld [vmem:[#allocation120_spill] sm:$0xff] }
 0x6e0   : > { %v3463_v24 = vpop.f32.mrb[230].mxu0  ;;  %3889 = vmatprep.mubr.f32.mxu1 %v3619_v2  ;;  %v6127_v57 = vpop.eup %6126  ;;  %v3622_v46 = vmul.f32 %v8689_v6, %v3206_v52  ;;  %6148 = vtanh.f32 %v9387_v0 }
 0x6e1   : > { %v8736_v17 = vmul.f32 %v6125_v63, %v3463_v24  ;;  %v3208_v51 = vpop.f32.mrb[123].mxu1  ;;  %v3465_v25 = vpop.f32.mrb[231].mxu0  ;;  %3890 = vmatmul.mubr.f32.gmra.mrb[184].mxu1 %v3618_v3 }
 0x6e2   : > { %v6129_v23 = vpop.eup %6128  ;;  %v3623_v30 = vmul.f32 %v6123_v55, %v3208_v51  ;;  %v8738_v49 = vmul.f32 %v6127_v57, %v3465_v25  ;;  %5498 = vmatpush1.bf16.msra.mxu1 %v5497_v42 }
 0x6e3   : > { %v6131_v13 = vpop.eup %6130  ;;  %v3212_v39 = vpop.f32.mrb[124].mxu1 }
 0x6e4   : > { %v3469_v48 = vpop.f32.mrb[232].mxu0  ;;  %3894 = vmatprep.mubr.f32.mxu1 %v3623_v30  ;;  %v6133_v4 = vpop.eup %6132  ;;  %v3626_v6 = vmul.f32 %v6115_v9, %v3212_v39 }
 0x6e5   : > { %v8741_v54 = vmul.f32 %v6131_v13, %v3469_v48  ;;  %v3214_v1 = vpop.f32.mrb[125].mxu1  ;;  %v3471_v2 = vpop.f32.mrb[233].mxu0  ;;  %3895 = vmatmul.mubr.f32.gmra.mrb[186].mxu1 %v3622_v46 }
 0x6e6   : > { %v6135_v3 = vpop.eup %6134  ;;  %v3627_v22 = vmul.f32 %v6129_v23, %v3214_v1  ;;  %v8743_v56 = vmul.f32 %v6133_v4, %v3471_v2 }
 0x6e7   : > { %v6137_v55 = vpop.eup %6136  ;;  %v3218_v52 = vpop.f32.mrb[126].mxu1 }
 0x6e8   : > { %v6139_v63 = vpop.eup %6138  ;;  %v3475_v24 = vpop.f32.mrb[234].mxu0  ;;  %3899 = vmatprep.mubr.f32.mxu1 %v3627_v22  ;;  %v3630_v33 = vmul.f32 %v6135_v3, %v3218_v52 }
 0x6e9   : > { %v6141_v53 = vpop.eup %6140  ;;  %v8745_v57 = vmul.f32 %v6139_v63, %v3475_v24  ;;  %v3220_v51 = vpop.f32.mrb[127].mxu1  ;;  %3900 = vmatmul.mubr.f32.gmra.mrb[188].mxu1 %v3626_v6  ;;  %v9390_v6 = vld [vmem:[#allocation62_spill] sm:$0xff]  ;;  %v9391_v63 = vld [vmem:[#allocation69_spill] sm:$0xff] }
 0x6ea   : > { %v3477_v9 = vpop.f32.mrb[235].mxu0  ;;  %v6143_v25 = vpop.eup %6142  ;;  %v3631_v42 = vmul.f32 %v6137_v55, %v3220_v51  ;;  %v1837_v55 = vadd.f32 %v9390_v6, %v8345_v26  ;;  %v2092_v52 = vadd.f32 %v9391_v63, %v8366_v7  ;;  %v9392_v24 = vld [vmem:[#allocation70_spill] sm:$0xff]  ;;  %v9393_v51 = vld [vmem:[#allocation65_spill] sm:$0xff] }
 0x6eb   : > { %v8747_v30 = vmul.f32 %v6141_v53, %v3477_v9  ;;  %v6145_v46 = vpop.eup %6144  ;;  %v3224_v13 = vpop.f32.mrb[128].mxu1  ;;  %v2094_v53 = vadd.f32 %v9392_v24, %v8371_v8  ;;  %v1843_v9 = vadd.f32 %v9393_v51, %v8345_v26  ;;  %v9403_v51 = vld [vmem:[#allocation124_spill] sm:$0xff] }
 0x6ec   : > { %v6147_v23 = vpop.eup %6146  ;;  %v3481_v0 = vpop.f32.mrb[236].mxu0  ;;  %3904 = vmatprep.mubr.f32.mxu1 %v3631_v42  ;;  %v3634_v48 = vmul.f32 %v6143_v25, %v3224_v13  ;;  %6150 = vtanh.f32 %v1837_v55  ;;  %v9395_v42 = vld [vmem:[#allocation73_spill] sm:$0xff] }
 0x6ed   : > { %v6149_v39 = vpop.eup %6148  ;;  %v8749_v4 = vmul.f32 %v6147_v23, %v3481_v0  ;;  %v3226_v1 = vpop.f32.mrb[129].mxu1  ;;  %3905 = vmatmul.mubr.f32.gmra.mrb[190].mxu1 %v3630_v33  ;;  %6152 = vtanh.f32 %v2092_v52  ;;  %v9394_v33 = vld [vmem:[#allocation72_spill] sm:$0xff]  ;;  %v9397_v0 = vld [vmem:[#allocation75_spill] sm:$0xff] }
 0x6ee   : > { %v3483_v2 = vpop.f32.mrb[237].mxu0  ;;  %v3635_v3 = vmul.f32 %v6145_v46, %v3226_v1  ;;  %v2098_v25 = vadd.f32 %v9394_v33, %v8366_v7  ;;  %6154 = vtanh.f32 %v2094_v53  ;;  %v2100_v46 = vadd.f32 %v9395_v42, %v8371_v8  ;;  %v9396_v23 = vld [vmem:[#allocation68_spill] sm:$0xff]  ;;  %v9402_v52 = vld [vmem:[#allocation79_spill] sm:$0xff]  ;;  %v9404_v33 = vld [vmem:[#allocation74_spill] sm:$0xff] }
 0x6ef   : > { %9388 = vst [vmem:[#allocation13_spill] sm:$0xff] %v8749_v4  ;;  %v8751_v22 = vmul.f32 %v6149_v39, %v3483_v2  ;;  %6156 = vtanh.f32 %v8060_v47  ;;  %v1849_v13 = vadd.f32 %v9396_v23, %v8345_v26  ;;  %v2104_v39 = vadd.f32 %v9397_v0, %v8366_v7  ;;  %v9399_v2 = vld [vmem:[#allocation122_spill] sm:$0xff]  ;;  %v9409_v4 = vld [vmem:[#allocation123_spill] sm:$0xff] }
 0x6f0   : > { %3909 = vmatprep.mubr.f32.mxu1 %v3635_v3  ;;  %6158 = vtanh.f32 %v1843_v9  ;;  %v9400_v3 = vld [vmem:[#allocation71_spill] sm:$0xff]  ;;  %v9401_v47 = vld [vmem:[#allocation78_spill] sm:$0xff]  ;;  %v2112_v24 = vadd.f32 %v9402_v52, %v8371_v8 }
 0x6f1   : > { %9389 = vst [vmem:[#allocation12_spill] sm:$0xff] %v8751_v22  ;;  %3910 = vmatmul.mubr.f32.gmra.mrb[192].mxu1 %v3634_v48  ;;  %6160 = vtanh.f32 %v2098_v25  ;;  %v9398_v48 = vld [vmem:[#allocation76_spill] sm:$0xff]  ;;  %v1855_v6 = vadd.f32 %v9400_v3, %v8345_v26  ;;  %v2110_v55 = vadd.f32 %v9401_v47, %v8366_v7  ;;  %v1861_v25 = vadd.f32 %v9404_v33, %v8345_v26  ;;  %v9407_v47 = vld [vmem:[#allocation82_spill] sm:$0xff] }
 0x6f2   : > { %6162 = vtanh.f32 %v2100_v46  ;;  %v2106_v1 = vadd.f32 %v9398_v48, %v8371_v8  ;;  %v9415_v22 = vld [vmem:[#allocation126_spill] sm:$0xff] }
 0x6f3   : > { %6164 = vtanh.f32 %v9399_v2 }
 0x6f4   : > { %6166 = vtanh.f32 %v1849_v13  ;;  %v9405_v13 = vld [vmem:[#allocation81_spill] sm:$0xff] }
 0x6f5   : > { %6168 = vtanh.f32 %v2104_v39  ;;  %v2116_v0 = vadd.f32 %v9405_v13, %v8366_v7  ;;  %v9410_v13 = vld [vmem:[#allocation77_spill] sm:$0xff] }
 0x6f6   : > { %v6151_v63 = vpop.eup %6150  ;;  %6170 = vtanh.f32 %v2106_v1 }
 0x6f7   : > { %v6153_v53 = vpop.eup %6152  ;;  %6172 = vtanh.f32 %v9403_v51 }
 0x6f8   : > { %v6155_v9 = vpop.eup %6154  ;;  %6174 = vtanh.f32 %v1855_v6  ;;  %v2118_v6 = vadd.f32 %v9407_v47, %v8371_v8 }
 0x6f9   : > { %v6157_v23 = vpop.eup %6156  ;;  %6176 = vtanh.f32 %v2110_v55 }
 0x6fa   : > { %v6159_v3 = vpop.eup %6158  ;;  %6178 = vtanh.f32 %v2112_v24  ;;  %v9411_v24 = vld [vmem:[#allocation84_spill] sm:$0xff] }
 0x6fb   : > { %v6161_v33 = vpop.eup %6160  ;;  %6180 = vtanh.f32 %v9409_v4 }
 0x6fc   : > { %v6163_v55 = vpop.eup %6162  ;;  %6182 = vtanh.f32 %v1861_v25  ;;  %v9413_v25 = vld [vmem:[#allocation85_spill] sm:$0xff] }
 0x6fd   : > { %6184 = vtanh.f32 %v2116_v0 }
 0x6fe   : > { %6186 = vtanh.f32 %v2118_v6  ;;  %v9417_v6 = vld [vmem:[#allocation87_spill] sm:$0xff] }
 0x6ff   : > { %6188 = vtanh.f32 %v9415_v22 }
 0x732   : > { %v3230_v42 = vpop.f32.mrb[130].mxu1  ;;  %v3487_v46 = vpop.f32.mrb[238].mxu0 }
 0x733   : > { %v3638_v39 = vmul.f32 %v6151_v63, %v3230_v42  ;;  %v8784_v48 = vmul.f32 %v6155_v9, %v3487_v46  ;;  %v3232_v1 = vpop.f32.mrb[131].mxu1  ;;  %v3489_v2 = vpop.f32.mrb[239].mxu0  ;;  %v1867_v63 = vadd.f32 %v9410_v13, %v8345_v26 }
 0x734   : > { %v3639_v52 = vmul.f32 %v6153_v53, %v3232_v1  ;;  %v8788_v51 = vmul.f32 %v6157_v23, %v3489_v2  ;;  %v6165_v46 = vpop.eup %6164  ;;  %v2124_v2 = vadd.f32 %v9413_v25, %v8371_v8 }
 0x735   : > { %9406 = vst [vmem:[#allocation27_spill] sm:$0xff] %v8784_v48  ;;  %v2122_v48 = vadd.f32 %v9411_v24, %v8366_v7  ;;  %v6167_v4 = vpop.eup %6166  ;;  %6190 = vtanh.f32 %v1867_v63  ;;  %v2128_v24 = vadd.f32 %v9417_v6, %v8366_v7  ;;  %v9419_v63 = vld [vmem:[#allocation88_spill] sm:$0xff] }
 0x736   : > { %9408 = vst [vmem:[#allocation26_spill] sm:$0xff] %v8788_v51  ;;  %v3236_v9 = vpop.f32.mrb[132].mxu1  ;;  %v3493_v42 = vpop.f32.mrb[240].mxu0  ;;  %3914 = vmatprep.mubr.f32.mxu1 %v3639_v52 }
 0x737   : > { %v3642_v47 = vmul.f32 %v6159_v3, %v3236_v9  ;;  %v8795_v53 = vmul.f32 %v6163_v55, %v3493_v42  ;;  %v3238_v23 = vpop.f32.mrb[133].mxu1  ;;  %v3495_v1 = vpop.f32.mrb[241].mxu0  ;;  %3915 = vmatmul.mubr.f32.gmra.mrb[194].mxu1 %v3638_v39  ;;  %v9416_v3 = vld [vmem:[#allocation80_spill] sm:$0xff]  ;;  %6192 = vtanh.f32 %v2122_v48 }
 0x738   : > { %v3643_v13 = vmul.f32 %v6161_v33, %v3238_v23  ;;  %v8799_v51 = vmul.f32 %v6165_v46, %v3495_v1  ;;  %v6169_v52 = vpop.eup %6168  ;;  %v1873_v55 = vadd.f32 %v9416_v3, %v8345_v26  ;;  %6194 = vtanh.f32 %v2124_v2  ;;  %v9423_v2 = vld [vmem:[#allocation90_spill] sm:$0xff] }
 0x739   : > { %9412 = vst [vmem:[#allocation100_spill] sm:$0xff] %v8795_v53  ;;  %v6171_v0 = vpop.eup %6170  ;;  %v2130_v1 = vadd.f32 %v9419_v63, %v8371_v8  ;;  %v2134_v6 = vadd.f32 %v9423_v2, %v8366_v7 }
 0x73a   : > { %9414 = vst [vmem:[#allocation15_spill] sm:$0xff] %v8799_v51  ;;  %v3242_v9 = vpop.f32.mrb[134].mxu1  ;;  %v3499_v42 = vpop.f32.mrb[242].mxu0  ;;  %3919 = vmatprep.mubr.f32.mxu1 %v3643_v13  ;;  %v9421_v51 = vld [vmem:[#allocation125_spill] sm:$0xff] }
 0x73b   : > { %v6173_v39 = vpop.eup %6172  ;;  %v3646_v25 = vmul.f32 %v6167_v4, %v3242_v9  ;;  %v8806_v33 = vmul.f32 %v6171_v0, %v3499_v42  ;;  %v3244_v46 = vpop.f32.mrb[135].mxu1  ;;  %3920 = vmatmul.mubr.f32.gmra.mrb[196].mxu1 %v3642_v47  ;;  %6196 = vtanh.f32 %v9421_v51  ;;  %v9422_v4 = vld [vmem:[#allocation83_spill] sm:$0xff] }
 0x73c   : > { %v3501_v23 = vpop.f32.mrb[243].mxu0  ;;  %v6175_v22 = vpop.eup %6174  ;;  %v3647_v3 = vmul.f32 %v6169_v52, %v3244_v46  ;;  %6198 = vtanh.f32 %v1873_v55  ;;  %v1879_v0 = vadd.f32 %v9422_v4, %v8345_v26  ;;  %v9425_v55 = vld [vmem:[#allocation91_spill] sm:$0xff] }
 0x73d   : > { %9418 = vst [vmem:[#allocation29_spill] sm:$0xff] %v8806_v33  ;;  %v8810_v53 = vmul.f32 %v6173_v39, %v3501_v23  ;;  %v6177_v13 = vpop.eup %6176  ;;  %6200 = vtanh.f32 %v2128_v24  ;;  %v2136_v23 = vadd.f32 %v9425_v55, %v8371_v8 }
 0x73e   : > { %v6179_v48 = vpop.eup %6178  ;;  %v3248_v9 = vpop.f32.mrb[136].mxu1  ;;  %3924 = vmatprep.mubr.f32.mxu1 %v3647_v3  ;;  %6202 = vtanh.f32 %v2130_v1  ;;  %v9429_v1 = vld [vmem:[#allocation93_spill] sm:$0xff] }
 0x73f   : > { %9420 = vst [vmem:[#allocation28_spill] sm:$0xff] %v8810_v53  ;;  %v3505_v42 = vpop.f32.mrb[244].mxu0  ;;  %v6181_v47 = vpop.eup %6180  ;;  %v3650_v63 = vmul.f32 %v6175_v22, %v3248_v9  ;;  %3925 = vmatmul.mubr.f32.gmra.mrb[198].mxu1 %v3646_v25  ;;  %v9427_v53 = vld [vmem:[#allocation128_spill] sm:$0xff]  ;;  %v9428_v22 = vld [vmem:[#allocation86_spill] sm:$0xff]  ;;  %v2140_v2 = vadd.f32 %v9429_v1, %v8366_v7 }
 0x740   : > { %v8817_v52 = vmul.f32 %v6179_v48, %v3505_v42  ;;  %v3250_v39 = vpop.f32.mrb[137].mxu1  ;;  %v3507_v46 = vpop.f32.mrb[245].mxu0  ;;  %6204 = vtanh.f32 %v9427_v53  ;;  %v1885_v48 = vadd.f32 %v9428_v22, %v8345_v26 }
 0x741   : > { %v6183_v51 = vpop.eup %6182  ;;  %v3651_v4 = vmul.f32 %v6177_v13, %v3250_v39  ;;  %v8821_v33 = vmul.f32 %v6181_v47, %v3507_v46  ;;  %6206 = vtanh.f32 %v1879_v0  ;;  %v9431_v0 = vld [vmem:[#allocation94_spill] sm:$0xff] }
 0x742   : > { %9424 = vst [vmem:[#allocation98_spill] sm:$0xff] %v8817_v52  ;;  %v6185_v3 = vpop.eup %6184  ;;  %v3254_v9 = vpop.f32.mrb[138].mxu1  ;;  %6208 = vtanh.f32 %v2134_v6  ;;  %v2142_v46 = vadd.f32 %v9431_v0, %v8371_v8 }
 0x743   : > { %9426 = vst [vmem:[#allocation14_spill] sm:$0xff] %v8821_v33  ;;  %v6187_v24 = vpop.eup %6186  ;;  %v3511_v42 = vpop.f32.mrb[246].mxu0  ;;  %3929 = vmatprep.mubr.f32.mxu1 %v3651_v4  ;;  %v3654_v55 = vmul.f32 %v6183_v51, %v3254_v9  ;;  %6210 = vtanh.f32 %v2136_v23  ;;  %v9433_v33 = vld [vmem:[#allocation127_spill] sm:$0xff]  ;;  %v9434_v51 = vld [vmem:[#allocation89_spill] sm:$0xff]  ;;  %v9435_v23 = vld [vmem:[#allocation96_spill] sm:$0xff] }
 0x744   : > { %v6189_v25 = vpop.eup %6188  ;;  %v8828_v13 = vmul.f32 %v6187_v24, %v3511_v42  ;;  %v3256_v47 = vpop.f32.mrb[139].mxu1  ;;  %3930 = vmatmul.mubr.f32.gmra.mrb[200].mxu1 %v3650_v63  ;;  %6212 = vtanh.f32 %v9433_v33  ;;  %v1891_v24 = vadd.f32 %v9434_v51, %v8345_v26  ;;  %v2146_v1 = vadd.f32 %v9435_v23, %v8366_v7 }
 0x745   : > { %v3513_v39 = vpop.f32.mrb[247].mxu0  ;;  %v6191_v53 = vpop.eup %6190  ;;  %v3655_v22 = vmul.f32 %v6185_v3, %v3256_v47  ;;  %6214 = vtanh.f32 %v1885_v48  ;;  %v9437_v48 = vld [vmem:[#allocation97_spill] sm:$0xff] }
 0x746   : > { %9430 = vst [vmem:[#allocation30_spill] sm:$0xff] %v8828_v13  ;;  %v8832_v52 = vmul.f32 %v6189_v25, %v3513_v39  ;;  %v6193_v4 = vpop.eup %6192  ;;  %v3260_v9 = vpop.f32.mrb[140].mxu1  ;;  %6216 = vtanh.f32 %v2140_v2  ;;  %v2148_v39 = vadd.f32 %v9437_v48, %v8371_v8 }
 0x747   : > { %v6195_v6 = vpop.eup %6194  ;;  %v3517_v42 = vpop.f32.mrb[248].mxu0  ;;  %3934 = vmatprep.mubr.f32.mxu1 %v3655_v22  ;;  %v3658_v0 = vmul.f32 %v6191_v53, %v3260_v9  ;;  %6218 = vtanh.f32 %v2142_v46  ;;  %v9440_v53 = vld [vmem:[#allocation92_spill] sm:$0xff]  ;;  %v9441_v46 = vld [vmem:[#allocation99_spill] sm:$0xff] }
 0x748   : > { %9432 = vst [vmem:[#allocation31_spill] sm:$0xff] %v8832_v52  ;;  %v6197_v63 = vpop.eup %6196  ;;  %v8839_v3 = vmul.f32 %v6195_v6, %v3517_v42  ;;  %v3262_v25 = vpop.f32.mrb[141].mxu1  ;;  %3935 = vmatmul.mubr.f32.gmra.mrb[202].mxu1 %v3654_v55  ;;  %v9439_v52 = vld [vmem:[#allocation130_spill] sm:$0xff]  ;;  %v1897_v6 = vadd.f32 %v9440_v53, %v8345_v26  ;;  %v2152_v23 = vadd.f32 %v9441_v46, %v8366_v7 }
 0x749   : > { %v3519_v47 = vpop.f32.mrb[249].mxu0  ;;  %v6199_v33 = vpop.eup %6198  ;;  %v3659_v51 = vmul.f32 %v6193_v4, %v3262_v25  ;;  %6220 = vtanh.f32 %v9439_v52 }
 0x74a   : > { %9436 = vst [vmem:[#allocation104_spill] sm:$0xff] %v8839_v3  ;;  %v8843_v13 = vmul.f32 %v6197_v63, %v3519_v47  ;;  %v6201_v22 = vpop.eup %6200  ;;  %6222 = vtanh.f32 %v1891_v24  ;;  %v3266_v9 = vpop.f32.mrb[142].mxu1  ;;  %v9443_v24 = vld [vmem:[#allocation101_spill] sm:$0xff] }
 0x74b   : > { %v6203_v2 = vpop.eup %6202  ;;  %v3523_v42 = vpop.f32.mrb[250].mxu0  ;;  %3939 = vmatprep.mubr.f32.mxu1 %v3659_v51  ;;  %6224 = vtanh.f32 %v2146_v1  ;;  %v3662_v48 = vmul.f32 %v6199_v33, %v3266_v9  ;;  %v2154_v47 = vadd.f32 %v9443_v24, %v8371_v8  ;;  %v9445_v33 = vld [vmem:[#allocation95_spill] sm:$0xff] }
 0x74c   : > { %9438 = vst [vmem:[#allocation17_spill] sm:$0xff] %v8843_v13  ;;  %v6205_v55 = vpop.eup %6204  ;;  %v8850_v4 = vmul.f32 %v6203_v2, %v3523_v42  ;;  %v3268_v63 = vpop.f32.mrb[143].mxu1  ;;  %3940 = vmatmul.mubr.f32.gmra.mrb[204].mxu1 %v3658_v0  ;;  %6226 = vtanh.f32 %v2148_v39  ;;  %v9444_v13 = vld [vmem:[#allocation129_spill] sm:$0xff]  ;;  %v1903_v2 = vadd.f32 %v9445_v33, %v8345_v26  ;;  %v9446_v39 = vld [vmem:[#allocation103_spill] sm:$0xff] }
 0x74d   : > { %v3525_v25 = vpop.f32.mrb[251].mxu0  ;;  %v6207_v52 = vpop.eup %6206  ;;  %v3663_v53 = vmul.f32 %v6201_v22, %v3268_v63  ;;  %6228 = vtanh.f32 %v9444_v13  ;;  %v2158_v46 = vadd.f32 %v9446_v39, %v8366_v7 }
 0x74e   : > { %9442 = vst [vmem:[#allocation32_spill] sm:$0xff] %v8850_v4  ;;  %v8854_v3 = vmul.f32 %v6205_v55, %v3525_v25  ;;  %v6209_v51 = vpop.eup %6208  ;;  %6230 = vtanh.f32 %v1897_v6  ;;  %v3272_v9 = vpop.f32.mrb[144].mxu1  ;;  %v9447_v6 = vld [vmem:[#allocation105_spill] sm:$0xff]  ;;  %v9448_v4 = vld [vmem:[#allocation132_spill] sm:$0xff] }
 0x74f   : > { %v6211_v1 = vpop.eup %6210  ;;  %v3529_v42 = vpop.f32.mrb[252].mxu0  ;;  %3944 = vmatprep.mubr.f32.mxu1 %v3663_v53  ;;  %6232 = vtanh.f32 %v2152_v23  ;;  %v3666_v24 = vmul.f32 %v6207_v52, %v3272_v9  ;;  %v2160_v25 = vadd.f32 %v9447_v6, %v8371_v8 }
 0x750   : > { %v6213_v0 = vpop.eup %6212  ;;  %v8861_v22 = vmul.f32 %v6211_v1, %v3529_v42  ;;  %v3274_v55 = vpop.f32.mrb[145].mxu1  ;;  %3945 = vmatmul.mubr.f32.gmra.mrb[206].mxu1 %v3662_v48  ;;  %6234 = vtanh.f32 %v2154_v47 }
 0x751   : > { %v3531_v63 = vpop.f32.mrb[253].mxu0  ;;  %v6215_v13 = vpop.eup %6214  ;;  %v3667_v26 = vmul.f32 %v6209_v51, %v3274_v55  ;;  %6236 = vtanh.f32 %v9448_v4  ;;  %v9450_v4 = vld [vmem:[#allocation131_spill] sm:$0xff] }
 0x752   : > { %v8865_v33 = vmul.f32 %v6213_v0, %v3531_v63  ;;  %v6217_v53 = vpop.eup %6216  ;;  %6238 = vtanh.f32 %v1903_v2  ;;  %v3278_v7 = vpop.f32.mrb[146].mxu1 }
 0x753   : > { %v6219_v23 = vpop.eup %6218  ;;  %v3535_v52 = vpop.f32.mrb[254].mxu0  ;;  %3949 = vmatprep.mubr.f32.mxu1 %v3667_v26  ;;  %6240 = vtanh.f32 %v2158_v46  ;;  %v3670_v9 = vmul.f32 %v6215_v13, %v3278_v7 }
 0x754   : > { %v6221_v1 = vpop.eup %6220  ;;  %v8868_v48 = vmul.f32 %v6219_v23, %v3535_v52  ;;  %v3280_v47 = vpop.f32.mrb[147].mxu1  ;;  %3950 = vmatmul.mubr.f32.gmra.mrb[208].mxu1 %v3666_v24  ;;  %6242 = vtanh.f32 %v2160_v25 }
 0x755   : > { %v3537_v42 = vpop.f32.mrb[255].mxu0  ;;  %v6223_v8 = vpop.eup %6222  ;;  %v3671_v51 = vmul.f32 %v6217_v53, %v3280_v47  ;;  %6244 = vtanh.f32 %v9450_v4 }
 0x756   : > { %9449 = vst [vmem:[#allocation33_spill] sm:$0xff] %v8868_v48  ;;  %v8870_v0 = vmul.f32 %v6221_v1, %v3537_v42  ;;  %v6225_v39 = vpop.eup %6224  ;;  %v3284_v55 = vpop.f32.mrb[148].mxu1 }
 0x757   : > { %v6227_v2 = vpop.eup %6226  ;;  %v3541_v63 = vpop.f32.mrb[0].mxu0  ;;  %3954 = vmatprep.mubr.f32.mxu1 %v3671_v51  ;;  %v3674_v46 = vmul.f32 %v6223_v8, %v3284_v55 }
 0x758   : > { %v6229_v6 = vpop.eup %6228  ;;  %v8873_v13 = vmul.f32 %v6227_v2, %v3541_v63  ;;  %v3286_v26 = vpop.f32.mrb[149].mxu1  ;;  %3955 = vmatmul.mubr.f32.gmra.mrb[210].mxu1 %v3670_v9 }
 0x759   : > { %v3543_v23 = vpop.f32.mrb[1].mxu0  ;;  %v6231_v24 = vpop.eup %6230  ;;  %v3675_v7 = vmul.f32 %v6225_v39, %v3286_v26 }
 0x75a   : > { %9451 = vst [vmem:[#allocation102_spill] sm:$0xff] %v8873_v13  ;;  %v8875_v25 = vmul.f32 %v6229_v6, %v3543_v23  ;;  %v6233_v53 = vpop.eup %6232  ;;  %v3290_v1 = vpop.f32.mrb[150].mxu1 }
 0x75b   : > { %v6235_v52 = vpop.eup %6234  ;;  %v3547_v47 = vpop.f32.mrb[2].mxu0  ;;  %3959 = vmatprep.mubr.f32.mxu1 %v3675_v7  ;;  %v3678_v4 = vmul.f32 %v6231_v24, %v3290_v1 }
 0x75c   : > { %9452 = vst [vmem:[#allocation34_spill] sm:$0xff] %v8875_v25  ;;  %v6237_v42 = vpop.eup %6236  ;;  %v8877_v48 = vmul.f32 %v6235_v52, %v3547_v47  ;;  %v3292_v51 = vpop.f32.mrb[151].mxu1  ;;  %3960 = vmatmul.mubr.f32.gmra.mrb[212].mxu1 %v3674_v46  ;;  %v4200_v46 = vld [vmem:[%s9080_s4 + $0x200] sm:$0xff]  ;;  %v4202_v47 = vld [vmem:[%s9080_s4 + $0x210] sm:$0xff] }
 0x75d   : > { %v3549_v8 = vpop.f32.mrb[3].mxu0  ;;  %v6239_v2 = vpop.eup %6238  ;;  %v3679_v55 = vmul.f32 %v6233_v53, %v3292_v51  ;;  %v4201_v53 = vld [vmem:[%s9080_s4 + $0x208] sm:$0xff]  ;;  %v4204_v51 = vld [vmem:[%s9080_s4 + $0x220] sm:$0xff] }
 0x75e   : > { %v8879_v63 = vmul.f32 %v6237_v42, %v3549_v8  ;;  %v6241_v9 = vpop.eup %6240  ;;  %v3296_v6 = vpop.f32.mrb[152].mxu1  ;;  %v5499_v42 = vpack.c.bf16 %v4201_v53, %v4200_v46  ;;  %v4205_v8 = vld [vmem:[%s9080_s4 + $0x228] sm:$0xff] }
 0x75f   : > { %v6243_v39 = vpop.eup %6242  ;;  %v3553_v26 = vpop.f32.mrb[4].mxu0  ;;  %3964 = vmatprep.mubr.f32.mxu1 %v3679_v55  ;;  %v3682_v13 = vmul.f32 %v6239_v2, %v3296_v6  ;;  %v4206_v2 = vld [vmem:[%s9080_s4 + $0x230] sm:$0xff]  ;;  %v4207_v55 = vld [vmem:[%s9080_s4 + $0x238] sm:$0xff]  ;;  %v4213_v6 = vld [vmem:[%s9080_s4 + $0x268] sm:$0xff] }
 0x760   : > { %v6245_v23 = vpop.eup %6244  ;;  %v8881_v25 = vmul.f32 %v6243_v39, %v3553_v26  ;;  %v3298_v7 = vpop.f32.mrb[153].mxu1  ;;  %3965 = vmatmul.mubr.f32.gmra.mrb[214].mxu1 %v3678_v4  ;;  %v4203_v4 = vld [vmem:[%s9080_s4 + $0x218] sm:$0xff]  ;;  %5500 = vmatprep.subr.bf16.mxu0 %v5499_v42 }
 0x761   : > { %v3555_v24 = vpop.f32.mrb[5].mxu0  ;;  %v3683_v52 = vmul.f32 %v6241_v9, %v3298_v7  ;;  %5502 = vmatpush3.bf16.msra.mxu0 %v5499_v42  ;;  %v4209_v9 = vld [vmem:[%s9080_s4 + $0x248] sm:$0xff]  ;;  %v4211_v39 = vld [vmem:[%s9080_s4 + $0x258] sm:$0xff] }
 0x762   : > { %v8883_v1 = vmul.f32 %v6245_v23, %v3555_v24 }
 0x763   : > { %3969 = vmatprep.mubr.f32.mxu1 %v3683_v52 }
 0x764   : > { %3970 = vmatmul.mubr.f32.gmra.mrb[216].mxu1 %v3682_v13  ;;  %v5503_v13 = vpack.c.bf16 %v4203_v4, %v4202_v47 }
 0x765   : > { %4039 = vmatprep.mubr.f32.mxu1 %v8433_v41  ;;  %v5507_v41 = vpack.c.bf16 %v4205_v8, %v4204_v51 }
 0x766   : > { %5504 = vmatprep.subr.bf16.mxu0 %v5503_v13 }
 0x767   : > { %5506 = vmatpush3.bf16.msra.mxu0 %v5503_v13 }
 0x768   : > { %4040 = vmatmul.mubr.f32.vlgmr.msra.gmra.mrb[154].mxu1 %v8429_v43  ;;  %5508 = vmatprep.subr.bf16.mxu0 %v5507_v41  ;;  %v5511_v43 = vpack.c.bf16 %v4207_v55, %v4206_v2 }
 0x769   : > { %4044 = vmatprep.mubr.f32.mxu1 %v8453_v10  ;;  %v4208_v10 = vld [vmem:[%s9080_s4 + $0x240] sm:$0xff] }
 0x76b   : > { %5510 = vmatpush3.bf16.msra.mxu0 %v5507_v41 }
 0x76c   : > { %4045 = vmatmul.mubr.f32.gmra.mrb[156].mxu1 %v8447_v15  ;;  %5512 = vmatprep.subr.bf16.mxu0 %v5511_v43  ;;  %v5515_v15 = vpack.c.bf16 %v4209_v9, %v4208_v10 }
 0x76d   : > { %4049 = vmatprep.mubr.f32.mxu1 %v8473_v62  ;;  %v4210_v62 = vld [vmem:[%s9080_s4 + $0x250] sm:$0xff] }
 0x76f   : > { %5514 = vmatpush3.bf16.msra.mxu0 %v5511_v43 }
 0x770   : > { %4050 = vmatmul.mubr.f32.gmra.mrb[158].mxu1 %v8469_v28  ;;  %5516 = vmatprep.subr.bf16.mxu0 %v5515_v15  ;;  %v5519_v28 = vpack.c.bf16 %v4211_v39, %v4210_v62 }
 0x771   : > { %4054 = vmatprep.mubr.f32.mxu1 %v8493_v20  ;;  %v4212_v20 = vld [vmem:[%s9080_s4 + $0x260] sm:$0xff] }
 0x773   : > { %5518 = vmatpush3.bf16.msra.mxu0 %v5515_v15 }
 0x774   : > { %4055 = vmatmul.mubr.f32.gmra.mrb[160].mxu1 %v8489_v27  ;;  %5520 = vmatprep.subr.bf16.mxu0 %v5519_v28  ;;  %v5523_v27 = vpack.c.bf16 %v4213_v6, %v4212_v20 }
 0x775   : > { %4059 = vmatprep.mubr.f32.mxu1 %v8513_v31  ;;  %v9454_v31 = vld [vmem:[#allocation13_spill] sm:$0xff] }
 0x777   : > { %5522 = vmatpush3.bf16.msra.mxu0 %v5519_v28 }
 0x778   : > { %4060 = vmatmul.mubr.f32.gmra.mrb[162].mxu1 %v8509_v35  ;;  %5524 = vmatprep.subr.bf16.mxu0 %v5523_v27  ;;  %v9453_v35 = vld [vmem:[#allocation12_spill] sm:$0xff] }
 0x779   : > { %4064 = vmatprep.mubr.f32.mxu1 %v8533_v60  ;;  %v9456_v60 = vld [vmem:[#allocation27_spill] sm:$0xff] }
 0x77b   : > { %5526 = vmatpush3.bf16.msra.mxu0 %v5523_v27 }
 0x77c   : > { %4065 = vmatmul.mubr.f32.gmra.mrb[164].mxu1 %v8529_v19  ;;  %v9455_v19 = vld [vmem:[#allocation26_spill] sm:$0xff] }
 0x77d   : > { %4069 = vmatprep.mubr.f32.mxu1 %v8553_v36  ;;  %v9458_v36 = vld [vmem:[#allocation100_spill] sm:$0xff] }
 0x780   : > { %4070 = vmatmul.mubr.f32.gmra.mrb[166].mxu1 %v8549_v40  ;;  %v9457_v40 = vld [vmem:[#allocation15_spill] sm:$0xff] }
 0x781   : > { %4074 = vmatprep.mubr.f32.mxu1 %v8573_v18  ;;  %v4215_v18 = vld [vmem:[%s9080_s4 + $0x278] sm:$0xff] }
 0x784   : > { %4075 = vmatmul.mubr.f32.gmra.mrb[168].mxu1 %v8569_v44  ;;  %v4214_v44 = vld [vmem:[%s9080_s4 + $0x270] sm:$0xff] }
 0x785   : > { %4079 = vmatprep.mubr.f32.mxu1 %v8593_v37  ;;  %v5527_v37 = vpack.c.bf16 %v4215_v18, %v4214_v44 }
 0x787   : > { %5528 = vmatprep.subr.bf16.mxu0 %v5527_v37 }
 0x788   : > { %4080 = vmatmul.mubr.f32.gmra.mrb[170].mxu1 %v8589_v38  ;;  %v9459_v38 = vld [vmem:[#allocation28_spill] sm:$0xff]  ;;  %5530 = vmatpush3.bf16.msra.mxu0 %v5527_v37 }
 0x789   : > { %4084 = vmatprep.mubr.f32.mxu1 %v8613_v50  ;;  %v9461_v50 = vld [vmem:[#allocation14_spill] sm:$0xff] }
 0x78c   : > { %4085 = vmatmul.mubr.f32.gmra.mrb[172].mxu1 %v8609_v5  ;;  %v9460_v5 = vld [vmem:[#allocation29_spill] sm:$0xff] }
 0x78d   : > { %4089 = vmatprep.mubr.f32.mxu1 %v8633_v14  ;;  %v9463_v14 = vld [vmem:[#allocation31_spill] sm:$0xff] }
 0x790   : > { %4090 = vmatmul.mubr.f32.gmra.mrb[174].mxu1 %v8629_v61  ;;  %v9462_v61 = vld [vmem:[#allocation98_spill] sm:$0xff] }
 0x791   : > { %4094 = vmatprep.mubr.f32.mxu1 %v8653_v45  ;;  %v9465_v45 = vld [vmem:[#allocation17_spill] sm:$0xff] }
 0x794   : > { %4095 = vmatmul.mubr.f32.gmra.mrb[176].mxu1 %v8649_v58  ;;  %v9464_v58 = vld [vmem:[#allocation30_spill] sm:$0xff] }
 0x795   : > { %4099 = vmatprep.mubr.f32.mxu1 %v8673_v16  ;;  %v9467_v16 = vld [vmem:[#allocation32_spill] sm:$0xff] }
 0x798   : > { %4100 = vmatmul.mubr.f32.gmra.mrb[178].mxu1 %v8669_v12  ;;  %v9466_v12 = vld [vmem:[#allocation104_spill] sm:$0xff] }
 0x799   : > { %4104 = vmatprep.mubr.f32.mxu1 %v8693_v29  ;;  %v9469_v29 = vld [vmem:[#allocation34_spill] sm:$0xff] }
 0x79c   : > { %4105 = vmatmul.mubr.f32.gmra.mrb[180].mxu1 %v8687_v32  ;;  %v9468_v32 = vld [vmem:[#allocation33_spill] sm:$0xff] }
 0x79d   : > { %4109 = vmatprep.mubr.f32.mxu1 %v8712_v59 }
 0x7a0   : > { %4110 = vmatmul.mubr.f32.gmra.mrb[182].mxu1 %v8708_v21  ;;  %v9470_v21 = vld [vmem:[#allocation102_spill] sm:$0xff] }
 0x7a1   : > { %4114 = vmatprep.mubr.f32.mxu1 %v8725_v34 }
 0x7a4   : > { %4115 = vmatmul.mubr.f32.gmra.mrb[184].mxu1 %v8721_v11 }
 0x7a5   : > { %4119 = vmatprep.mubr.f32.mxu1 %v8738_v49 }
 0x7a8   : > { %4120 = vmatmul.mubr.f32.gmra.mrb[186].mxu1 %v8736_v17 }
 0x7a9   : > { %4124 = vmatprep.mubr.f32.mxu1 %v8743_v56 }
 0x7ac   : > { %4125 = vmatmul.mubr.f32.gmra.mrb[188].mxu1 %v8741_v54 }
 0x7ad   : > { %4129 = vmatprep.mubr.f32.mxu1 %v8747_v30 }
 0x7b0   : > { %4130 = vmatmul.mubr.f32.gmra.mrb[190].mxu1 %v8745_v57 }
 0x7b1   : > { %4134 = vmatprep.mubr.f32.mxu1 %v9453_v35 }
 0x7b4   : > { %4135 = vmatmul.mubr.f32.gmra.mrb[192].mxu1 %v9454_v31 }
 0x7b5   : > { %4139 = vmatprep.mubr.f32.mxu1 %v9455_v19 }
 0x7b8   : > { %4140 = vmatmul.mubr.f32.gmra.mrb[194].mxu1 %v9456_v60 }
 0x7b9   : > { %4144 = vmatprep.mubr.f32.mxu1 %v9457_v40 }
 0x7bc   : > { %4145 = vmatmul.mubr.f32.gmra.mrb[196].mxu1 %v9458_v36 }
 0x7bd   : > { %4149 = vmatprep.mubr.f32.mxu1 %v9459_v38 }
 0x7c0   : > { %4150 = vmatmul.mubr.f32.gmra.mrb[198].mxu1 %v9460_v5 }
 0x7c1   : > { %4154 = vmatprep.mubr.f32.mxu1 %v9461_v50 }
 0x7c4   : > { %4155 = vmatmul.mubr.f32.gmra.mrb[200].mxu1 %v9462_v61 }
 0x7c5   : > { %4159 = vmatprep.mubr.f32.mxu1 %v9463_v14 }
 0x7c8   : > { %4160 = vmatmul.mubr.f32.gmra.mrb[202].mxu1 %v9464_v58 }
 0x7c9   : > { %4164 = vmatprep.mubr.f32.mxu1 %v9465_v45 }
 0x7cc   : > { %4165 = vmatmul.mubr.f32.gmra.mrb[204].mxu1 %v9466_v12 }
 0x7cd   : > { %4169 = vmatprep.mubr.f32.mxu1 %v8854_v3 }
 0x7d0   : > { %4170 = vmatmul.mubr.f32.gmra.mrb[206].mxu1 %v9467_v16 }
 0x7d1   : > { %4174 = vmatprep.mubr.f32.mxu1 %v8865_v33 }
 0x7d4   : > { %4175 = vmatmul.mubr.f32.gmra.mrb[208].mxu1 %v8861_v22 }
 0x7d5   : > { %4179 = vmatprep.mubr.f32.mxu1 %v8870_v0 }
 0x7d8   : > { %4180 = vmatmul.mubr.f32.gmra.mrb[210].mxu1 %v9468_v32 }
 0x7d9   : > { %4184 = vmatprep.mubr.f32.mxu1 %v9469_v29 }
 0x7dc   : > { %4185 = vmatmul.mubr.f32.gmra.mrb[212].mxu1 %v9470_v21 }
 0x7dd   : > { %4189 = vmatprep.mubr.f32.mxu1 %v8879_v63 }
 0x7e0   : > { %4190 = vmatmul.mubr.f32.gmra.mrb[214].mxu1 %v8877_v48 }
 0x7e1   : > { %4194 = vmatprep.mubr.f32.mxu1 %v8883_v1 }
 0x7e4   : > { %4195 = vmatmul.mubr.f32.gmra.mrb[216].mxu1 %v8881_v25 }
 0x83b   : > { %v4041_v59 = vpop.f32.mrb[154].mxu1 }
 0x83c   : > { %v4043_v11 = vpop.f32.mrb[155].mxu1  ;;  %5123 = vmatprep.mubr.f32.mxu0 %v4041_v59  ;;  %v9000_v59 = vld [vmem:[%s9080_s4 + $0x280] ss:$0 sm:$0xff] }
 0x83f   : > { %v4046_v34 = vpop.f32.mrb[156].mxu1 }
 0x840   : > { %v4048_v17 = vpop.f32.mrb[157].mxu1  ;;  %5124 = vmatmul.mubr.f32.vlgmr.msra.gmra.mrb[6].mxu0 %v4046_v34 }
 0x843   : > { %v4051_v49 = vpop.f32.mrb[158].mxu1 }
 0x844   : > { %v4053_v54 = vpop.f32.mrb[159].mxu1  ;;  %5126 = vmatprep.mubr.f32.mxu0 %v4051_v49 }
 0x847   : > { %v4056_v56 = vpop.f32.mrb[160].mxu1 }
 0x848   : > { %v4058_v57 = vpop.f32.mrb[161].mxu1  ;;  %5127 = vmatmul.mubr.f32.gmra.mrb[8].mxu0 %v4056_v56 }
 0x84b   : > { %v4061_v30 = vpop.f32.mrb[162].mxu1 }
 0x84c   : > { %v4063_v3 = vpop.f32.mrb[163].mxu1  ;;  %5129 = vmatprep.mubr.f32.mxu0 %v4061_v30 }
 0x84f   : > { %v4066_v22 = vpop.f32.mrb[164].mxu1 }
 0x850   : > { %v4068_v33 = vpop.f32.mrb[165].mxu1  ;;  %5130 = vmatmul.mubr.f32.gmra.mrb[10].mxu0 %v4066_v22 }
 0x853   : > { %v4071_v48 = vpop.f32.mrb[166].mxu1 }
 0x854   : > { %v4073_v0 = vpop.f32.mrb[167].mxu1  ;;  %5132 = vmatprep.mubr.f32.mxu0 %v4071_v48 }
 0x857   : > { %v4076_v25 = vpop.f32.mrb[168].mxu1 }
 0x858   : > { %v4078_v63 = vpop.f32.mrb[169].mxu1  ;;  %5133 = vmatmul.mubr.f32.gmra.mrb[12].mxu0 %v4076_v25 }
 0x85b   : > { %v4081_v26 = vpop.f32.mrb[170].mxu1 }
 0x85c   : > { %v4083_v23 = vpop.f32.mrb[171].mxu1  ;;  %5135 = vmatprep.mubr.f32.mxu0 %v4081_v26 }
 0x85f   : > { %v4086_v7 = vpop.f32.mrb[172].mxu1 }
 0x860   : > { %v4088_v24 = vpop.f32.mrb[173].mxu1  ;;  %5136 = vmatmul.mubr.f32.gmra.mrb[14].mxu0 %v4086_v7 }
 0x863   : > { %v4091_v52 = vpop.f32.mrb[174].mxu1 }
 0x864   : > { %v4093_v1 = vpop.f32.mrb[175].mxu1  ;;  %5138 = vmatprep.mubr.f32.mxu0 %v4091_v52 }
 0x867   : > { %v4096_v46 = vpop.f32.mrb[176].mxu1 }
 0x868   : > { %v4098_v53 = vpop.f32.mrb[177].mxu1  ;;  %5139 = vmatmul.mubr.f32.gmra.mrb[16].mxu0 %v4096_v46 }
 0x86b   : > { %v4101_v47 = vpop.f32.mrb[178].mxu1 }
 0x86c   : > { %v4103_v42 = vpop.f32.mrb[179].mxu1  ;;  %5141 = vmatprep.mubr.f32.mxu0 %v4101_v47 }
 0x86f   : > { %v4106_v4 = vpop.f32.mrb[180].mxu1 }
 0x870   : > { %v4108_v13 = vpop.f32.mrb[181].mxu1  ;;  %5142 = vmatmul.mubr.f32.gmra.mrb[18].mxu0 %v4106_v4 }
 0x873   : > { %v4111_v51 = vpop.f32.mrb[182].mxu1 }
 0x874   : > { %v4113_v8 = vpop.f32.mrb[183].mxu1  ;;  %5144 = vmatprep.mubr.f32.mxu0 %v4111_v51 }
 0x877   : > { %v4116_v41 = vpop.f32.mrb[184].mxu1 }
 0x878   : > { %v4118_v2 = vpop.f32.mrb[185].mxu1  ;;  %5145 = vmatmul.mubr.f32.gmra.mrb[20].mxu0 %v4116_v41 }
 0x87b   : > { %v4121_v55 = vpop.f32.mrb[186].mxu1 }
 0x87c   : > { %v4123_v43 = vpop.f32.mrb[187].mxu1  ;;  %5147 = vmatprep.mubr.f32.mxu0 %v4121_v55 }
 0x87f   : > { %v4126_v10 = vpop.f32.mrb[188].mxu1 }
 0x880   : > { %v4128_v9 = vpop.f32.mrb[189].mxu1  ;;  %5148 = vmatmul.mubr.f32.gmra.mrb[22].mxu0 %v4126_v10 }
 0x883   : > { %v4131_v15 = vpop.f32.mrb[190].mxu1 }
 0x884   : > { %v4133_v62 = vpop.f32.mrb[191].mxu1  ;;  %5150 = vmatprep.mubr.f32.mxu0 %v4131_v15 }
 0x887   : > { %v4136_v39 = vpop.f32.mrb[192].mxu1 }
 0x888   : > { %v4138_v28 = vpop.f32.mrb[193].mxu1  ;;  %5151 = vmatmul.mubr.f32.gmra.mrb[24].mxu0 %v4136_v39 }
 0x88b   : > { %v4141_v20 = vpop.f32.mrb[194].mxu1 }
 0x88c   : > { %v4143_v6 = vpop.f32.mrb[195].mxu1  ;;  %5153 = vmatprep.mubr.f32.mxu0 %v4141_v20 }
 0x88f   : > { %v4146_v27 = vpop.f32.mrb[196].mxu1 }
 0x890   : > { %v4148_v35 = vpop.f32.mrb[197].mxu1  ;;  %5154 = vmatmul.mubr.f32.gmra.mrb[26].mxu0 %v4146_v27 }
 0x893   : > { %v4151_v31 = vpop.f32.mrb[198].mxu1 }
 0x894   : > { %v4153_v19 = vpop.f32.mrb[199].mxu1  ;;  %5156 = vmatprep.mubr.f32.mxu0 %v4151_v31 }
 0x897   : > { %v4156_v60 = vpop.f32.mrb[200].mxu1 }
 0x898   : > { %v4158_v40 = vpop.f32.mrb[201].mxu1  ;;  %5157 = vmatmul.mubr.f32.gmra.mrb[28].mxu0 %v4156_v60 }
 0x89b   : > { %v4161_v36 = vpop.f32.mrb[202].mxu1 }
 0x89c   : > { %v4163_v44 = vpop.f32.mrb[203].mxu1  ;;  %5159 = vmatprep.mubr.f32.mxu0 %v4161_v36 }
 0x89f   : > { %v4166_v18 = vpop.f32.mrb[204].mxu1 }
 0x8a0   : > { %v4168_v38 = vpop.f32.mrb[205].mxu1  ;;  %5160 = vmatmul.mubr.f32.gmra.mrb[30].mxu0 %v4166_v18 }
 0x8a3   : > { %v4171_v37 = vpop.f32.mrb[206].mxu1 }
 0x8a4   : > { %v4173_v5 = vpop.f32.mrb[207].mxu1  ;;  %5162 = vmatprep.mubr.f32.mxu0 %v4171_v37 }
 0x8a7   : > { %v4176_v50 = vpop.f32.mrb[208].mxu1 }
 0x8a8   : > { %v4178_v61 = vpop.f32.mrb[209].mxu1  ;;  %5163 = vmatmul.mubr.f32.gmra.mrb[32].mxu0 %v4176_v50 }
 0x8ab   : > { %v4181_v14 = vpop.f32.mrb[210].mxu1 }
 0x8ac   : > { %v4183_v58 = vpop.f32.mrb[211].mxu1  ;;  %5165 = vmatprep.mubr.f32.mxu0 %v4181_v14 }
 0x8af   : > { %v4186_v45 = vpop.f32.mrb[212].mxu1 }
 0x8b0   : > { %v4188_v12 = vpop.f32.mrb[213].mxu1  ;;  %5166 = vmatmul.mubr.f32.gmra.mrb[34].mxu0 %v4186_v45 }
 0x8b3   : > { %v4191_v16 = vpop.f32.mrb[214].mxu1 }
 0x8b4   : > { %v4193_v32 = vpop.f32.mrb[215].mxu1  ;;  %5168 = vmatprep.mubr.f32.mxu0 %v4191_v16 }
 0x8b7   : > { %v4196_v29 = vpop.f32.mrb[216].mxu1 }
 0x8b8   : > { %v4198_v21 = vpop.f32.mrb[217].mxu1  ;;  %5169 = vmatmul.mubr.f32.gmra.mrb[36].mxu0 %v4196_v29 }
 0x913   : > { %v5125_v11 = vpop.f32.mrb[6].mxu0 }
 0x914   : > { %v4293_v34 = vadd.f32 %v5125_v11, %v9000_v59  ;;  %v4287_v17 = vpop.f32.mrb[7].mxu0 }
 0x915   : > { %v4288_v49 = vadd.f32 %v9000_v59, %v4287_v17 }
 0x916   : > { %6246 = vtanh.f32 %v4293_v34 }
 0x917   : > { %6248 = vtanh.f32 %v4288_v49 }
 0x91b   : > { %v5128_v54 = vpop.f32.mrb[8].mxu0 }
 0x91c   : > { %v4303_v56 = vadd.f32 %v5128_v54, %v9000_v59  ;;  %v4297_v57 = vpop.f32.mrb[9].mxu0 }
 0x91d   : > { %v4298_v30 = vadd.f32 %v9000_v59, %v4297_v57 }
 0x91e   : > { %6250 = vtanh.f32 %v4303_v56 }
 0x91f   : > { %6252 = vtanh.f32 %v4298_v30 }
 0x920   : > { %v6247_v3 = vpop.eup %6246 }
 0x921   : > { %v6249_v22 = vpop.eup %6248  ;;  %4479 = vst [vmem:[%s9011_s8 + $0x8] sm:$0xff] %v6247_v3 }
 0x922   : > { %4478 = vst [vmem:[%s9011_s8] sm:$0xff] %v6249_v22 }
 0x923   : > { %v5131_v33 = vpop.f32.mrb[10].mxu0 }
 0x924   : > { %v4313_v48 = vadd.f32 %v5131_v33, %v9000_v59  ;;  %v4307_v0 = vpop.f32.mrb[11].mxu0 }
 0x925   : > { %v4308_v25 = vadd.f32 %v9000_v59, %v4307_v0 }
 0x926   : > { %6254 = vtanh.f32 %v4313_v48 }
 0x927   : > { %6256 = vtanh.f32 %v4308_v25 }
 0x928   : > { %v6251_v63 = vpop.eup %6250 }
 0x929   : > { %v6253_v26 = vpop.eup %6252  ;;  %4481 = vst [vmem:[%s9011_s8 + $0x18] sm:$0xff] %v6251_v63 }
 0x92a   : > { %4480 = vst [vmem:[%s9011_s8 + $0x10] sm:$0xff] %v6253_v26 }
 0x92b   : > { %v5134_v23 = vpop.f32.mrb[12].mxu0 }
 0x92c   : > { %v4323_v7 = vadd.f32 %v5134_v23, %v9000_v59  ;;  %v4317_v24 = vpop.f32.mrb[13].mxu0 }
 0x92d   : > { %v4318_v52 = vadd.f32 %v9000_v59, %v4317_v24 }
 0x92e   : > { %6258 = vtanh.f32 %v4323_v7 }
 0x92f   : > { %6260 = vtanh.f32 %v4318_v52 }
 0x930   : > { %v6255_v1 = vpop.eup %6254 }
 0x931   : > { %v6257_v46 = vpop.eup %6256  ;;  %4483 = vst [vmem:[%s9011_s8 + $0x28] sm:$0xff] %v6255_v1 }
 0x932   : > { %4482 = vst [vmem:[%s9011_s8 + $0x20] sm:$0xff] %v6257_v46 }
 0x933   : > { %v5137_v53 = vpop.f32.mrb[14].mxu0 }
 0x934   : > { %v4333_v47 = vadd.f32 %v5137_v53, %v9000_v59  ;;  %v4327_v42 = vpop.f32.mrb[15].mxu0 }
 0x935   : > { %v4328_v4 = vadd.f32 %v9000_v59, %v4327_v42 }
 0x936   : > { %6262 = vtanh.f32 %v4333_v47 }
 0x937   : > { %6264 = vtanh.f32 %v4328_v4 }
 0x938   : > { %v6259_v13 = vpop.eup %6258 }
 0x939   : > { %v6261_v51 = vpop.eup %6260  ;;  %4485 = vst [vmem:[%s9011_s8 + $0x38] sm:$0xff] %v6259_v13 }
 0x93a   : > { %4484 = vst [vmem:[%s9011_s8 + $0x30] sm:$0xff] %v6261_v51 }
 0x93b   : > { %v5140_v8 = vpop.f32.mrb[16].mxu0 }
 0x93c   : > { %v4343_v41 = vadd.f32 %v5140_v8, %v9000_v59  ;;  %v4337_v2 = vpop.f32.mrb[17].mxu0 }
 0x93d   : > { %v4338_v55 = vadd.f32 %v9000_v59, %v4337_v2 }
 0x93e   : > { %6266 = vtanh.f32 %v4343_v41 }
 0x93f   : > { %6268 = vtanh.f32 %v4338_v55 }
 0x940   : > { %v6263_v43 = vpop.eup %6262 }
 0x941   : > { %v6265_v10 = vpop.eup %6264  ;;  %4487 = vst [vmem:[%s9011_s8 + $0x48] sm:$0xff] %v6263_v43 }
 0x942   : > { %4486 = vst [vmem:[%s9011_s8 + $0x40] sm:$0xff] %v6265_v10 }
 0x943   : > { %v5143_v9 = vpop.f32.mrb[18].mxu0 }
 0x944   : > { %v4353_v15 = vadd.f32 %v5143_v9, %v9000_v59  ;;  %v4347_v62 = vpop.f32.mrb[19].mxu0 }
 0x945   : > { %v4348_v39 = vadd.f32 %v9000_v59, %v4347_v62 }
 0x946   : > { %6270 = vtanh.f32 %v4353_v15 }
 0x947   : > { %6272 = vtanh.f32 %v4348_v39 }
 0x948   : > { %v6267_v28 = vpop.eup %6266 }
 0x949   : > { %v6269_v20 = vpop.eup %6268  ;;  %4489 = vst [vmem:[%s9011_s8 + $0x58] sm:$0xff] %v6267_v28 }
 0x94a   : > { %4488 = vst [vmem:[%s9011_s8 + $0x50] sm:$0xff] %v6269_v20 }
 0x94b   : > { %v5146_v6 = vpop.f32.mrb[20].mxu0 }
 0x94c   : > { %v4363_v27 = vadd.f32 %v5146_v6, %v9000_v59  ;;  %v4357_v35 = vpop.f32.mrb[21].mxu0 }
 0x94d   : > { %v4358_v31 = vadd.f32 %v9000_v59, %v4357_v35 }
 0x94e   : > { %6274 = vtanh.f32 %v4363_v27 }
 0x94f   : > { %6276 = vtanh.f32 %v4358_v31 }
 0x950   : > { %v6271_v19 = vpop.eup %6270 }
 0x951   : > { %v6273_v60 = vpop.eup %6272  ;;  %4491 = vst [vmem:[%s9011_s8 + $0x68] sm:$0xff] %v6271_v19 }
 0x952   : > { %4490 = vst [vmem:[%s9011_s8 + $0x60] sm:$0xff] %v6273_v60 }
 0x953   : > { %v5149_v40 = vpop.f32.mrb[22].mxu0 }
 0x954   : > { %v4373_v36 = vadd.f32 %v5149_v40, %v9000_v59  ;;  %v4367_v44 = vpop.f32.mrb[23].mxu0 }
 0x955   : > { %v4368_v18 = vadd.f32 %v9000_v59, %v4367_v44 }
 0x956   : > { %6278 = vtanh.f32 %v4373_v36 }
 0x957   : > { %6280 = vtanh.f32 %v4368_v18 }
 0x958   : > { %v6275_v38 = vpop.eup %6274 }
 0x959   : > { %v6277_v37 = vpop.eup %6276  ;;  %4493 = vst [vmem:[%s9011_s8 + $0x78] sm:$0xff] %v6275_v38 }
 0x95a   : > { %4492 = vst [vmem:[%s9011_s8 + $0x70] sm:$0xff] %v6277_v37 }
 0x95b   : > { %v5152_v5 = vpop.f32.mrb[24].mxu0 }
 0x95c   : > { %v4383_v50 = vadd.f32 %v5152_v5, %v9000_v59  ;;  %v4377_v61 = vpop.f32.mrb[25].mxu0 }
 0x95d   : > { %v4378_v14 = vadd.f32 %v9000_v59, %v4377_v61 }
 0x95e   : > { %6282 = vtanh.f32 %v4383_v50 }
 0x95f   : > { %6284 = vtanh.f32 %v4378_v14 }
 0x960   : > { %v6279_v58 = vpop.eup %6278 }
 0x961   : > { %v6281_v45 = vpop.eup %6280  ;;  %4495 = vst [vmem:[%s9011_s8 + $0x88] sm:$0xff] %v6279_v58 }
 0x962   : > { %4494 = vst [vmem:[%s9011_s8 + $0x80] sm:$0xff] %v6281_v45 }
 0x963   : > { %v5155_v12 = vpop.f32.mrb[26].mxu0 }
 0x964   : > { %v4393_v16 = vadd.f32 %v5155_v12, %v9000_v59  ;;  %v4387_v32 = vpop.f32.mrb[27].mxu0 }
 0x965   : > { %v4388_v29 = vadd.f32 %v9000_v59, %v4387_v32 }
 0x966   : > { %6286 = vtanh.f32 %v4393_v16 }
 0x967   : > { %6288 = vtanh.f32 %v4388_v29 }
 0x968   : > { %v6283_v21 = vpop.eup %6282 }
 0x969   : > { %v6285_v11 = vpop.eup %6284  ;;  %4497 = vst [vmem:[%s9011_s8 + $0x98] sm:$0xff] %v6283_v21 }
 0x96a   : > { %4496 = vst [vmem:[%s9011_s8 + $0x90] sm:$0xff] %v6285_v11 }
 0x96b   : > { %v5158_v34 = vpop.f32.mrb[28].mxu0 }
 0x96c   : > { %v4403_v17 = vadd.f32 %v5158_v34, %v9000_v59  ;;  %v4397_v49 = vpop.f32.mrb[29].mxu0 }
 0x96d   : > { %v4398_v54 = vadd.f32 %v9000_v59, %v4397_v49 }
 0x96e   : > { %6290 = vtanh.f32 %v4403_v17 }
 0x96f   : > { %6292 = vtanh.f32 %v4398_v54 }
 0x970   : > { %v6287_v56 = vpop.eup %6286 }
 0x971   : > { %v6289_v57 = vpop.eup %6288  ;;  %4499 = vst [vmem:[%s9011_s8 + $0xa8] sm:$0xff] %v6287_v56 }
 0x972   : > { %4498 = vst [vmem:[%s9011_s8 + $0xa0] sm:$0xff] %v6289_v57 }
 0x973   : > { %v5161_v30 = vpop.f32.mrb[30].mxu0 }
 0x974   : > { %v4413_v3 = vadd.f32 %v5161_v30, %v9000_v59  ;;  %v4407_v22 = vpop.f32.mrb[31].mxu0 }
 0x975   : > { %v4408_v33 = vadd.f32 %v9000_v59, %v4407_v22 }
 0x976   : > { %6294 = vtanh.f32 %v4413_v3 }
 0x977   : > { %6296 = vtanh.f32 %v4408_v33 }
 0x978   : > { %v6291_v48 = vpop.eup %6290 }
 0x979   : > { %v6293_v0 = vpop.eup %6292  ;;  %4501 = vst [vmem:[%s9011_s8 + $0xb8] sm:$0xff] %v6291_v48 }
 0x97a   : > { %4500 = vst [vmem:[%s9011_s8 + $0xb0] sm:$0xff] %v6293_v0 }
 0x97b   : > { %v5164_v25 = vpop.f32.mrb[32].mxu0 }
 0x97c   : > { %v4423_v63 = vadd.f32 %v5164_v25, %v9000_v59  ;;  %v4417_v26 = vpop.f32.mrb[33].mxu0 }
 0x97d   : > { %v4418_v23 = vadd.f32 %v9000_v59, %v4417_v26 }
 0x97e   : > { %6298 = vtanh.f32 %v4423_v63 }
 0x97f   : > { %6300 = vtanh.f32 %v4418_v23 }
 0x980   : > { %v6295_v7 = vpop.eup %6294 }
 0x981   : > { %v6297_v24 = vpop.eup %6296  ;;  %4503 = vst [vmem:[%s9011_s8 + $0xc8] sm:$0xff] %v6295_v7 }
 0x982   : > { %4502 = vst [vmem:[%s9011_s8 + $0xc0] sm:$0xff] %v6297_v24 }
 0x983   : > { %v5167_v52 = vpop.f32.mrb[34].mxu0 }
 0x984   : > { %v4433_v1 = vadd.f32 %v5167_v52, %v9000_v59  ;;  %v4427_v46 = vpop.f32.mrb[35].mxu0 }
 0x985   : > { %v4428_v53 = vadd.f32 %v9000_v59, %v4427_v46 }
 0x986   : > { %6302 = vtanh.f32 %v4433_v1 }
 0x987   : > { %6304 = vtanh.f32 %v4428_v53 }
 0x988   : > { %v6299_v47 = vpop.eup %6298 }
 0x989   : > { %v6301_v42 = vpop.eup %6300  ;;  %4505 = vst [vmem:[%s9011_s8 + $0xd8] sm:$0xff] %v6299_v47 }
 0x98a   : > { %4504 = vst [vmem:[%s9011_s8 + $0xd0] sm:$0xff] %v6301_v42 }
 0x98b   : > { %v5170_v4 = vpop.f32.mrb[36].mxu0 }
 0x98c   : > { %v4443_v13 = vadd.f32 %v5170_v4, %v9000_v59  ;;  %v4437_v51 = vpop.f32.mrb[37].mxu0 }
 0x98d   : > { %v4438_v8 = vadd.f32 %v9000_v59, %v4437_v51 }
 0x98e   : > { %6306 = vtanh.f32 %v4443_v13 }
 0x98f   : > { %6308 = vtanh.f32 %v4438_v8 }
 0x990   : > { %v6303_v41 = vpop.eup %6302 }
 0x991   : > { %v6305_v2 = vpop.eup %6304  ;;  %4507 = vst [vmem:[%s9011_s8 + $0xe8] sm:$0xff] %v6303_v41 }
 0x992   : > { %4506 = vst [vmem:[%s9011_s8 + $0xe0] sm:$0xff] %v6305_v2 }
 0x998   : > { %v6307_v55 = vpop.eup %6306 }
 0x999   : > { %v6309_v43 = vpop.eup %6308  ;;  %4509 = vst [vmem:[%s9011_s8 + $0xf8] sm:$0xff] %v6307_v55 }
 0x99a   : > { %4508 = vst [vmem:[%s9011_s8 + $0xf0] sm:$0xff] %v6309_v43 }
 0x99b PF: > { %s19_s21 = sadd.s32 1, %s6441_s21  }
 0x99c   : > { %p16_p7 = scmp.ge.s32.totalorder %s19_s21, 4  }
 0x99e   :  { %18 = sbr.rel (!%p16_p7) target bundleno = 3 (0x3), region = 93 }
 0x9a5   :  { %4532 = vsyncpa [#allocation3], 1 }
 0x9a6   :  { %4534 = vsyncpa [#allocation3 + $0x1], 1 }
 0x9a7   :  { %4535 = vsyncpa [#allocation5], 1 }
 0x9a8   :  { %4536 = vsyncpa [#allocation8], 1 }

</bundles_post_ra>
